<compile_context>
chip_gen: v7x
topology: tpu7x:2x2x1
jax: 0.10.0
libtpu: 0.0.40
codegen_flags: <defaults>
</compile_context>

<pallas_src>
import functools

import jax
import jax.numpy as jnp
from jax.experimental import pallas as pl
from jax.experimental.pallas import tpu as pltpu


# Fixed order of the fused parameter tensors inside the packed weight slab.
_PARAM_ORDER = (
    'bn_gamma', 'bn_beta',
    'e_wih', 'e_whh', 'e_b',
    'd_wih', 'd_b', 'd_whh', 'w_dec', 'bdin',
    'l12w', 'l12b',
    'inw', 'inb', 'wor', 'bor',
    'fwt', 'fb',
)


# ----------------------------------------------------------------------------
# Single fused kernel: BatchNorm + encoder LSTM + decoder LSTM (fused feedback)
# + hoisted linear_1/linear_2 + num_attention_layer x (self-MHA + fused
# out_proj/linear + residual + ReLU) + final Linear + exp, packed output slab.
# ----------------------------------------------------------------------------
def proportion_kernel(x_ref, w_ref, out_ref, *, offsets, dims, num_head, num_layers):
    C, H, D_in, Hh, D_out, E, T = dims
    hd = E // num_head

    def P(name):
        off, r, c = offsets[name]               # static, sublane-aligned slice
        return w_ref[off:off + r, :c]

    bn_gamma = P('bn_gamma'); bn_beta = P('bn_beta')
    e_wih = P('e_wih'); e_whh = P('e_whh'); e_b = P('e_b')
    d_wih = P('d_wih'); d_b = P('d_b'); d_whh = P('d_whh')
    w_dec = P('w_dec'); bdin = P('bdin')
    l12w = P('l12w'); l12b = P('l12b')
    inw = P('inw'); inb = P('inb'); wor = P('wor'); bor = P('bor')
    fwt = P('fwt'); fb = P('fb')

    x = x_ref[...]                               # (C, H, D_in)
    x2 = x.reshape(C * H, D_in)

    # --- BatchNorm1d, training-mode biased batch stats over (C, H) per feature.
    # TODO(synk): eval-mode BatchNorm would use running_mean / running_var instead.
    # TODO(synk): for large C*H, fold (scale, shift) into e_wih/e_b instead of
    # materializing xn2 (needs a (D_in,1) column relayout of `scale`).
    mean = jnp.mean(x2, axis=0, keepdims=True)
    var = jnp.mean((x2 - mean) ** 2, axis=0, keepdims=True)
    scale = bn_gamma * jax.lax.rsqrt(var + 1e-5)
    shift = bn_beta - mean * scale
    xn2 = x2 * scale + shift                     # (C*H, D_in)

    def gates(pre, c):
        # gate columns pre-permuted to [i, f, o, g] -> contiguous sigmoid block
        sig = jax.nn.sigmoid(pre[:, :3 * Hh])
        g = jnp.tanh(pre[:, 3 * Hh:])
        i = sig[:, :Hh]
        f = sig[:, Hh:2 * Hh]
        o = sig[:, 2 * Hh:3 * Hh]
        c_new = f * c + i * g
        return o * jnp.tanh(c_new), c_new

    # --- encoder LSTM: input projection hoisted off the serial recurrence.
    xg = (jnp.dot(xn2, e_wih, preferred_element_type=jnp.float32) + e_b
          ).reshape(C, H, 4 * Hh)
    h = jnp.zeros((C, Hh), jnp.float32)
    c = jnp.zeros((C, Hh), jnp.float32)
    # TODO(synk): switch to lax.fori_loop(..., unroll=True) if H/T grow beyond ~16
    # (static unroll does not bound live ranges -> vreg pressure cliff).
    for t in range(H):
        if t == 0:
            pre = xg[:, 0, :]                    # h == 0 -> skip the recurrent matmul
        else:
            pre = xg[:, t, :] + jnp.dot(h, e_whh, preferred_element_type=jnp.float32)
        h, c = gates(pre, c)

    # --- decoder LSTM seeded with the encoder cache.
    # step 0 input = BN'd last encoder timestep through d_wih;
    # steps >= 1: feedback linear_1 fused into the recurrence
    #   pre = h @ (l1_w@d_wih + d_whh) + (l1_b@d_wih + d_b)
    xn_last = xn2.reshape(C, H, D_in)[:, H - 1, :]
    in0 = jnp.dot(xn_last, d_wih, preferred_element_type=jnp.float32) + d_b
    hs = []
    for t in range(T):
        if t == 0:
            pre = in0 + jnp.dot(h, d_whh, preferred_element_type=jnp.float32)
        else:
            pre = jnp.dot(h, w_dec, preferred_element_type=jnp.float32) + bdin
        h, c = gates(pre, c)
        hs.append(h)

    # linear_1 -> linear_2 projection hoisted out of the loop: one MXU op,
    # result stays in vregs and feeds attention directly.
    h_all = jnp.stack(hs, axis=0).reshape(T * C, Hh)
    dec_all = jnp.dot(h_all, l12w, preferred_element_type=jnp.float32) + l12b   # (T*C, D_out)

    # --- attention stack: same weights reused every layer (the reference module
    # calls the single mha_with_residual module num_attention_layer times).
    # batch=T, seq=C (batch_first on the stacked decoder outputs).
    # TODO(synk): fully batch heads with a (T*num_head)-batched einsum once the
    # required 4-D (T,C,nh,hd)->(T,nh,C,hd) transpose lowers cleanly in Mosaic;
    # TODO(synk): tile over query blocks (flash-style) before C ~ 2K so the
    # (T,C,C) score tensor stays under the 64 MiB v7x VMEM ceiling.
    val2 = dec_all                                # D_out == E
    for _ in range(num_layers):
        qkv = jnp.dot(val2, inw, preferred_element_type=jnp.float32) + inb      # (T*C, 3E)
        ctx_heads = []
        for n in range(num_head):
            qh = qkv[:, n * hd:(n + 1) * hd].reshape(T, C, hd)
            kh = qkv[:, E + n * hd:E + (n + 1) * hd].reshape(T, C, hd)
            vh = qkv[:, 2 * E + n * hd:2 * E + (n + 1) * hd].reshape(T, C, hd)
            sc = jnp.einsum('tqd,tkd->tqk', qh, kh,
                            preferred_element_type=jnp.float32)                 # (T, C, C)
            sc = sc - jnp.max(sc, axis=-1, keepdims=True)
            p = jnp.exp(sc)
            p = p * pl.reciprocal(jnp.sum(p, axis=-1, keepdims=True), approx=True)
            ctx_heads.append(jnp.einsum('tqk,tkd->tqd', p, vh,
                                        preferred_element_type=jnp.float32))    # (T, C, hd)
        # lane-concat heads -> ONE fused (out_proj @ residual-linear) matmul
        ctx = jnp.concatenate(ctx_heads, axis=-1).reshape(T * C, E)
        val2 = jnp.maximum(
            jnp.dot(ctx, wor, preferred_element_type=jnp.float32) + bor + val2, 0.0)

    # --- final Linear(E -> 1) as multiply + lane-reduce, then exp.
    fin = jnp.sum(val2 * fwt, axis=-1, keepdims=True) + fb                       # (T*C, 1)
    outv = jnp.exp(fin)

    # single lane-dense output slab: [dec_outs | value | out | zero pad]
    pieces = [dec_all, val2, outv]
    pad = out_ref.shape[1] - (D_out + E + 1)
    if pad > 0:
        pieces.append(jnp.zeros((T * C, pad), jnp.float32))
    out_ref[...] = jnp.concatenate(pieces, axis=-1)


# ----------------------------------------------------------------------------
# JAX wrapper (glue) implementing proportion_model.forward
# ----------------------------------------------------------------------------
def _round_up(n, m):
    return -(-n // m) * m


def _permute_gates(w, Hh):
    # PyTorch LSTM gate order [i, f, g, o] -> [i, f, o, g] (contiguous sigmoid gates)
    return jnp.concatenate(
        [w[..., :2 * Hh], w[..., 3 * Hh:4 * Hh], w[..., 2 * Hh:3 * Hh]], axis=-1)


def _prepare_fused_params(params, num_head):
    Hh = params['e_whh'].shape[0]
    E = params['in_proj_w'].shape[0]
    hd = E // num_head

    e_wih = _permute_gates(params['e_wih'], Hh)
    e_whh = _permute_gates(params['e_whh'], Hh)
    e_b = _permute_gates(params['e_b'], Hh)
    d_wih = _permute_gates(params['d_wih'], Hh)
    d_whh = _permute_gates(params['d_whh'], Hh)
    d_b = _permute_gates(params['d_b'], Hh)

    # decoder feedback fusion: dec_in_{t+1}@d_wih + d_b == h_t@(l1_w@d_wih) + (l1_b@d_wih + d_b)
    wdin = params['l1_w'] @ d_wih
    bdin = params['l1_b'] @ d_wih + d_b
    w_dec = wdin + d_whh                       # feedback + recurrence fold (steps >= 1 only)
    # linear_1 -> linear_2 fusion (hoisted off the serial recurrence)
    l12w = params['l1_w'] @ params['l2_w']
    l12b = params['l1_b'] @ params['l2_w'] + params['l2_b']

    # fold the 1/sqrt(head_dim) attention scale into the q columns of in_proj
    scaleq = 1.0 / float(hd) ** 0.5
    qscale = jnp.concatenate([jnp.full((E,), scaleq, jnp.float32),
                              jnp.ones((2 * E,), jnp.float32)])[None, :]
    inw = params['in_proj_w'] * qscale
    inb = params['in_proj_b'] * qscale
    # fold MHA out_proj into the residual-block linear
    wor = params['out_proj_w'] @ params['res_lin_w']
    bor = params['out_proj_b'] @ params['res_lin_w'] + params['res_lin_b']

    return dict(bn_gamma=params['bn_gamma'], bn_beta=params['bn_beta'],
                e_wih=e_wih, e_whh=e_whh, e_b=e_b,
                d_wih=d_wih, d_b=d_b, d_whh=d_whh, w_dec=w_dec, bdin=bdin,
                l12w=l12w, l12b=l12b, inw=inw, inb=inb, wor=wor, bor=bor,
                fwt=params['fin_w'].T, fb=params['fin_b'])


def _pack_weight_slab(fp):
    """Pack all fused 2-D params into one (rows, 128k) slab: one DMA, static slices."""
    arrs = [fp[k] for k in _PARAM_ORDER]
    lane_w = _round_up(max(int(a.shape[-1]) for a in arrs), 128)
    parts, offsets, row = [], {}, 0
    for name, a in zip(_PARAM_ORDER, arrs):
        a = a.astype(jnp.float32)
        r, c = a.shape
        pr = _round_up(r, 8)                   # sublane-align every block
        block = jnp.zeros((pr, lane_w), jnp.float32).at[:r, :c].set(a)
        parts.append(block)
        offsets[name] = (row, r, c)
        row += pr
    return jnp.concatenate(parts, axis=0), offsets


def proportion_model_forward(target_len, inp, params, *, num_head, num_attention_layer):
    # layout: inp is (C, H, dim); inp[:, 0, -1] holds integer embedding indices.
    C, H, _ = inp.shape
    feat = inp[:, :, :-1]                            # (C, H, dim-1)
    idx = inp[:, 0, -1].astype(jnp.int32)            # (C,)

    # nn.Embedding(max_norm=True) -> renormalize looked-up rows to L2 norm <= 1.0
    # (data-dependent gather; kept in plain JAX)
    emb = params['emb'][idx]                         # (C, E_hts)
    norm = jnp.sqrt(jnp.sum(emb * emb, axis=-1, keepdims=True))
    emb = emb * jnp.minimum(1.0, 1.0 / (norm + 1e-7))
    emb = jnp.broadcast_to(emb[:, None, :], (C, H, emb.shape[-1]))
    x = jnp.concatenate([feat, emb], axis=-1).astype(jnp.float32)    # (C, H, D_in)

    D_in = x.shape[-1]
    Hh = params['e_whh'].shape[0]
    D_out = params['l2_w'].shape[1]
    E = params['in_proj_w'].shape[0]
    hd = E // num_head
    T = target_len
    assert D_out == E, "mha_embedd_dim must equal lstm_output_dim"
    # TODO(synk): only lstm_num_layer == 1 is implemented.

    fp = _prepare_fused_params(params, num_head)
    slab, offsets = _pack_weight_slab(fp)
    lane_out = _round_up(D_out + E + 1, 128)

    # advisory cost estimate so XLA schedules the call sensibly vs. the glue ops
    mm = lambda m, k, n: 2 * m * k * n
    flops = (mm(C * H, D_in, 4 * Hh) + (H - 1) * mm(C, Hh, 4 * Hh)
             + mm(C, D_in, 4 * Hh) + T * mm(C, Hh, 4 * Hh)
             + mm(T * C, Hh, D_out)
             + num_attention_layer * (mm(T * C, E, 3 * E)
                                      + num_head * T * 2 * mm(C, C, hd)
                                      + mm(T * C, E, E))
             + 2 * T * C * E)
    transc = ((H + T) * C * 5 * Hh
              + num_attention_layer * num_head * T * C * (C + 1)
              + T * C)
    bytes_acc = 4 * (int(x.size) + int(slab.size) + T * C * lane_out)
    cost = pl.CostEstimate(flops=int(flops), transcendentals=int(transc),
                           bytes_accessed=int(bytes_acc))

    # TODO(synk): for many independent (C,H) instances add a leading "parallel"
    # grid axis (dimension_semantics) so v7x's second TensorCore is used and
    # per-call launch/DMA overhead is amortized.
    packed = pl.pallas_call(
        functools.partial(proportion_kernel, offsets=offsets,
                          dims=(C, H, D_in, Hh, D_out, E, T),
                          num_head=num_head, num_layers=num_attention_layer),
        out_shape=jax.ShapeDtypeStruct((T * C, lane_out), jnp.float32),
        in_specs=[pl.BlockSpec(memory_space=pltpu.MemorySpace.VMEM),
                  pl.BlockSpec(memory_space=pltpu.MemorySpace.VMEM)],
        out_specs=pl.BlockSpec(memory_space=pltpu.MemorySpace.VMEM),
        cost_estimate=cost,
    )(x, slab)

    dec_outs = packed[:, :D_out].reshape(T, C, D_out)
    value = packed[:, D_out:D_out + E].reshape(T, C, E)
    out = packed[:, D_out + E:D_out + E + 1].reshape(T, C, 1)
    return out, dec_outs, value


# ----------------------------------------------------------------------------
# Deterministic parameter init (synthetic; shapes follow the module's __init__)
# ----------------------------------------------------------------------------
def init_params(key, *, num_hts_embedd, hts_embedd_dim, D_in, Hh, D_lstm_out, E):
    ks = jax.random.split(key, 20)

    def w(k, shape, scale=0.1):
        return (scale * jax.random.normal(k, shape)).astype(jnp.float32)

    return {
        'emb': w(ks[0], (num_hts_embedd, hts_embedd_dim), 1.0),
        'bn_gamma': jnp.ones((1, D_in), jnp.float32),
        'bn_beta': jnp.zeros((1, D_in), jnp.float32),
        # encoder LSTM (weights pre-transposed to (in, 4*hidden); bias = b_ih + b_hh)
        'e_wih': w(ks[1], (D_in, 4 * Hh)),
        'e_whh': w(ks[2], (Hh, 4 * Hh)),
        'e_b': w(ks[3], (1, 4 * Hh)),
        # decoder LSTM
        'd_wih': w(ks[4], (D_in, 4 * Hh)),
        'd_whh': w(ks[5], (Hh, 4 * Hh)),
        'd_b': w(ks[6], (1, 4 * Hh)),
        # decoder linear_1: hidden -> lstm_input_dim ; linear_2: lstm_input_dim -> lstm_output_dim
        'l1_w': w(ks[7], (Hh, D_in)),
        'l1_b': w(ks[8], (1, D_in)),
        'l2_w': w(ks[9], (D_in, D_lstm_out)),
        'l2_b': w(ks[10], (1, D_lstm_out)),
        # MultiheadAttention in/out projections (pre-transposed)
        'in_proj_w': w(ks[11], (E, 3 * E)),
        'in_proj_b': w(ks[12], (1, 3 * E)),
        'out_proj_w': w(ks[13], (E, E)),
        'out_proj_b': w(ks[14], (1, E)),
        # residual-block linear
        'res_lin_w': w(ks[15], (E, E)),
        'res_lin_b': w(ks[16], (1, E)),
        # final output linear (-> 1) followed by exp
        'fin_w': w(ks[17], (E, 1)),
        'fin_b': w(ks[18], (1, 1)),
    }


if __name__ == "__main__":
    # Small, consistent configuration
    C, H = 4, 8                       # children, history length
    feat_dim = 4                      # numeric features per timestep
    hts_embedd_dim = 4
    num_hts_embedd = 8
    lstm_input_dim = feat_dim + hts_embedd_dim     # 8
    lstm_hidden_dim = 16
    lstm_output_dim = 16
    mha_embedd_dim = mha_output_dim = 16           # must equal lstm_output_dim
    num_head = 2
    num_attention_layer = 2
    model_output_dim = 1
    target_len = 4

    key = jax.random.PRNGKey(0)
    kp, kx = jax.random.split(key)
    params = init_params(kp,
                         num_hts_embedd=num_hts_embedd,
                         hts_embedd_dim=hts_embedd_dim,
                         D_in=lstm_input_dim,
                         Hh=lstm_hidden_dim,
                         D_lstm_out=lstm_output_dim,
                         E=mha_embedd_dim)

    # Build input (C, H, feat_dim + 1): last column = embedding index (as float)
    feats = jax.random.normal(kx, (C, H, feat_dim), jnp.float32)
    idx_col = jnp.broadcast_to(
        (jnp.arange(C) % num_hts_embedd).astype(jnp.float32)[:, None, None], (C, H, 1))
    inp = jnp.concatenate([feats, idx_col], axis=-1)

    fwd = jax.jit(functools.partial(proportion_model_forward, target_len,
                                    num_head=num_head,
                                    num_attention_layer=num_attention_layer))
    out, dec_outs, value = fwd(inp, params)
    jax.block_until_ready((out, dec_outs, value))

    assert out.shape == (target_len, C, model_output_dim)
    assert dec_outs.shape == (target_len, C, lstm_output_dim)
    assert value.shape == (target_len, C, mha_output_dim)
    assert bool(jnp.all(out > 0.0))          # exp(...) is strictly positive
    assert bool(jnp.all(value >= 0.0))       # ReLU output is non-negative
    assert bool(jnp.all(jnp.isfinite(out)))
    print("KERNEL_OK")
</pallas_src>

<mosaic_0001>
module attributes {stable_mosaic.version = 11 : i64} {
  func.func @proportion_kernel(%arg0: memref<4x8x8xf32, #tpu.memory_space<vmem>>, %arg1: memref<192x128xf32, #tpu.memory_space<vmem>>, %arg2: memref<16x128xf32, #tpu.memory_space<vmem>>) attributes {dimension_semantics = [], scalar_prefetch = 0 : i64, scratch_operands = 0 : i64, tpu.core_type = #tpu.core_type<tc>} {
    %c0 = arith.constant 0 : index
    %c0_0 = arith.constant 0 : index
    %0 = vector.load %arg1[%c0, %c0_0] : memref<192x128xf32, #tpu.memory_space<vmem>>, vector<1x8xf32>
    %c8 = arith.constant 8 : index
    %c0_1 = arith.constant 0 : index
    %1 = vector.load %arg1[%c8, %c0_1] : memref<192x128xf32, #tpu.memory_space<vmem>>, vector<1x8xf32>
    %c16 = arith.constant 16 : index
    %c0_2 = arith.constant 0 : index
    %2 = vector.load %arg1[%c16, %c0_2] : memref<192x128xf32, #tpu.memory_space<vmem>>, vector<8x64xf32>
    %c24 = arith.constant 24 : index
    %c0_3 = arith.constant 0 : index
    %3 = vector.load %arg1[%c24, %c0_3] : memref<192x128xf32, #tpu.memory_space<vmem>>, vector<16x64xf32>
    %c40 = arith.constant 40 : index
    %c0_4 = arith.constant 0 : index
    %4 = vector.load %arg1[%c40, %c0_4] : memref<192x128xf32, #tpu.memory_space<vmem>>, vector<1x64xf32>
    %c48 = arith.constant 48 : index
    %c0_5 = arith.constant 0 : index
    %5 = vector.load %arg1[%c48, %c0_5] : memref<192x128xf32, #tpu.memory_space<vmem>>, vector<8x64xf32>
    %c56 = arith.constant 56 : index
    %c0_6 = arith.constant 0 : index
    %6 = vector.load %arg1[%c56, %c0_6] : memref<192x128xf32, #tpu.memory_space<vmem>>, vector<1x64xf32>
    %c64 = arith.constant 64 : index
    %c0_7 = arith.constant 0 : index
    %7 = vector.load %arg1[%c64, %c0_7] : memref<192x128xf32, #tpu.memory_space<vmem>>, vector<16x64xf32>
    %c80 = arith.constant 80 : index
    %c0_8 = arith.constant 0 : index
    %8 = vector.load %arg1[%c80, %c0_8] : memref<192x128xf32, #tpu.memory_space<vmem>>, vector<16x64xf32>
    %c96 = arith.constant 96 : index
    %c0_9 = arith.constant 0 : index
    %9 = vector.load %arg1[%c96, %c0_9] : memref<192x128xf32, #tpu.memory_space<vmem>>, vector<1x64xf32>
    %c104 = arith.constant 104 : index
    %c0_10 = arith.constant 0 : index
    %10 = vector.load %arg1[%c104, %c0_10] : memref<192x128xf32, #tpu.memory_space<vmem>>, vector<16x16xf32>
    %c120 = arith.constant 120 : index
    %c0_11 = arith.constant 0 : index
    %11 = vector.load %arg1[%c120, %c0_11] : memref<192x128xf32, #tpu.memory_space<vmem>>, vector<1x16xf32>
    %c128 = arith.constant 128 : index
    %c0_12 = arith.constant 0 : index
    %12 = vector.load %arg1[%c128, %c0_12] : memref<192x128xf32, #tpu.memory_space<vmem>>, vector<16x48xf32>
    %c144 = arith.constant 144 : index
    %c0_13 = arith.constant 0 : index
    %13 = vector.load %arg1[%c144, %c0_13] : memref<192x128xf32, #tpu.memory_space<vmem>>, vector<1x48xf32>
    %c152 = arith.constant 152 : index
    %c0_14 = arith.constant 0 : index
    %14 = vector.load %arg1[%c152, %c0_14] : memref<192x128xf32, #tpu.memory_space<vmem>>, vector<16x16xf32>
    %c168 = arith.constant 168 : index
    %c0_15 = arith.constant 0 : index
    %15 = vector.load %arg1[%c168, %c0_15] : memref<192x128xf32, #tpu.memory_space<vmem>>, vector<1x16xf32>
    %c176 = arith.constant 176 : index
    %c0_16 = arith.constant 0 : index
    %16 = vector.load %arg1[%c176, %c0_16] : memref<192x128xf32, #tpu.memory_space<vmem>>, vector<1x16xf32>
    %c184 = arith.constant 184 : index
    %c0_17 = arith.constant 0 : index
    %17 = vector.load %arg1[%c184, %c0_17] : memref<192x128xf32, #tpu.memory_space<vmem>>, vector<1x1xf32>
    %c0_18 = arith.constant 0 : index
    %c0_19 = arith.constant 0 : index
    %c0_20 = arith.constant 0 : index
    %18 = vector.load %arg0[%c0_18, %c0_19, %c0_20] : memref<4x8x8xf32, #tpu.memory_space<vmem>>, vector<4x8x8xf32>
    %19 = vector.shape_cast %18 : vector<4x8x8xf32> to vector<32x8xf32>
    %cst = arith.constant dense<0.000000e+00> : vector<8xf32>
    %20 = vector.multi_reduction <add>, %19, %cst [0] : vector<32x8xf32> to vector<8xf32>
    %21 = vector.shape_cast %20 : vector<8xf32> to vector<1x8xf32>
    %cst_21 = arith.constant 3.200000e+01 : f32
    %22 = vector.broadcast %cst_21 : f32 to vector<1x8xf32>
    %23 = arith.divf %21, %22 : vector<1x8xf32>
    %24 = vector.broadcast %23 : vector<1x8xf32> to vector<32x8xf32>
    %25 = arith.subf %19, %24 : vector<32x8xf32>
    %26 = arith.mulf %25, %25 : vector<32x8xf32>
    %cst_22 = arith.constant dense<0.000000e+00> : vector<8xf32>
    %27 = vector.multi_reduction <add>, %26, %cst_22 [0] : vector<32x8xf32> to vector<8xf32>
    %28 = vector.shape_cast %27 : vector<8xf32> to vector<1x8xf32>
    %cst_23 = arith.constant 3.200000e+01 : f32
    %29 = vector.broadcast %cst_23 : f32 to vector<1x8xf32>
    %30 = arith.divf %28, %29 : vector<1x8xf32>
    %cst_24 = arith.constant 9.99999974E-6 : f32
    %31 = vector.broadcast %cst_24 : f32 to vector<1x8xf32>
    %32 = arith.addf %30, %31 : vector<1x8xf32>
    %33 = math.rsqrt %32 : vector<1x8xf32>
    %34 = arith.mulf %0, %33 : vector<1x8xf32>
    %35 = arith.mulf %23, %34 : vector<1x8xf32>
    %36 = arith.subf %1, %35 : vector<1x8xf32>
    %37 = vector.broadcast %34 : vector<1x8xf32> to vector<32x8xf32>
    %38 = arith.mulf %19, %37 : vector<32x8xf32>
    %39 = vector.broadcast %36 : vector<1x8xf32> to vector<32x8xf32>
    %40 = arith.addf %38, %39 : vector<32x8xf32>
    %cst_25 = arith.constant dense<0.000000e+00> : vector<32x64xf32>
    %41 = tpu.matmul %40, %2, %cst_25 {dimension_numbers = #tpu.dot_dimension_numbers<[1], [0], [0], [1], [0, 0, 1, 1], [], []>} : vector<32x8xf32>, vector<8x64xf32>, vector<32x64xf32> -> vector<32x64xf32>
    %42 = vector.broadcast %4 : vector<1x64xf32> to vector<32x64xf32>
    %43 = arith.addf %41, %42 : vector<32x64xf32>
    %44 = vector.shape_cast %43 : vector<32x64xf32> to vector<4x8x64xf32>
    %cst_26 = arith.constant 0.000000e+00 : f32
    %45 = vector.broadcast %cst_26 : f32 to vector<4x16xf32>
    %46 = vector.extract_strided_slice %44 {offsets = [0, 0, 0], sizes = [4, 1, 64], strides = [1, 1, 1]} : vector<4x8x64xf32> to vector<4x1x64xf32>
    %47 = vector.shape_cast %46 : vector<4x1x64xf32> to vector<4x64xf32>
    %48 = vector.extract_strided_slice %47 {offsets = [0, 0], sizes = [4, 48], strides = [1, 1]} : vector<4x64xf32> to vector<4x48xf32>
    %49 = arith.negf %48 : vector<4x48xf32>
    %50 = math.exp %49 : vector<4x48xf32>
    %cst_27 = arith.constant 1.000000e+00 : f32
    %51 = vector.broadcast %cst_27 : f32 to vector<4x48xf32>
    %52 = arith.addf %51, %50 : vector<4x48xf32>
    %53 = arith.divf %51, %52 : vector<4x48xf32>
    %54 = vector.extract_strided_slice %47 {offsets = [0, 48], sizes = [4, 16], strides = [1, 1]} : vector<4x64xf32> to vector<4x16xf32>
    %55 = math.tanh %54 : vector<4x16xf32>
    %56 = vector.extract_strided_slice %53 {offsets = [0, 0], sizes = [4, 16], strides = [1, 1]} : vector<4x48xf32> to vector<4x16xf32>
    %57 = vector.extract_strided_slice %53 {offsets = [0, 16], sizes = [4, 16], strides = [1, 1]} : vector<4x48xf32> to vector<4x16xf32>
    %58 = vector.extract_strided_slice %53 {offsets = [0, 32], sizes = [4, 16], strides = [1, 1]} : vector<4x48xf32> to vector<4x16xf32>
    %59 = arith.mulf %57, %45 : vector<4x16xf32>
    %60 = arith.mulf %56, %55 : vector<4x16xf32>
    %61 = arith.addf %59, %60 : vector<4x16xf32>
    %62 = math.tanh %61 : vector<4x16xf32>
    %63 = arith.mulf %58, %62 : vector<4x16xf32>
    %64 = vector.extract_strided_slice %44 {offsets = [0, 1, 0], sizes = [4, 1, 64], strides = [1, 1, 1]} : vector<4x8x64xf32> to vector<4x1x64xf32>
    %65 = vector.shape_cast %64 : vector<4x1x64xf32> to vector<4x64xf32>
    %cst_28 = arith.constant dense<0.000000e+00> : vector<4x64xf32>
    %66 = tpu.matmul %63, %3, %cst_28 {dimension_numbers = #tpu.dot_dimension_numbers<[1], [0], [0], [1], [0, 0, 1, 1], [], []>} : vector<4x16xf32>, vector<16x64xf32>, vector<4x64xf32> -> vector<4x64xf32>
    %67 = arith.addf %65, %66 : vector<4x64xf32>
    %68 = vector.extract_strided_slice %67 {offsets = [0, 0], sizes = [4, 48], strides = [1, 1]} : vector<4x64xf32> to vector<4x48xf32>
    %69 = arith.negf %68 : vector<4x48xf32>
    %70 = math.exp %69 : vector<4x48xf32>
    %cst_29 = arith.constant 1.000000e+00 : f32
    %71 = vector.broadcast %cst_29 : f32 to vector<4x48xf32>
    %72 = arith.addf %71, %70 : vector<4x48xf32>
    %73 = arith.divf %71, %72 : vector<4x48xf32>
    %74 = vector.extract_strided_slice %67 {offsets = [0, 48], sizes = [4, 16], strides = [1, 1]} : vector<4x64xf32> to vector<4x16xf32>
    %75 = math.tanh %74 : vector<4x16xf32>
    %76 = vector.extract_strided_slice %73 {offsets = [0, 0], sizes = [4, 16], strides = [1, 1]} : vector<4x48xf32> to vector<4x16xf32>
    %77 = vector.extract_strided_slice %73 {offsets = [0, 16], sizes = [4, 16], strides = [1, 1]} : vector<4x48xf32> to vector<4x16xf32>
    %78 = vector.extract_strided_slice %73 {offsets = [0, 32], sizes = [4, 16], strides = [1, 1]} : vector<4x48xf32> to vector<4x16xf32>
    %79 = arith.mulf %77, %61 : vector<4x16xf32>
    %80 = arith.mulf %76, %75 : vector<4x16xf32>
    %81 = arith.addf %79, %80 : vector<4x16xf32>
    %82 = math.tanh %81 : vector<4x16xf32>
    %83 = arith.mulf %78, %82 : vector<4x16xf32>
    %84 = vector.extract_strided_slice %44 {offsets = [0, 2, 0], sizes = [4, 1, 64], strides = [1, 1, 1]} : vector<4x8x64xf32> to vector<4x1x64xf32>
    %85 = vector.shape_cast %84 : vector<4x1x64xf32> to vector<4x64xf32>
    %cst_30 = arith.constant dense<0.000000e+00> : vector<4x64xf32>
    %86 = tpu.matmul %83, %3, %cst_30 {dimension_numbers = #tpu.dot_dimension_numbers<[1], [0], [0], [1], [0, 0, 1, 1], [], []>} : vector<4x16xf32>, vector<16x64xf32>, vector<4x64xf32> -> vector<4x64xf32>
    %87 = arith.addf %85, %86 : vector<4x64xf32>
    %88 = vector.extract_strided_slice %87 {offsets = [0, 0], sizes = [4, 48], strides = [1, 1]} : vector<4x64xf32> to vector<4x48xf32>
    %89 = arith.negf %88 : vector<4x48xf32>
    %90 = math.exp %89 : vector<4x48xf32>
    %cst_31 = arith.constant 1.000000e+00 : f32
    %91 = vector.broadcast %cst_31 : f32 to vector<4x48xf32>
    %92 = arith.addf %91, %90 : vector<4x48xf32>
    %93 = arith.divf %91, %92 : vector<4x48xf32>
    %94 = vector.extract_strided_slice %87 {offsets = [0, 48], sizes = [4, 16], strides = [1, 1]} : vector<4x64xf32> to vector<4x16xf32>
    %95 = math.tanh %94 : vector<4x16xf32>
    %96 = vector.extract_strided_slice %93 {offsets = [0, 0], sizes = [4, 16], strides = [1, 1]} : vector<4x48xf32> to vector<4x16xf32>
    %97 = vector.extract_strided_slice %93 {offsets = [0, 16], sizes = [4, 16], strides = [1, 1]} : vector<4x48xf32> to vector<4x16xf32>
    %98 = vector.extract_strided_slice %93 {offsets = [0, 32], sizes = [4, 16], strides = [1, 1]} : vector<4x48xf32> to vector<4x16xf32>
    %99 = arith.mulf %97, %81 : vector<4x16xf32>
    %100 = arith.mulf %96, %95 : vector<4x16xf32>
    %101 = arith.addf %99, %100 : vector<4x16xf32>
    %102 = math.tanh %101 : vector<4x16xf32>
    %103 = arith.mulf %98, %102 : vector<4x16xf32>
    %104 = vector.extract_strided_slice %44 {offsets = [0, 3, 0], sizes = [4, 1, 64], strides = [1, 1, 1]} : vector<4x8x64xf32> to vector<4x1x64xf32>
    %105 = vector.shape_cast %104 : vector<4x1x64xf32> to vector<4x64xf32>
    %cst_32 = arith.constant dense<0.000000e+00> : vector<4x64xf32>
    %106 = tpu.matmul %103, %3, %cst_32 {dimension_numbers = #tpu.dot_dimension_numbers<[1], [0], [0], [1], [0, 0, 1, 1], [], []>} : vector<4x16xf32>, vector<16x64xf32>, vector<4x64xf32> -> vector<4x64xf32>
    %107 = arith.addf %105, %106 : vector<4x64xf32>
    %108 = vector.extract_strided_slice %107 {offsets = [0, 0], sizes = [4, 48], strides = [1, 1]} : vector<4x64xf32> to vector<4x48xf32>
    %109 = arith.negf %108 : vector<4x48xf32>
    %110 = math.exp %109 : vector<4x48xf32>
    %cst_33 = arith.constant 1.000000e+00 : f32
    %111 = vector.broadcast %cst_33 : f32 to vector<4x48xf32>
    %112 = arith.addf %111, %110 : vector<4x48xf32>
    %113 = arith.divf %111, %112 : vector<4x48xf32>
    %114 = vector.extract_strided_slice %107 {offsets = [0, 48], sizes = [4, 16], strides = [1, 1]} : vector<4x64xf32> to vector<4x16xf32>
    %115 = math.tanh %114 : vector<4x16xf32>
    %116 = vector.extract_strided_slice %113 {offsets = [0, 0], sizes = [4, 16], strides = [1, 1]} : vector<4x48xf32> to vector<4x16xf32>
    %117 = vector.extract_strided_slice %113 {offsets = [0, 16], sizes = [4, 16], strides = [1, 1]} : vector<4x48xf32> to vector<4x16xf32>
    %118 = vector.extract_strided_slice %113 {offsets = [0, 32], sizes = [4, 16], strides = [1, 1]} : vector<4x48xf32> to vector<4x16xf32>
    %119 = arith.mulf %117, %101 : vector<4x16xf32>
    %120 = arith.mulf %116, %115 : vector<4x16xf32>
    %121 = arith.addf %119, %120 : vector<4x16xf32>
    %122 = math.tanh %121 : vector<4x16xf32>
    %123 = arith.mulf %118, %122 : vector<4x16xf32>
    %124 = vector.extract_strided_slice %44 {offsets = [0, 4, 0], sizes = [4, 1, 64], strides = [1, 1, 1]} : vector<4x8x64xf32> to vector<4x1x64xf32>
    %125 = vector.shape_cast %124 : vector<4x1x64xf32> to vector<4x64xf32>
    %cst_34 = arith.constant dense<0.000000e+00> : vector<4x64xf32>
    %126 = tpu.matmul %123, %3, %cst_34 {dimension_numbers = #tpu.dot_dimension_numbers<[1], [0], [0], [1], [0, 0, 1, 1], [], []>} : vector<4x16xf32>, vector<16x64xf32>, vector<4x64xf32> -> vector<4x64xf32>
    %127 = arith.addf %125, %126 : vector<4x64xf32>
    %128 = vector.extract_strided_slice %127 {offsets = [0, 0], sizes = [4, 48], strides = [1, 1]} : vector<4x64xf32> to vector<4x48xf32>
    %129 = arith.negf %128 : vector<4x48xf32>
    %130 = math.exp %129 : vector<4x48xf32>
    %cst_35 = arith.constant 1.000000e+00 : f32
    %131 = vector.broadcast %cst_35 : f32 to vector<4x48xf32>
    %132 = arith.addf %131, %130 : vector<4x48xf32>
    %133 = arith.divf %131, %132 : vector<4x48xf32>
    %134 = vector.extract_strided_slice %127 {offsets = [0, 48], sizes = [4, 16], strides = [1, 1]} : vector<4x64xf32> to vector<4x16xf32>
    %135 = math.tanh %134 : vector<4x16xf32>
    %136 = vector.extract_strided_slice %133 {offsets = [0, 0], sizes = [4, 16], strides = [1, 1]} : vector<4x48xf32> to vector<4x16xf32>
    %137 = vector.extract_strided_slice %133 {offsets = [0, 16], sizes = [4, 16], strides = [1, 1]} : vector<4x48xf32> to vector<4x16xf32>
    %138 = vector.extract_strided_slice %133 {offsets = [0, 32], sizes = [4, 16], strides = [1, 1]} : vector<4x48xf32> to vector<4x16xf32>
    %139 = arith.mulf %137, %121 : vector<4x16xf32>
    %140 = arith.mulf %136, %135 : vector<4x16xf32>
    %141 = arith.addf %139, %140 : vector<4x16xf32>
    %142 = math.tanh %141 : vector<4x16xf32>
    %143 = arith.mulf %138, %142 : vector<4x16xf32>
    %144 = vector.extract_strided_slice %44 {offsets = [0, 5, 0], sizes = [4, 1, 64], strides = [1, 1, 1]} : vector<4x8x64xf32> to vector<4x1x64xf32>
    %145 = vector.shape_cast %144 : vector<4x1x64xf32> to vector<4x64xf32>
    %cst_36 = arith.constant dense<0.000000e+00> : vector<4x64xf32>
    %146 = tpu.matmul %143, %3, %cst_36 {dimension_numbers = #tpu.dot_dimension_numbers<[1], [0], [0], [1], [0, 0, 1, 1], [], []>} : vector<4x16xf32>, vector<16x64xf32>, vector<4x64xf32> -> vector<4x64xf32>
    %147 = arith.addf %145, %146 : vector<4x64xf32>
    %148 = vector.extract_strided_slice %147 {offsets = [0, 0], sizes = [4, 48], strides = [1, 1]} : vector<4x64xf32> to vector<4x48xf32>
    %149 = arith.negf %148 : vector<4x48xf32>
    %150 = math.exp %149 : vector<4x48xf32>
    %cst_37 = arith.constant 1.000000e+00 : f32
    %151 = vector.broadcast %cst_37 : f32 to vector<4x48xf32>
    %152 = arith.addf %151, %150 : vector<4x48xf32>
    %153 = arith.divf %151, %152 : vector<4x48xf32>
    %154 = vector.extract_strided_slice %147 {offsets = [0, 48], sizes = [4, 16], strides = [1, 1]} : vector<4x64xf32> to vector<4x16xf32>
    %155 = math.tanh %154 : vector<4x16xf32>
    %156 = vector.extract_strided_slice %153 {offsets = [0, 0], sizes = [4, 16], strides = [1, 1]} : vector<4x48xf32> to vector<4x16xf32>
    %157 = vector.extract_strided_slice %153 {offsets = [0, 16], sizes = [4, 16], strides = [1, 1]} : vector<4x48xf32> to vector<4x16xf32>
    %158 = vector.extract_strided_slice %153 {offsets = [0, 32], sizes = [4, 16], strides = [1, 1]} : vector<4x48xf32> to vector<4x16xf32>
    %159 = arith.mulf %157, %141 : vector<4x16xf32>
    %160 = arith.mulf %156, %155 : vector<4x16xf32>
    %161 = arith.addf %159, %160 : vector<4x16xf32>
    %162 = math.tanh %161 : vector<4x16xf32>
    %163 = arith.mulf %158, %162 : vector<4x16xf32>
    %164 = vector.extract_strided_slice %44 {offsets = [0, 6, 0], sizes = [4, 1, 64], strides = [1, 1, 1]} : vector<4x8x64xf32> to vector<4x1x64xf32>
    %165 = vector.shape_cast %164 : vector<4x1x64xf32> to vector<4x64xf32>
    %cst_38 = arith.constant dense<0.000000e+00> : vector<4x64xf32>
    %166 = tpu.matmul %163, %3, %cst_38 {dimension_numbers = #tpu.dot_dimension_numbers<[1], [0], [0], [1], [0, 0, 1, 1], [], []>} : vector<4x16xf32>, vector<16x64xf32>, vector<4x64xf32> -> vector<4x64xf32>
    %167 = arith.addf %165, %166 : vector<4x64xf32>
    %168 = vector.extract_strided_slice %167 {offsets = [0, 0], sizes = [4, 48], strides = [1, 1]} : vector<4x64xf32> to vector<4x48xf32>
    %169 = arith.negf %168 : vector<4x48xf32>
    %170 = math.exp %169 : vector<4x48xf32>
    %cst_39 = arith.constant 1.000000e+00 : f32
    %171 = vector.broadcast %cst_39 : f32 to vector<4x48xf32>
    %172 = arith.addf %171, %170 : vector<4x48xf32>
    %173 = arith.divf %171, %172 : vector<4x48xf32>
    %174 = vector.extract_strided_slice %167 {offsets = [0, 48], sizes = [4, 16], strides = [1, 1]} : vector<4x64xf32> to vector<4x16xf32>
    %175 = math.tanh %174 : vector<4x16xf32>
    %176 = vector.extract_strided_slice %173 {offsets = [0, 0], sizes = [4, 16], strides = [1, 1]} : vector<4x48xf32> to vector<4x16xf32>
    %177 = vector.extract_strided_slice %173 {offsets = [0, 16], sizes = [4, 16], strides = [1, 1]} : vector<4x48xf32> to vector<4x16xf32>
    %178 = vector.extract_strided_slice %173 {offsets = [0, 32], sizes = [4, 16], strides = [1, 1]} : vector<4x48xf32> to vector<4x16xf32>
    %179 = arith.mulf %177, %161 : vector<4x16xf32>
    %180 = arith.mulf %176, %175 : vector<4x16xf32>
    %181 = arith.addf %179, %180 : vector<4x16xf32>
    %182 = math.tanh %181 : vector<4x16xf32>
    %183 = arith.mulf %178, %182 : vector<4x16xf32>
    %184 = vector.extract_strided_slice %44 {offsets = [0, 7, 0], sizes = [4, 1, 64], strides = [1, 1, 1]} : vector<4x8x64xf32> to vector<4x1x64xf32>
    %185 = vector.shape_cast %184 : vector<4x1x64xf32> to vector<4x64xf32>
    %cst_40 = arith.constant dense<0.000000e+00> : vector<4x64xf32>
    %186 = tpu.matmul %183, %3, %cst_40 {dimension_numbers = #tpu.dot_dimension_numbers<[1], [0], [0], [1], [0, 0, 1, 1], [], []>} : vector<4x16xf32>, vector<16x64xf32>, vector<4x64xf32> -> vector<4x64xf32>
    %187 = arith.addf %185, %186 : vector<4x64xf32>
    %188 = vector.extract_strided_slice %187 {offsets = [0, 0], sizes = [4, 48], strides = [1, 1]} : vector<4x64xf32> to vector<4x48xf32>
    %189 = arith.negf %188 : vector<4x48xf32>
    %190 = math.exp %189 : vector<4x48xf32>
    %cst_41 = arith.constant 1.000000e+00 : f32
    %191 = vector.broadcast %cst_41 : f32 to vector<4x48xf32>
    %192 = arith.addf %191, %190 : vector<4x48xf32>
    %193 = arith.divf %191, %192 : vector<4x48xf32>
    %194 = vector.extract_strided_slice %187 {offsets = [0, 48], sizes = [4, 16], strides = [1, 1]} : vector<4x64xf32> to vector<4x16xf32>
    %195 = math.tanh %194 : vector<4x16xf32>
    %196 = vector.extract_strided_slice %193 {offsets = [0, 0], sizes = [4, 16], strides = [1, 1]} : vector<4x48xf32> to vector<4x16xf32>
    %197 = vector.extract_strided_slice %193 {offsets = [0, 16], sizes = [4, 16], strides = [1, 1]} : vector<4x48xf32> to vector<4x16xf32>
    %198 = vector.extract_strided_slice %193 {offsets = [0, 32], sizes = [4, 16], strides = [1, 1]} : vector<4x48xf32> to vector<4x16xf32>
    %199 = arith.mulf %197, %181 : vector<4x16xf32>
    %200 = arith.mulf %196, %195 : vector<4x16xf32>
    %201 = arith.addf %199, %200 : vector<4x16xf32>
    %202 = math.tanh %201 : vector<4x16xf32>
    %203 = arith.mulf %198, %202 : vector<4x16xf32>
    %204 = vector.shape_cast %40 : vector<32x8xf32> to vector<4x8x8xf32>
    %205 = vector.extract_strided_slice %204 {offsets = [0, 7, 0], sizes = [4, 1, 8], strides = [1, 1, 1]} : vector<4x8x8xf32> to vector<4x1x8xf32>
    %206 = vector.shape_cast %205 : vector<4x1x8xf32> to vector<4x8xf32>
    %cst_42 = arith.constant dense<0.000000e+00> : vector<4x64xf32>
    %207 = tpu.matmul %206, %5, %cst_42 {dimension_numbers = #tpu.dot_dimension_numbers<[1], [0], [0], [1], [0, 0, 1, 1], [], []>} : vector<4x8xf32>, vector<8x64xf32>, vector<4x64xf32> -> vector<4x64xf32>
    %208 = vector.broadcast %6 : vector<1x64xf32> to vector<4x64xf32>
    %209 = arith.addf %207, %208 : vector<4x64xf32>
    %cst_43 = arith.constant dense<0.000000e+00> : vector<4x64xf32>
    %210 = tpu.matmul %203, %7, %cst_43 {dimension_numbers = #tpu.dot_dimension_numbers<[1], [0], [0], [1], [0, 0, 1, 1], [], []>} : vector<4x16xf32>, vector<16x64xf32>, vector<4x64xf32> -> vector<4x64xf32>
    %211 = arith.addf %209, %210 : vector<4x64xf32>
    %212 = vector.extract_strided_slice %211 {offsets = [0, 0], sizes = [4, 48], strides = [1, 1]} : vector<4x64xf32> to vector<4x48xf32>
    %213 = arith.negf %212 : vector<4x48xf32>
    %214 = math.exp %213 : vector<4x48xf32>
    %cst_44 = arith.constant 1.000000e+00 : f32
    %215 = vector.broadcast %cst_44 : f32 to vector<4x48xf32>
    %216 = arith.addf %215, %214 : vector<4x48xf32>
    %217 = arith.divf %215, %216 : vector<4x48xf32>
    %218 = vector.extract_strided_slice %211 {offsets = [0, 48], sizes = [4, 16], strides = [1, 1]} : vector<4x64xf32> to vector<4x16xf32>
    %219 = math.tanh %218 : vector<4x16xf32>
    %220 = vector.extract_strided_slice %217 {offsets = [0, 0], sizes = [4, 16], strides = [1, 1]} : vector<4x48xf32> to vector<4x16xf32>
    %221 = vector.extract_strided_slice %217 {offsets = [0, 16], sizes = [4, 16], strides = [1, 1]} : vector<4x48xf32> to vector<4x16xf32>
    %222 = vector.extract_strided_slice %217 {offsets = [0, 32], sizes = [4, 16], strides = [1, 1]} : vector<4x48xf32> to vector<4x16xf32>
    %223 = arith.mulf %221, %201 : vector<4x16xf32>
    %224 = arith.mulf %220, %219 : vector<4x16xf32>
    %225 = arith.addf %223, %224 : vector<4x16xf32>
    %226 = math.tanh %225 : vector<4x16xf32>
    %227 = arith.mulf %222, %226 : vector<4x16xf32>
    %cst_45 = arith.constant dense<0.000000e+00> : vector<4x64xf32>
    %228 = tpu.matmul %227, %8, %cst_45 {dimension_numbers = #tpu.dot_dimension_numbers<[1], [0], [0], [1], [0, 0, 1, 1], [], []>} : vector<4x16xf32>, vector<16x64xf32>, vector<4x64xf32> -> vector<4x64xf32>
    %229 = vector.broadcast %9 : vector<1x64xf32> to vector<4x64xf32>
    %230 = arith.addf %228, %229 : vector<4x64xf32>
    %231 = vector.extract_strided_slice %230 {offsets = [0, 0], sizes = [4, 48], strides = [1, 1]} : vector<4x64xf32> to vector<4x48xf32>
    %232 = arith.negf %231 : vector<4x48xf32>
    %233 = math.exp %232 : vector<4x48xf32>
    %cst_46 = arith.constant 1.000000e+00 : f32
    %234 = vector.broadcast %cst_46 : f32 to vector<4x48xf32>
    %235 = arith.addf %234, %233 : vector<4x48xf32>
    %236 = arith.divf %234, %235 : vector<4x48xf32>
    %237 = vector.extract_strided_slice %230 {offsets = [0, 48], sizes = [4, 16], strides = [1, 1]} : vector<4x64xf32> to vector<4x16xf32>
    %238 = math.tanh %237 : vector<4x16xf32>
    %239 = vector.extract_strided_slice %236 {offsets = [0, 0], sizes = [4, 16], strides = [1, 1]} : vector<4x48xf32> to vector<4x16xf32>
    %240 = vector.extract_strided_slice %236 {offsets = [0, 16], sizes = [4, 16], strides = [1, 1]} : vector<4x48xf32> to vector<4x16xf32>
    %241 = vector.extract_strided_slice %236 {offsets = [0, 32], sizes = [4, 16], strides = [1, 1]} : vector<4x48xf32> to vector<4x16xf32>
    %242 = arith.mulf %240, %225 : vector<4x16xf32>
    %243 = arith.mulf %239, %238 : vector<4x16xf32>
    %244 = arith.addf %242, %243 : vector<4x16xf32>
    %245 = math.tanh %244 : vector<4x16xf32>
    %246 = arith.mulf %241, %245 : vector<4x16xf32>
    %cst_47 = arith.constant dense<0.000000e+00> : vector<4x64xf32>
    %247 = tpu.matmul %246, %8, %cst_47 {dimension_numbers = #tpu.dot_dimension_numbers<[1], [0], [0], [1], [0, 0, 1, 1], [], []>} : vector<4x16xf32>, vector<16x64xf32>, vector<4x64xf32> -> vector<4x64xf32>
    %248 = vector.broadcast %9 : vector<1x64xf32> to vector<4x64xf32>
    %249 = arith.addf %247, %248 : vector<4x64xf32>
    %250 = vector.extract_strided_slice %249 {offsets = [0, 0], sizes = [4, 48], strides = [1, 1]} : vector<4x64xf32> to vector<4x48xf32>
    %251 = arith.negf %250 : vector<4x48xf32>
    %252 = math.exp %251 : vector<4x48xf32>
    %cst_48 = arith.constant 1.000000e+00 : f32
    %253 = vector.broadcast %cst_48 : f32 to vector<4x48xf32>
    %254 = arith.addf %253, %252 : vector<4x48xf32>
    %255 = arith.divf %253, %254 : vector<4x48xf32>
    %256 = vector.extract_strided_slice %249 {offsets = [0, 48], sizes = [4, 16], strides = [1, 1]} : vector<4x64xf32> to vector<4x16xf32>
    %257 = math.tanh %256 : vector<4x16xf32>
    %258 = vector.extract_strided_slice %255 {offsets = [0, 0], sizes = [4, 16], strides = [1, 1]} : vector<4x48xf32> to vector<4x16xf32>
    %259 = vector.extract_strided_slice %255 {offsets = [0, 16], sizes = [4, 16], strides = [1, 1]} : vector<4x48xf32> to vector<4x16xf32>
    %260 = vector.extract_strided_slice %255 {offsets = [0, 32], sizes = [4, 16], strides = [1, 1]} : vector<4x48xf32> to vector<4x16xf32>
    %261 = arith.mulf %259, %244 : vector<4x16xf32>
    %262 = arith.mulf %258, %257 : vector<4x16xf32>
    %263 = arith.addf %261, %262 : vector<4x16xf32>
    %264 = math.tanh %263 : vector<4x16xf32>
    %265 = arith.mulf %260, %264 : vector<4x16xf32>
    %cst_49 = arith.constant dense<0.000000e+00> : vector<4x64xf32>
    %266 = tpu.matmul %265, %8, %cst_49 {dimension_numbers = #tpu.dot_dimension_numbers<[1], [0], [0], [1], [0, 0, 1, 1], [], []>} : vector<4x16xf32>, vector<16x64xf32>, vector<4x64xf32> -> vector<4x64xf32>
    %267 = vector.broadcast %9 : vector<1x64xf32> to vector<4x64xf32>
    %268 = arith.addf %266, %267 : vector<4x64xf32>
    %269 = vector.extract_strided_slice %268 {offsets = [0, 0], sizes = [4, 48], strides = [1, 1]} : vector<4x64xf32> to vector<4x48xf32>
    %270 = arith.negf %269 : vector<4x48xf32>
    %271 = math.exp %270 : vector<4x48xf32>
    %cst_50 = arith.constant 1.000000e+00 : f32
    %272 = vector.broadcast %cst_50 : f32 to vector<4x48xf32>
    %273 = arith.addf %272, %271 : vector<4x48xf32>
    %274 = arith.divf %272, %273 : vector<4x48xf32>
    %275 = vector.extract_strided_slice %268 {offsets = [0, 48], sizes = [4, 16], strides = [1, 1]} : vector<4x64xf32> to vector<4x16xf32>
    %276 = math.tanh %275 : vector<4x16xf32>
    %277 = vector.extract_strided_slice %274 {offsets = [0, 0], sizes = [4, 16], strides = [1, 1]} : vector<4x48xf32> to vector<4x16xf32>
    %278 = vector.extract_strided_slice %274 {offsets = [0, 16], sizes = [4, 16], strides = [1, 1]} : vector<4x48xf32> to vector<4x16xf32>
    %279 = vector.extract_strided_slice %274 {offsets = [0, 32], sizes = [4, 16], strides = [1, 1]} : vector<4x48xf32> to vector<4x16xf32>
    %280 = arith.mulf %278, %263 : vector<4x16xf32>
    %281 = arith.mulf %277, %276 : vector<4x16xf32>
    %282 = arith.addf %280, %281 : vector<4x16xf32>
    %283 = math.tanh %282 : vector<4x16xf32>
    %284 = arith.mulf %279, %283 : vector<4x16xf32>
    %285 = vector.shape_cast %227 : vector<4x16xf32> to vector<1x4x16xf32>
    %286 = vector.shape_cast %246 : vector<4x16xf32> to vector<1x4x16xf32>
    %287 = vector.shape_cast %265 : vector<4x16xf32> to vector<1x4x16xf32>
    %288 = vector.shape_cast %284 : vector<4x16xf32> to vector<1x4x16xf32>
    %289 = tpu.concatenate %285, %286, %287, %288 in 0 : vector<1x4x16xf32>, vector<1x4x16xf32>, vector<1x4x16xf32>, vector<1x4x16xf32> -> vector<4x4x16xf32>
    %290 = vector.shape_cast %289 : vector<4x4x16xf32> to vector<16x16xf32>
    %cst_51 = arith.constant dense<0.000000e+00> : vector<16x16xf32>
    %291 = tpu.matmul %290, %10, %cst_51 {dimension_numbers = #tpu.dot_dimension_numbers<[1], [0], [0], [1], [0, 0, 1, 1], [], []>} : vector<16x16xf32>, vector<16x16xf32>, vector<16x16xf32> -> vector<16x16xf32>
    %292 = vector.broadcast %11 : vector<1x16xf32> to vector<16x16xf32>
    %293 = arith.addf %291, %292 : vector<16x16xf32>
    %cst_52 = arith.constant dense<0.000000e+00> : vector<16x48xf32>
    %294 = tpu.matmul %293, %12, %cst_52 {dimension_numbers = #tpu.dot_dimension_numbers<[1], [0], [0], [1], [0, 0, 1, 1], [], []>} : vector<16x16xf32>, vector<16x48xf32>, vector<16x48xf32> -> vector<16x48xf32>
    %295 = vector.broadcast %13 : vector<1x48xf32> to vector<16x48xf32>
    %296 = arith.addf %294, %295 : vector<16x48xf32>
    %297 = vector.extract_strided_slice %296 {offsets = [0, 0], sizes = [16, 8], strides = [1, 1]} : vector<16x48xf32> to vector<16x8xf32>
    %298 = vector.shape_cast %297 : vector<16x8xf32> to vector<4x4x8xf32>
    %299 = vector.extract_strided_slice %296 {offsets = [0, 16], sizes = [16, 8], strides = [1, 1]} : vector<16x48xf32> to vector<16x8xf32>
    %300 = vector.shape_cast %299 : vector<16x8xf32> to vector<4x4x8xf32>
    %301 = vector.extract_strided_slice %296 {offsets = [0, 32], sizes = [16, 8], strides = [1, 1]} : vector<16x48xf32> to vector<16x8xf32>
    %302 = vector.shape_cast %301 : vector<16x8xf32> to vector<4x4x8xf32>
    "tpu.trace_start"() <{level = 10 : i32, message = "tqd,tkd->tqk"}> : () -> ()
    %cst_53 = arith.constant dense<0.000000e+00> : vector<4x4x4xf32>
    %303 = tpu.matmul %298, %300, %cst_53 {dimension_numbers = #tpu.dot_dimension_numbers<[2], [2], [1], [1], [0, 0, 0, 1, 1, 1], [0], [0]>} : vector<4x4x8xf32>, vector<4x4x8xf32>, vector<4x4x4xf32> -> vector<4x4x4xf32>
    "tpu.trace_stop"() : () -> ()
    %cst_54 = arith.constant dense<0xFF800000> : vector<4x4xf32>
    %304 = vector.multi_reduction <maximumf>, %303, %cst_54 [2] : vector<4x4x4xf32> to vector<4x4xf32>
    %305 = vector.shape_cast %304 : vector<4x4xf32> to vector<4x4x1xf32>
    %306 = vector.broadcast %305 : vector<4x4x1xf32> to vector<4x4x4xf32>
    %307 = arith.subf %303, %306 : vector<4x4x4xf32>
    %308 = math.exp %307 : vector<4x4x4xf32>
    %cst_55 = arith.constant dense<0.000000e+00> : vector<4x4xf32>
    %309 = vector.multi_reduction <add>, %308, %cst_55 [2] : vector<4x4x4xf32> to vector<4x4xf32>
    %310 = vector.shape_cast %309 : vector<4x4xf32> to vector<4x4x1xf32>
    %311 = tpu.reciprocal %310 {approx = true} : vector<4x4x1xf32> -> vector<4x4x1xf32>
    %312 = vector.broadcast %311 : vector<4x4x1xf32> to vector<4x4x4xf32>
    %313 = arith.mulf %308, %312 : vector<4x4x4xf32>
    "tpu.trace_start"() <{level = 10 : i32, message = "tqk,tkd->tqd"}> : () -> ()
    %cst_56 = arith.constant dense<0.000000e+00> : vector<4x4x8xf32>
    %314 = tpu.matmul %313, %302, %cst_56 {dimension_numbers = #tpu.dot_dimension_numbers<[2], [1], [1], [2], [0, 0, 0, 1, 1, 2], [0], [0]>} : vector<4x4x4xf32>, vector<4x4x8xf32>, vector<4x4x8xf32> -> vector<4x4x8xf32>
    "tpu.trace_stop"() : () -> ()
    %315 = vector.extract_strided_slice %296 {offsets = [0, 8], sizes = [16, 8], strides = [1, 1]} : vector<16x48xf32> to vector<16x8xf32>
    %316 = vector.shape_cast %315 : vector<16x8xf32> to vector<4x4x8xf32>
    %317 = vector.extract_strided_slice %296 {offsets = [0, 24], sizes = [16, 8], strides = [1, 1]} : vector<16x48xf32> to vector<16x8xf32>
    %318 = vector.shape_cast %317 : vector<16x8xf32> to vector<4x4x8xf32>
    %319 = vector.extract_strided_slice %296 {offsets = [0, 40], sizes = [16, 8], strides = [1, 1]} : vector<16x48xf32> to vector<16x8xf32>
    %320 = vector.shape_cast %319 : vector<16x8xf32> to vector<4x4x8xf32>
    "tpu.trace_start"() <{level = 10 : i32, message = "tqd,tkd->tqk"}> : () -> ()
    %cst_57 = arith.constant dense<0.000000e+00> : vector<4x4x4xf32>
    %321 = tpu.matmul %316, %318, %cst_57 {dimension_numbers = #tpu.dot_dimension_numbers<[2], [2], [1], [1], [0, 0, 0, 1, 1, 1], [0], [0]>} : vector<4x4x8xf32>, vector<4x4x8xf32>, vector<4x4x4xf32> -> vector<4x4x4xf32>
    "tpu.trace_stop"() : () -> ()
    %cst_58 = arith.constant dense<0xFF800000> : vector<4x4xf32>
    %322 = vector.multi_reduction <maximumf>, %321, %cst_58 [2] : vector<4x4x4xf32> to vector<4x4xf32>
    %323 = vector.shape_cast %322 : vector<4x4xf32> to vector<4x4x1xf32>
    %324 = vector.broadcast %323 : vector<4x4x1xf32> to vector<4x4x4xf32>
    %325 = arith.subf %321, %324 : vector<4x4x4xf32>
    %326 = math.exp %325 : vector<4x4x4xf32>
    %cst_59 = arith.constant dense<0.000000e+00> : vector<4x4xf32>
    %327 = vector.multi_reduction <add>, %326, %cst_59 [2] : vector<4x4x4xf32> to vector<4x4xf32>
    %328 = vector.shape_cast %327 : vector<4x4xf32> to vector<4x4x1xf32>
    %329 = tpu.reciprocal %328 {approx = true} : vector<4x4x1xf32> -> vector<4x4x1xf32>
    %330 = vector.broadcast %329 : vector<4x4x1xf32> to vector<4x4x4xf32>
    %331 = arith.mulf %326, %330 : vector<4x4x4xf32>
    "tpu.trace_start"() <{level = 10 : i32, message = "tqk,tkd->tqd"}> : () -> ()
    %cst_60 = arith.constant dense<0.000000e+00> : vector<4x4x8xf32>
    %332 = tpu.matmul %331, %320, %cst_60 {dimension_numbers = #tpu.dot_dimension_numbers<[2], [1], [1], [2], [0, 0, 0, 1, 1, 2], [0], [0]>} : vector<4x4x4xf32>, vector<4x4x8xf32>, vector<4x4x8xf32> -> vector<4x4x8xf32>
    "tpu.trace_stop"() : () -> ()
    %333 = tpu.concatenate %314, %332 in 2 : vector<4x4x8xf32>, vector<4x4x8xf32> -> vector<4x4x16xf32>
    %334 = vector.shape_cast %333 : vector<4x4x16xf32> to vector<16x16xf32>
    %cst_61 = arith.constant dense<0.000000e+00> : vector<16x16xf32>
    %335 = tpu.matmul %334, %14, %cst_61 {dimension_numbers = #tpu.dot_dimension_numbers<[1], [0], [0], [1], [0, 0, 1, 1], [], []>} : vector<16x16xf32>, vector<16x16xf32>, vector<16x16xf32> -> vector<16x16xf32>
    %336 = vector.broadcast %15 : vector<1x16xf32> to vector<16x16xf32>
    %337 = arith.addf %335, %336 : vector<16x16xf32>
    %338 = arith.addf %337, %293 : vector<16x16xf32>
    %cst_62 = arith.constant 0.000000e+00 : f32
    %339 = vector.broadcast %cst_62 : f32 to vector<16x16xf32>
    %340 = arith.maximumf %338, %339 : vector<16x16xf32>
    %cst_63 = arith.constant dense<0.000000e+00> : vector<16x48xf32>
    %341 = tpu.matmul %340, %12, %cst_63 {dimension_numbers = #tpu.dot_dimension_numbers<[1], [0], [0], [1], [0, 0, 1, 1], [], []>} : vector<16x16xf32>, vector<16x48xf32>, vector<16x48xf32> -> vector<16x48xf32>
    %342 = vector.broadcast %13 : vector<1x48xf32> to vector<16x48xf32>
    %343 = arith.addf %341, %342 : vector<16x48xf32>
    %344 = vector.extract_strided_slice %343 {offsets = [0, 0], sizes = [16, 8], strides = [1, 1]} : vector<16x48xf32> to vector<16x8xf32>
    %345 = vector.shape_cast %344 : vector<16x8xf32> to vector<4x4x8xf32>
    %346 = vector.extract_strided_slice %343 {offsets = [0, 16], sizes = [16, 8], strides = [1, 1]} : vector<16x48xf32> to vector<16x8xf32>
    %347 = vector.shape_cast %346 : vector<16x8xf32> to vector<4x4x8xf32>
    %348 = vector.extract_strided_slice %343 {offsets = [0, 32], sizes = [16, 8], strides = [1, 1]} : vector<16x48xf32> to vector<16x8xf32>
    %349 = vector.shape_cast %348 : vector<16x8xf32> to vector<4x4x8xf32>
    "tpu.trace_start"() <{level = 10 : i32, message = "tqd,tkd->tqk"}> : () -> ()
    %cst_64 = arith.constant dense<0.000000e+00> : vector<4x4x4xf32>
    %350 = tpu.matmul %345, %347, %cst_64 {dimension_numbers = #tpu.dot_dimension_numbers<[2], [2], [1], [1], [0, 0, 0, 1, 1, 1], [0], [0]>} : vector<4x4x8xf32>, vector<4x4x8xf32>, vector<4x4x4xf32> -> vector<4x4x4xf32>
    "tpu.trace_stop"() : () -> ()
    %cst_65 = arith.constant dense<0xFF800000> : vector<4x4xf32>
    %351 = vector.multi_reduction <maximumf>, %350, %cst_65 [2] : vector<4x4x4xf32> to vector<4x4xf32>
    %352 = vector.shape_cast %351 : vector<4x4xf32> to vector<4x4x1xf32>
    %353 = vector.broadcast %352 : vector<4x4x1xf32> to vector<4x4x4xf32>
    %354 = arith.subf %350, %353 : vector<4x4x4xf32>
    %355 = math.exp %354 : vector<4x4x4xf32>
    %cst_66 = arith.constant dense<0.000000e+00> : vector<4x4xf32>
    %356 = vector.multi_reduction <add>, %355, %cst_66 [2] : vector<4x4x4xf32> to vector<4x4xf32>
    %357 = vector.shape_cast %356 : vector<4x4xf32> to vector<4x4x1xf32>
    %358 = tpu.reciprocal %357 {approx = true} : vector<4x4x1xf32> -> vector<4x4x1xf32>
    %359 = vector.broadcast %358 : vector<4x4x1xf32> to vector<4x4x4xf32>
    %360 = arith.mulf %355, %359 : vector<4x4x4xf32>
    "tpu.trace_start"() <{level = 10 : i32, message = "tqk,tkd->tqd"}> : () -> ()
    %cst_67 = arith.constant dense<0.000000e+00> : vector<4x4x8xf32>
    %361 = tpu.matmul %360, %349, %cst_67 {dimension_numbers = #tpu.dot_dimension_numbers<[2], [1], [1], [2], [0, 0, 0, 1, 1, 2], [0], [0]>} : vector<4x4x4xf32>, vector<4x4x8xf32>, vector<4x4x8xf32> -> vector<4x4x8xf32>
    "tpu.trace_stop"() : () -> ()
    %362 = vector.extract_strided_slice %343 {offsets = [0, 8], sizes = [16, 8], strides = [1, 1]} : vector<16x48xf32> to vector<16x8xf32>
    %363 = vector.shape_cast %362 : vector<16x8xf32> to vector<4x4x8xf32>
    %364 = vector.extract_strided_slice %343 {offsets = [0, 24], sizes = [16, 8], strides = [1, 1]} : vector<16x48xf32> to vector<16x8xf32>
    %365 = vector.shape_cast %364 : vector<16x8xf32> to vector<4x4x8xf32>
    %366 = vector.extract_strided_slice %343 {offsets = [0, 40], sizes = [16, 8], strides = [1, 1]} : vector<16x48xf32> to vector<16x8xf32>
    %367 = vector.shape_cast %366 : vector<16x8xf32> to vector<4x4x8xf32>
    "tpu.trace_start"() <{level = 10 : i32, message = "tqd,tkd->tqk"}> : () -> ()
    %cst_68 = arith.constant dense<0.000000e+00> : vector<4x4x4xf32>
    %368 = tpu.matmul %363, %365, %cst_68 {dimension_numbers = #tpu.dot_dimension_numbers<[2], [2], [1], [1], [0, 0, 0, 1, 1, 1], [0], [0]>} : vector<4x4x8xf32>, vector<4x4x8xf32>, vector<4x4x4xf32> -> vector<4x4x4xf32>
    "tpu.trace_stop"() : () -> ()
    %cst_69 = arith.constant dense<0xFF800000> : vector<4x4xf32>
    %369 = vector.multi_reduction <maximumf>, %368, %cst_69 [2] : vector<4x4x4xf32> to vector<4x4xf32>
    %370 = vector.shape_cast %369 : vector<4x4xf32> to vector<4x4x1xf32>
    %371 = vector.broadcast %370 : vector<4x4x1xf32> to vector<4x4x4xf32>
    %372 = arith.subf %368, %371 : vector<4x4x4xf32>
    %373 = math.exp %372 : vector<4x4x4xf32>
    %cst_70 = arith.constant dense<0.000000e+00> : vector<4x4xf32>
    %374 = vector.multi_reduction <add>, %373, %cst_70 [2] : vector<4x4x4xf32> to vector<4x4xf32>
    %375 = vector.shape_cast %374 : vector<4x4xf32> to vector<4x4x1xf32>
    %376 = tpu.reciprocal %375 {approx = true} : vector<4x4x1xf32> -> vector<4x4x1xf32>
    %377 = vector.broadcast %376 : vector<4x4x1xf32> to vector<4x4x4xf32>
    %378 = arith.mulf %373, %377 : vector<4x4x4xf32>
    "tpu.trace_start"() <{level = 10 : i32, message = "tqk,tkd->tqd"}> : () -> ()
    %cst_71 = arith.constant dense<0.000000e+00> : vector<4x4x8xf32>
    %379 = tpu.matmul %378, %367, %cst_71 {dimension_numbers = #tpu.dot_dimension_numbers<[2], [1], [1], [2], [0, 0, 0, 1, 1, 2], [0], [0]>} : vector<4x4x4xf32>, vector<4x4x8xf32>, vector<4x4x8xf32> -> vector<4x4x8xf32>
    "tpu.trace_stop"() : () -> ()
    %380 = tpu.concatenate %361, %379 in 2 : vector<4x4x8xf32>, vector<4x4x8xf32> -> vector<4x4x16xf32>
    %381 = vector.shape_cast %380 : vector<4x4x16xf32> to vector<16x16xf32>
    %cst_72 = arith.constant dense<0.000000e+00> : vector<16x16xf32>
    %382 = tpu.matmul %381, %14, %cst_72 {dimension_numbers = #tpu.dot_dimension_numbers<[1], [0], [0], [1], [0, 0, 1, 1], [], []>} : vector<16x16xf32>, vector<16x16xf32>, vector<16x16xf32> -> vector<16x16xf32>
    %383 = vector.broadcast %15 : vector<1x16xf32> to vector<16x16xf32>
    %384 = arith.addf %382, %383 : vector<16x16xf32>
    %385 = arith.addf %384, %340 : vector<16x16xf32>
    %cst_73 = arith.constant 0.000000e+00 : f32
    %386 = vector.broadcast %cst_73 : f32 to vector<16x16xf32>
    %387 = arith.maximumf %385, %386 : vector<16x16xf32>
    %388 = vector.broadcast %16 : vector<1x16xf32> to vector<16x16xf32>
    %389 = arith.mulf %387, %388 : vector<16x16xf32>
    %cst_74 = arith.constant dense<0.000000e+00> : vector<16xf32>
    %390 = vector.multi_reduction <add>, %389, %cst_74 [1] : vector<16x16xf32> to vector<16xf32>
    %391 = vector.shape_cast %390 : vector<16xf32> to vector<16x1xf32>
    %392 = vector.broadcast %17 : vector<1x1xf32> to vector<16x1xf32>
    %393 = arith.addf %391, %392 : vector<16x1xf32>
    %394 = math.exp %393 : vector<16x1xf32>
    %cst_75 = arith.constant 0.000000e+00 : f32
    %395 = vector.broadcast %cst_75 : f32 to vector<16x95xf32>
    %396 = tpu.concatenate %293, %387, %394, %395 in 1 : vector<16x16xf32>, vector<16x16xf32>, vector<16x1xf32>, vector<16x95xf32> -> vector<16x128xf32>
    %c0_76 = arith.constant 0 : index
    %c0_77 = arith.constant 0 : index
    %397 = vector.load %arg2[%c0_76, %c0_77] : memref<16x128xf32, #tpu.memory_space<vmem>>, vector<16x128xf32>
    tpu.vector_store %arg2[%c0_76, %c0_77], %396 {strides = array<i32>} : memref<16x128xf32, #tpu.memory_space<vmem>>, vector<16x128xf32>,
    return
  }
}

</mosaic_0001>

<bundles_post_ra>
// kernel: mul.19
= control target key start
LH: loop header
LB: loop body
LE: loop exit
PB: predicated region body
PF: predicated region fallthrough
CT: control target
= control target key end

     0   :  { %s34_s0 = inlined_call_operand.vmem [shape: f32[1,48], index: 0, kind: input, shape index: {}]   ;;  %s35_s1 = inlined_call_operand.vmem [shape: f32[1,48], index: 1, kind: input, shape index: {}]   ;;  %s36_s2 = inlined_call_operand.vmem [shape: f32[1,48], index: 2, kind: output, shape index: {}]  }
   0x1   :  { %v3_v0 = vld [vmem:[%s34_s0] sm:$0x1] }
   0x2   :  { %v4_v1 = vld [vmem:[%s35_s1] sm:$0x1] }
   0x3   :  { %v7_v2 = vmul.f32 %v4_v1, %v3_v0 }
   0x5   :  { %9 = vst [vmem:[%s36_s2] sm:$0x1] %v7_v2 }

// kernel: proportion_model_forward.1
= control target key start
LH: loop header
LB: loop body
LE: loop exit
PB: predicated region body
PF: predicated region fallthrough
CT: control target
= control target key end

     0   :  { %vm39_vm0 = vcmask 64512   ;;  %v82_v42 = vlaneseq  ;;  %s6390_s24 = smov 80   ;;  %s6391_s25 = smov 16   ;;  %vm6393_vm1 = vmmov 0   ;;  %vm300_vm2 = vcmask 1041409   ;;  %s7343_s1 = inlined_call_operand.vmem [shape: f32[192,128], index: 1, kind: input, shape index: {}]   ;;  %s7344_s0 = inlined_call_operand.vmem [shape: f32[4,8,8], index: 0, kind: input, shape index: {}]   ;;  %s7345_s2 = inlined_call_operand.vmem [shape: f32[16,128], index: 2, kind: output, shape index: {}]  }
   0x1   :  { %v13_v0 = vld [vmem:[%s7343_s1 + $0x10] sm:$0xff]  ;;  %v35_v1 = vld [vmem:[%s7344_s0] sm:$0xff]  ;;  %v36_v2 = vld [vmem:[%s7344_s0 + $0x8] sm:$0xff]  ;;  %vm303_vm3 = vcmask 1042434   ;;  %vm306_vm4 = vcmask 1043459   ;;  %s6395_s30 = smov 96  }
   0x2   :  { %5679 = vmatprep.subr.mxu0 %v13_v0  ;;  %v37_v3 = vld [vmem:[%s7344_s0 + $0x10] sm:$0xff]  ;;  %v38_v4 = vld [vmem:[%s7344_s0 + $0x18] sm:$0xff]  ;;  %v40_v5 = vsel %vm39_vm0, %v35_v1, 0.0  ;;  %v41_v6 = vsel %vm39_vm0, %v36_v2, 0.0  ;;  %v83_v43 = vshrl.u32 %v82_v42, 7  ;;  %vm310_vm5 = vcmask 130048  }
   0x3   :  { %5680 = vmatpush3.msra.mxu0 %v13_v0  ;;  %v43_v7 = vsel %vm39_vm0, %v37_v3, 0.0  ;;  %v42_v8 = vadd.f32 %v41_v6, %v40_v5  ;;  %v45_v9 = vsel %vm39_vm0, %v38_v4, 0.0  ;;  %v11_v44 = vld [vmem:[%s7343_s1] sm:$0x1]  ;;  %v12_v48 = vld [vmem:[%s7343_s1 + $0x8] sm:$0x1] }
   0x4   :  { %v84_v45 = vsub.s32 0, %v83_v43  ;;  %v5421_v61 = vld [vmem:[%s7343_s1 + $0x28] ss:$0 sm:$0xff]  ;;  %s6396_s29 = smov 112   ;;  %s6397_s3 = smov 104   ;;  %vm2774_vm6 = vcmask 1043456  }
   0x5   :  { %v44_v10 = vadd.f32 %v43_v7, %v42_v8  ;;  %vm2723_vm7 = vcmask 27648   ;;  %s6398_s4 = smov 120   ;;  %vm2770_vm8 = vcmask 31744   ;;  %s6399_s5 = smov 88   ;;  %vm5409_vm9 = vcmask 261120  }
   0x6   :  { %s6400_s10 = smov 8   ;;  %s6401_s16 = smov 32   ;;  %vm5412_vm10 = vcmask 269312  }
   0x7   :  { %v46_v11 = vadd.f32 %v45_v9, %v44_v10 }
   0x9   :  { %v47_v12 = vrot.slane %v46_v11, 4 }
   0xb   :  { %v48_v13 = vadd.f32 %v47_v12, %v46_v11 }
   0xd   :  { %v49_v14 = vrot.slane %v48_v13, 2 }
   0xf   :  { %v50_v15 = vadd.f32 %v49_v14, %v48_v13 }
  0x11   :  { %v51_v16 = vrot.slane %v50_v15, 1 }
  0x13   :  { %v52_v17 = vadd.f32 %v51_v16, %v50_v15 }
  0x15   :  { %v54_v18 = vmul.f32 0.03125, %v52_v17 }
  0x17   :  { %v55_v19 = vsub.f32 %v35_v1, %v54_v18  ;;  %v56_v20 = vsub.f32 %v36_v2, %v54_v18  ;;  %v57_v21 = vsub.f32 %v37_v3, %v54_v18  ;;  %v58_v22 = vsub.f32 %v38_v4, %v54_v18 }
  0x19   :  { %v59_v23 = vmul.f32 %v55_v19, %v55_v19  ;;  %v60_v24 = vmul.f32 %v56_v20, %v56_v20  ;;  %v61_v25 = vmul.f32 %v57_v21, %v57_v21  ;;  %v62_v26 = vmul.f32 %v58_v22, %v58_v22 }
  0x1b   :  { %v63_v27 = vsel %vm39_vm0, %v59_v23, 0.0  ;;  %v64_v28 = vsel %vm39_vm0, %v60_v24, 0.0  ;;  %v66_v29 = vsel %vm39_vm0, %v61_v25, 0.0  ;;  %v68_v31 = vsel %vm39_vm0, %v62_v26, 0.0 }
  0x1c   :  { %v65_v30 = vadd.f32 %v64_v28, %v63_v27 }
  0x1e   :  { %v67_v32 = vadd.f32 %v66_v29, %v65_v30 }
  0x20   :  { %v69_v33 = vadd.f32 %v68_v31, %v67_v32 }
  0x22   :  { %v70_v34 = vrot.slane %v69_v33, 4 }
  0x24   :  { %v71_v35 = vadd.f32 %v70_v34, %v69_v33 }
  0x26   :  { %v72_v36 = vrot.slane %v71_v35, 2 }
  0x28   :  { %v73_v37 = vadd.f32 %v72_v36, %v71_v35 }
  0x2a   :  { %v74_v38 = vrot.slane %v73_v37, 1 }
  0x2c   :  { %v75_v39 = vadd.f32 %v74_v38, %v73_v37 }
  0x2e   :  { %v76_v40 = vmul.f32 0.03125, %v75_v39 }
  0x30   :  { %v77_v41 = vadd.f32 1e-05, %v76_v40 }
  0x32   :  { %6032 = vrsqrt.f32 %v77_v41 }
  0x3c   :  { %v6033_v46 = vpop.eup %6032 }
  0x3d   :  { %v79_v47 = vmul.f32 %v6033_v46, %v11_v44 }
  0x3f   :  { %v80_v49 = vmul.f32 %v79_v47, %v54_v18  ;;  %v85_v50 = vrot.slane %v79_v47, %v84_v45  ;;  %v14_v47 = vld [vmem:[%s7343_s1 + $0x18] sm:$0xff] }
  0x41   :  { %v81_v51 = vsub.f32 %v12_v48, %v80_v49  ;;  %v86_v52 = vmul.f32 %v85_v50, %v35_v1  ;;  %v87_v53 = vmul.f32 %v85_v50, %v36_v2  ;;  %v88_v54 = vmul.f32 %v85_v50, %v37_v3  ;;  %v15_v48 = vld [vmem:[%s7343_s1 + $0x20] sm:$0xff] }
  0x42   :  { %v89_v56 = vmul.f32 %v85_v50, %v38_v4  ;;  %v6392_v49 = vmov 0.0|0.0   ;;  %v6509_v50 = vpack.c.bf16 %v15_v48, %v14_v47 }
  0x43   :  { %v93_v55 = vrot.slane %v81_v51, %v84_v45  ;;  %5964 = vmatprep.subr.bf16.mxu1 %v6392_v49  ;;  %v6394_v51 = vmov 0.0   ;;  %5970 = vmatprep.subr.bf16.mxu0 %v6392_v49 }
  0x44   :  { %5691 = vmatprep.mubr.msk.f32.mxu1 %vm6393_vm1, %v6394_v51  ;;  %5966 = vmatpush3.bf16.msra.mxu1 %v6509_v50 }
  0x45   :  { %v6446_v57 = vadd.f32 %v93_v55, %v86_v52  ;;  %v6448_v58 = vadd.f32 %v93_v55, %v87_v53  ;;  %v6450_v59 = vadd.f32 %v93_v55, %v88_v54  ;;  %v6456_v60 = vadd.f32 %v93_v55, %v89_v56  ;;  %5967 = vmatprep.subr.bf16.mxu1 %v6392_v49 }
  0x47   :  { %5681 = vmatprep.mubr.msk.f32.mxu0 %vm39_vm0, %v6446_v57 }
  0x48   :  { %5682 = vmatmul.mubr.msk.f32.vlgmr.msra.gmra.mrb[0].mxu0 %vm39_vm0, %v6448_v58 }
  0x49   :  { %5684 = vmatprep.mubr.msk.f32.mxu0 %vm39_vm0, %v6450_v59  ;;  %5972 = vmatpush3.bf16.msra.mxu0 %v6509_v50 }
  0x4a   :  { %5976 = vmatprep.subr.bf16.mxu0 %v6392_v49 }
  0x4c   :  { %5685 = vmatmul.mubr.msk.f32.gmra.mrb[2].mxu0 %vm39_vm0, %v6456_v60 }
  0x4d   :  { %5705 = vmatprep.mubr.msk.f32.mxu0 %vm6393_vm1, %v6394_v51 }
 0x11b   :  { %v5683_v62 = vpop.f32.mrb[0].mxu0 }
 0x11c   :  { %v6465_v63 = vadd.f32 %v5683_v62, %v5421_v61  ;;  %v180_v0 = vpop.f32.mrb[1].mxu0 }
 0x11d   :  { %v6467_v1 = vadd.f32 %v5421_v61, %v180_v0 }
 0x11e   :  { %6034 = vtanh.f32 %v6465_v63  ;;  %v5427_v10 = vmul.f32 -1.442695, %v6465_v63 }
 0x11f   :  { %v5686_v2 = vpop.f32.mrb[2].mxu0  ;;  %6036 = vtanh.f32 %v6467_v1  ;;  %v5426_v11 = vmul.f32 -1.442695, %v6467_v1 }
 0x120   :  { %v6471_v3 = vadd.f32 %v5686_v2, %v5421_v61  ;;  %v190_v4 = vpop.f32.mrb[3].mxu0 }
 0x121   :  { %v6473_v5 = vadd.f32 %v5421_v61, %v190_v4 }
 0x122   :  { %6038 = vtanh.f32 %v6471_v3  ;;  %v5429_v13 = vmul.f32 -1.442695, %v6471_v3 }
 0x123   :  { %6040 = vtanh.f32 %v6473_v5  ;;  %v5428_v12 = vmul.f32 -1.442695, %v6473_v5 }
 0x124   :  { %6042 = vpow2.f32 %v5427_v10 }
 0x125   :  { %6044 = vpow2.f32 %v5426_v11 }
 0x126   :  { %6046 = vpow2.f32 %v5428_v12 }
 0x127   :  { %6048 = vpow2.f32 %v5429_v13 }
 0x128   :  { %v6035_v6 = vpop.eup %6034 }
 0x129   :  { %v6037_v7 = vpop.eup %6036  ;;  %237 = vrot.lane.b32.xlu0 %v6035_v6, %s6390_s24 }
 0x12a   :  { %235 = vrot.lane.b32.xlu1 %v6037_v7, %s6390_s24 }
 0x12c   :  { %v6039_v8 = vpop.eup %6038 }
 0x12d   :  { %v6041_v9 = vpop.eup %6040 }
 0x12e   :  { %239 = vrot.lane.b32.xlu0 %v6041_v9, %s6390_s24  ;;  %241 = vrot.lane.b32.xlu1 %v6039_v8, %s6390_s24  ;;  %v6043_v14 = vpop.eup %6042 }
 0x12f   :  { %v212_v15 = vadd.f32 1.0, %v6043_v14  ;;  %v6045_v16 = vpop.eup %6044 }
 0x130   :  { %v6047_v17 = vpop.eup %6046  ;;  %v211_v18 = vadd.f32 1.0, %v6045_v16 }
 0x131   :  { %6050 = vrcp.f32 %v212_v15  ;;  %v213_v19 = vadd.f32 1.0, %v6047_v17  ;;  %v6049_v20 = vpop.eup %6048 }
 0x132   :  { %6052 = vrcp.f32 %v211_v18  ;;  %v214_v21 = vadd.f32 1.0, %v6049_v20 }
 0x133   :  { %6054 = vrcp.f32 %v213_v19 }
 0x134   :  { %6056 = vrcp.f32 %v214_v21 }
 0x13b   :  { %v6051_v22 = vpop.eup %6050 }
 0x13c   :  { %v6053_v26 = vpop.eup %6052  ;;  %v228_v34 = vmul.f32 0.0, %v6051_v22 }
 0x13d   :  { %v6055_v27 = vpop.eup %6054  ;;  %v227_v37 = vmul.f32 0.0, %v6053_v26 }
 0x13e   :  { %v6057_v32 = vpop.eup %6056  ;;  %v229_v39 = vmul.f32 0.0, %v6055_v27 }
 0x13f   :  { %v230_v43 = vmul.f32 0.0, %v6057_v32 }
 0x19b   :  { %v238_v23 = vpop.permute.xlu0 %237 }
 0x19c   :  { %v248_v24 = vmul.f32 %v6051_v22, %v238_v23  ;;  %v236_v25 = vpop.permute.xlu1 %235 }
 0x19d   :  { %v247_v28 = vmul.f32 %v6053_v26, %v236_v25 }
 0x19e   :  { %257 = vrot.lane.b32.xlu0 %v248_v24, %s6391_s25 }
 0x1a0   :  { %v240_v29 = vpop.permute.xlu0 %239  ;;  %v242_v31 = vpop.permute.xlu1 %241 }
 0x1a1   :  { %v249_v30 = vmul.f32 %v6055_v27, %v240_v29  ;;  %v250_v33 = vmul.f32 %v6057_v32, %v242_v31 }
 0x1a2   :  { %255 = vrot.lane.b32.xlu0 %v247_v28, %s6391_s25 }
 0x1a3   :  { %259 = vrot.lane.b32.xlu1 %v249_v30, %s6391_s25 }
 0x1a7   :  { %261 = vrot.lane.b32.xlu1 %v250_v33, %s6391_s25 }
 0x210   :  { %v258_v35 = vpop.permute.xlu0 %257 }
 0x211   :  { %v6489_v36 = vadd.f32 %v258_v35, %v228_v34 }
 0x213   :  { %6058 = vtanh.f32 %v6489_v36 }
 0x214   :  { %v256_v38 = vpop.permute.xlu0 %255 }
 0x215   :  { %v6492_v40 = vadd.f32 %v256_v38, %v227_v37  ;;  %v260_v41 = vpop.permute.xlu1 %259 }
 0x216   :  { %v6494_v42 = vadd.f32 %v260_v41, %v229_v39 }
 0x217   :  { %6060 = vtanh.f32 %v6492_v40 }
 0x218   :  { %6062 = vtanh.f32 %v6494_v42 }
 0x219   :  { %v262_v44 = vpop.permute.xlu1 %261 }
 0x21a   :  { %v6498_v45 = vadd.f32 %v262_v44, %v230_v43 }
 0x21c   :  { %6064 = vtanh.f32 %v6498_v45 }
 0x21d   :  { %v6059_v46 = vpop.eup %6058 }
 0x21e   :  { %281 = vrot.lane.b32.xlu0 %v6059_v46, %s6391_s25 }
 0x221   :  { %v6061_v52 = vpop.eup %6060 }
 0x222   :  { %v6063_v53 = vpop.eup %6062  ;;  %279 = vrot.lane.b32.xlu0 %v6061_v52, %s6391_s25 }
 0x223   :  { %283 = vrot.lane.b32.xlu1 %v6063_v53, %s6391_s25 }
 0x226   :  { %v6065_v54 = vpop.eup %6064 }
 0x227   :  { %285 = vrot.lane.b32.xlu1 %v6065_v54, %s6391_s25 }
 0x290   :  { %v282_v55 = vpop.permute.xlu0 %281 }
 0x291   :  { %v292_v62 = vmul.f32 %v6051_v22, %v282_v55 }
 0x293   :  { %v299_v7 = vrot.slane %v292_v62, 7  ;;  %v427_v62 = vrot.slane %v6492_v40, 7 }
 0x294   :  { %v280_v56 = vpop.permute.xlu0 %279 }
 0x295   :  { %v284_v61 = vpop.permute.xlu1 %283  ;;  %v291_v2 = vmul.f32 %v6053_v26, %v280_v56 }
 0x296   :  { %v293_v0 = vmul.f32 %v6055_v27, %v284_v61 }
 0x297   :  { %v301_v10 = vsel %vm300_vm2, %v299_v7, %v291_v2 }
 0x298   :  { %v302_v4 = vrot.slane %v293_v0, 6 }
 0x299   :  { %v286_v6 = vpop.permute.xlu1 %285 }
 0x29a   :  { %v294_v8 = vmul.f32 %v6057_v32, %v286_v6  ;;  %v304_v11 = vsel %vm303_vm3, %v302_v4, %v301_v10  ;;  %v428_v4 = vrot.slane %v6489_v36, 7  ;;  %v429_v6 = vrot.slane %v6494_v42, 7 }
 0x29c   :  { %v305_v9 = vrot.slane %v294_v8, 5 }
 0x29e   :  { %v307_v12 = vsel %vm306_vm4, %v305_v9, %v304_v11 }
 0x29f   :  { %308 = vrot.lane.b32.xlu0 %v307_v12, %s6395_s30  ;;  %v430_v12 = vrot.slane %v6498_v45, 7 }
 0x311   :  { %v309_v13 = vpop.permute.xlu0 %308 }
 0x312   :  { %5692 = vmatmul.mubr.msk.f32.vlgmr.msra.gmra.mrb[0].mxu1 %vm310_vm5, %v309_v13 }
 0x313   :  { %5969 = vmatpush3.bf16.msra.mxu1 %v6509_v50  ;;  %5698 = vmatprep.mubr.msk.f32.mxu1 %vm6393_vm1, %v6394_v51 }
 0x314   :  { %5973 = vmatprep.subr.bf16.mxu1 %v6392_v49 }
 0x3e5   :  { %v379_v14 = vpop.f32.mrb[0].mxu1 }
 0x3e6   :  { %v384_v15 = vrot.slane %v379_v14, 7  ;;  %v5693_v16 = vpop.f32.mrb[1].mxu1  ;;  %v385_v17 = vrot.slane %v379_v14, 1  ;;  %v392_v19 = vadd.f32 %v379_v14, %v6465_v63  ;;  %v386_v20 = vrot.slane %v379_v14, 2 }
 0x3e8   :  { %v391_v18 = vadd.f32 %v384_v15, %v6467_v1  ;;  %v393_v21 = vadd.f32 %v385_v17, %v6473_v5  ;;  %v394_v22 = vadd.f32 %v386_v20, %v6471_v3  ;;  %v5432_v28 = vmul.f32 -1.442695, %v392_v19 }
 0x3ea   :  { %6066 = vtanh.f32 %v391_v18  ;;  %v5431_v27 = vmul.f32 -1.442695, %v391_v18  ;;  %v5433_v29 = vmul.f32 -1.442695, %v393_v21  ;;  %v5434_v30 = vmul.f32 -1.442695, %v394_v22 }
 0x3eb   :  { %6068 = vtanh.f32 %v392_v19 }
 0x3ec   :  { %6070 = vtanh.f32 %v393_v21 }
 0x3ed   :  { %6072 = vtanh.f32 %v394_v22 }
 0x3ee   :  { %6074 = vpow2.f32 %v5431_v27 }
 0x3ef   :  { %6076 = vpow2.f32 %v5432_v28 }
 0x3f0   :  { %6078 = vpow2.f32 %v5433_v29 }
 0x3f1   :  { %6080 = vpow2.f32 %v5434_v30 }
 0x3f4   :  { %v6067_v23 = vpop.eup %6066 }
 0x3f5   :  { %443 = vrot.lane.b32.xlu1 %v6067_v23, %s6390_s24  ;;  %v6069_v24 = vpop.eup %6068 }
 0x3f6   :  { %v6071_v25 = vpop.eup %6070 }
 0x3f7   :  { %447 = vrot.lane.b32.xlu0 %v6071_v25, %s6390_s24  ;;  %v6073_v26 = vpop.eup %6072 }
 0x3f8   :  { %v6075_v31 = vpop.eup %6074 }
 0x3f9   :  { %445 = vrot.lane.b32.xlu1 %v6069_v24, %s6390_s24  ;;  %v6077_v32 = vpop.eup %6076  ;;  %v407_v33 = vadd.f32 1.0, %v6075_v31 }
 0x3fa   :  { %v6079_v34 = vpop.eup %6078  ;;  %v408_v35 = vadd.f32 1.0, %v6077_v32 }
 0x3fb   :  { %449 = vrot.lane.b32.xlu0 %v6073_v26, %s6390_s24  ;;  %v409_v37 = vadd.f32 1.0, %v6079_v34  ;;  %6082 = vrcp.f32 %v407_v33  ;;  %v6081_v38 = vpop.eup %6080 }
 0x3fc   :  { %6084 = vrcp.f32 %v408_v35  ;;  %v410_v39 = vadd.f32 1.0, %v6081_v38 }
 0x3fd   :  { %6086 = vrcp.f32 %v409_v37 }
 0x3fe   :  { %6088 = vrcp.f32 %v410_v39 }
 0x405   :  { %v6083_v41 = vpop.eup %6082 }
 0x406   :  { %v6085_v46 = vpop.eup %6084  ;;  %v435_v0 = vmul.f32 %v6083_v41, %v427_v62 }
 0x407   :  { %v6087_v47 = vpop.eup %6086  ;;  %v436_v9 = vmul.f32 %v6085_v46, %v428_v4 }
 0x408   :  { %v6089_v55 = vpop.eup %6088  ;;  %v437_v8 = vmul.f32 %v6087_v47, %v429_v6 }
 0x409   :  { %v438_v40 = vmul.f32 %v6089_v55, %v430_v12 }
 0x467   :  { %v444_v43 = vpop.permute.xlu1 %443 }
 0x468   :  { %v455_v44 = vmul.f32 %v6083_v41, %v444_v43 }
 0x469   :  { %v448_v48 = vpop.permute.xlu0 %447 }
 0x46a   :  { %463 = vrot.lane.b32.xlu1 %v455_v44, %s6391_s25  ;;  %v457_v53 = vmul.f32 %v6087_v47, %v448_v48 }
 0x46b   :  { %v446_v52 = vpop.permute.xlu1 %445 }
 0x46c   :  { %v456_v54 = vmul.f32 %v6085_v46, %v446_v52  ;;  %467 = vrot.lane.b32.xlu0 %v457_v53, %s6391_s25 }
 0x46d   :  { %v450_v56 = vpop.permute.xlu0 %449 }
 0x46e   :  { %465 = vrot.lane.b32.xlu1 %v456_v54, %s6391_s25  ;;  %v458_v61 = vmul.f32 %v6089_v55, %v450_v56 }
 0x470   :  { %469 = vrot.lane.b32.xlu0 %v458_v61, %s6391_s25 }
 0x4dc   :  { %v464_v2 = vpop.permute.xlu1 %463 }
 0x4dd   :  { %v6547_v7 = vadd.f32 %v464_v2, %v435_v0 }
 0x4de   :  { %v468_v10 = vpop.permute.xlu0 %467 }
 0x4df   :  { %6090 = vtanh.f32 %v6547_v7  ;;  %v6551_v13 = vadd.f32 %v468_v10, %v437_v8 }
 0x4e0   :  { %v466_v11 = vpop.permute.xlu1 %465 }
 0x4e1   :  { %v6553_v14 = vadd.f32 %v466_v11, %v436_v9  ;;  %6092 = vtanh.f32 %v6551_v13 }
 0x4e2   :  { %v470_v36 = vpop.permute.xlu0 %469 }
 0x4e3   :  { %6094 = vtanh.f32 %v6553_v14  ;;  %v6557_v42 = vadd.f32 %v470_v36, %v438_v40 }
 0x4e5   :  { %6096 = vtanh.f32 %v6557_v42 }
 0x4e9   :  { %v6091_v15 = vpop.eup %6090 }
 0x4ea   :  { %487 = vrot.lane.b32.xlu1 %v6091_v15, %s6391_s25 }
 0x4eb   :  { %v6093_v16 = vpop.eup %6092 }
 0x4ec   :  { %491 = vrot.lane.b32.xlu0 %v6093_v16, %s6391_s25 }
 0x4ed   :  { %v6095_v17 = vpop.eup %6094 }
 0x4ee   :  { %489 = vrot.lane.b32.xlu1 %v6095_v17, %s6391_s25 }
 0x4ef   :  { %v6097_v45 = vpop.eup %6096 }
 0x4f0   :  { %493 = vrot.lane.b32.xlu0 %v6097_v45, %s6391_s25 }
 0x55c   :  { %v488_v18 = vpop.permute.xlu1 %487 }
 0x55d   :  { %v499_v19 = vmul.f32 %v6083_v41, %v488_v18 }
 0x55e   :  { %v492_v20 = vpop.permute.xlu0 %491 }
 0x55f   :  { %v501_v21 = vmul.f32 %v6087_v47, %v492_v20  ;;  %v507_v23 = vrot.slane %v499_v19, 1 }
 0x560   :  { %v490_v22 = vpop.permute.xlu1 %489 }
 0x561   :  { %v500_v24 = vmul.f32 %v6085_v46, %v490_v22  ;;  %v509_v25 = vrot.slane %v501_v21, 7  ;;  %v631_v21 = vrot.slane %v6547_v7, 7 }
 0x562   :  { %v494_v26 = vpop.permute.xlu0 %493 }
 0x563   :  { %v508_v27 = vsel %vm300_vm2, %v500_v24, %v507_v23  ;;  %v502_v28 = vmul.f32 %v6089_v55, %v494_v26  ;;  %v632_v24 = vrot.slane %v6553_v14, 7  ;;  %v634_v26 = vrot.slane %v6557_v42, 7 }
 0x564   :  { %v510_v29 = vsel %vm303_vm3, %v509_v25, %v508_v27 }
 0x565   :  { %v511_v30 = vrot.slane %v502_v28, 6 }
 0x567   :  { %v512_v31 = vsel %vm306_vm4, %v511_v30, %v510_v29  ;;  %v633_v30 = vrot.slane %v6551_v13, 7 }
 0x568   :  { %513 = vrot.lane.b32.xlu1 %v512_v31, %s6395_s30 }
 0x5da   :  { %v514_v32 = vpop.permute.xlu1 %513 }
 0x5db   :  { %5699 = vmatmul.mubr.msk.f32.vlgmr.msra.gmra.mrb[2].mxu1 %vm310_vm5, %v514_v32 }
 0x5dc   :  { %5975 = vmatpush3.bf16.msra.mxu1 %v6509_v50  ;;  %5712 = vmatprep.mubr.msk.f32.mxu1 %vm6393_vm1, %v6394_v51 }
 0x5dd   :  { %5979 = vmatprep.subr.bf16.mxu1 %v6392_v49 }
 0x6ae   :  { %v583_v33 = vpop.f32.mrb[2].mxu1 }
 0x6af   :  { %v588_v34 = vrot.slane %v583_v33, 6  ;;  %v5700_v35 = vpop.f32.mrb[3].mxu1  ;;  %v589_v37 = vrot.slane %v583_v33, 7  ;;  %v590_v38 = vrot.slane %v583_v33, 1  ;;  %v597_v44 = vadd.f32 %v583_v33, %v6473_v5 }
 0x6b1   :  { %v595_v39 = vadd.f32 %v588_v34, %v6467_v1  ;;  %v596_v41 = vadd.f32 %v589_v37, %v6465_v63  ;;  %v598_v43 = vadd.f32 %v590_v38, %v6471_v3  ;;  %v5438_v56 = vmul.f32 -1.442695, %v597_v44 }
 0x6b3   :  { %6098 = vtanh.f32 %v595_v39  ;;  %v5436_v53 = vmul.f32 -1.442695, %v595_v39  ;;  %v5437_v54 = vmul.f32 -1.442695, %v596_v41  ;;  %v5439_v55 = vmul.f32 -1.442695, %v598_v43 }
 0x6b4   :  { %6100 = vtanh.f32 %v596_v41 }
 0x6b5   :  { %6102 = vtanh.f32 %v598_v43 }
 0x6b6   :  { %6104 = vtanh.f32 %v597_v44 }
 0x6b7   :  { %6106 = vpow2.f32 %v5436_v53 }
 0x6b8   :  { %6108 = vpow2.f32 %v5437_v54 }
 0x6b9   :  { %6110 = vpow2.f32 %v5439_v55 }
 0x6ba   :  { %6112 = vpow2.f32 %v5438_v56 }
 0x6bd   :  { %v6099_v46 = vpop.eup %6098 }
 0x6be   :  { %647 = vrot.lane.b32.xlu0 %v6099_v46, %s6390_s24  ;;  %v6101_v47 = vpop.eup %6100 }
 0x6bf   :  { %v6103_v48 = vpop.eup %6102  ;;  %649 = vrot.lane.b32.xlu1 %v6101_v47, %s6390_s24 }
 0x6c0   :  { %v6105_v52 = vpop.eup %6104 }
 0x6c1   :  { %v6107_v61 = vpop.eup %6106 }
 0x6c2   :  { %653 = vrot.lane.b32.xlu0 %v6103_v48, %s6390_s24  ;;  %v611_v62 = vadd.f32 1.0, %v6107_v61  ;;  %v6109_v0 = vpop.eup %6108 }
 0x6c3   :  { %651 = vrot.lane.b32.xlu1 %v6105_v52, %s6390_s24  ;;  %v6111_v2 = vpop.eup %6110  ;;  %v612_v4 = vadd.f32 1.0, %v6109_v0 }
 0x6c4   :  { %6114 = vrcp.f32 %v611_v62  ;;  %v6113_v6 = vpop.eup %6112  ;;  %v614_v8 = vadd.f32 1.0, %v6111_v2 }
 0x6c5   :  { %v613_v9 = vadd.f32 1.0, %v6113_v6  ;;  %6116 = vrcp.f32 %v612_v4 }
 0x6c6   :  { %6118 = vrcp.f32 %v614_v8 }
 0x6c7   :  { %6120 = vrcp.f32 %v613_v9 }
 0x6ce   :  { %v6115_v10 = vpop.eup %6114 }
 0x6cf   :  { %v6117_v40 = vpop.eup %6116  ;;  %v639_v22 = vmul.f32 %v6115_v10, %v631_v21 }
 0x6d0   :  { %v6119_v15 = vpop.eup %6118  ;;  %v640_v27 = vmul.f32 %v6117_v40, %v632_v24 }
 0x6d1   :  { %v6121_v18 = vpop.eup %6120  ;;  %v642_v29 = vmul.f32 %v6119_v15, %v634_v26 }
 0x6d2   :  { %v641_v7 = vmul.f32 %v6121_v18, %v633_v30 }
 0x730   :  { %v648_v11 = vpop.permute.xlu0 %647 }
 0x731   :  { %v659_v12 = vmul.f32 %v6115_v10, %v648_v11  ;;  %v650_v36 = vpop.permute.xlu1 %649 }
 0x732   :  { %v660_v16 = vmul.f32 %v6117_v40, %v650_v36 }
 0x733   :  { %667 = vrot.lane.b32.xlu0 %v659_v12, %s6391_s25 }
 0x734   :  { %v654_v17 = vpop.permute.xlu0 %653  ;;  %669 = vrot.lane.b32.xlu1 %v660_v16, %s6391_s25 }
 0x735   :  { %v662_v45 = vmul.f32 %v6119_v15, %v654_v17  ;;  %v652_v19 = vpop.permute.xlu1 %651 }
 0x736   :  { %v661_v20 = vmul.f32 %v6121_v18, %v652_v19 }
 0x737   :  { %673 = vrot.lane.b32.xlu0 %v662_v45, %s6391_s25 }
 0x738   :  { %671 = vrot.lane.b32.xlu1 %v661_v20, %s6391_s25 }
 0x7a5   :  { %v668_v23 = vpop.permute.xlu0 %667 }
 0x7a6   :  { %v6587_v25 = vadd.f32 %v668_v23, %v639_v22  ;;  %v670_v28 = vpop.permute.xlu1 %669 }
 0x7a7   :  { %v6592_v31 = vadd.f32 %v670_v28, %v640_v27 }
 0x7a8   :  { %6122 = vtanh.f32 %v6587_v25 }
 0x7a9   :  { %v674_v32 = vpop.permute.xlu0 %673  ;;  %6124 = vtanh.f32 %v6592_v31 }
 0x7aa   :  { %v6594_v33 = vadd.f32 %v674_v32, %v642_v29  ;;  %v672_v14 = vpop.permute.xlu1 %671 }
 0x7ab   :  { %v6598_v34 = vadd.f32 %v672_v14, %v641_v7 }
 0x7ac   :  { %6126 = vtanh.f32 %v6594_v33 }
 0x7ad   :  { %6128 = vtanh.f32 %v6598_v34 }
 0x7b2   :  { %v6123_v42 = vpop.eup %6122 }
 0x7b3   :  { %691 = vrot.lane.b32.xlu0 %v6123_v42, %s6391_s25  ;;  %v6125_v35 = vpop.eup %6124 }
 0x7b4   :  { %693 = vrot.lane.b32.xlu1 %v6125_v35, %s6391_s25 }
 0x7b6   :  { %v6127_v13 = vpop.eup %6126 }
 0x7b7   :  { %697 = vrot.lane.b32.xlu0 %v6127_v13, %s6391_s25  ;;  %v6129_v37 = vpop.eup %6128 }
 0x7b8   :  { %695 = vrot.lane.b32.xlu1 %v6129_v37, %s6391_s25 }
 0x825   :  { %v692_v38 = vpop.permute.xlu0 %691 }
 0x826   :  { %v703_v39 = vmul.f32 %v6115_v10, %v692_v38  ;;  %v694_v41 = vpop.permute.xlu1 %693 }
 0x827   :  { %v704_v43 = vmul.f32 %v6117_v40, %v694_v41 }
 0x828   :  { %v711_v44 = vrot.slane %v703_v39, 2 }
 0x829   :  { %v698_v46 = vpop.permute.xlu0 %697  ;;  %v712_v48 = vrot.slane %v704_v43, 1  ;;  %v835_v43 = vrot.slane %v6587_v25, 7 }
 0x82a   :  { %v706_v47 = vmul.f32 %v6119_v15, %v698_v46  ;;  %v696_v52 = vpop.permute.xlu1 %695 }
 0x82b   :  { %v705_v54 = vmul.f32 %v6121_v18, %v696_v52  ;;  %v713_v55 = vsel %vm300_vm2, %v712_v48, %v711_v44  ;;  %v837_v52 = vrot.slane %v6598_v34, 7 }
 0x82c   :  { %v715_v53 = vrot.slane %v706_v47, 7  ;;  %v836_v47 = vrot.slane %v6592_v31, 7 }
 0x82d   :  { %v714_v56 = vsel %vm303_vm3, %v705_v54, %v713_v55 }
 0x82e   :  { %v716_v61 = vsel %vm306_vm4, %v715_v53, %v714_v56  ;;  %v838_v56 = vrot.slane %v6594_v33, 7 }
 0x82f   :  { %717 = vrot.lane.b32.xlu0 %v716_v61, %s6395_s30 }
 0x8a1   :  { %v718_v62 = vpop.permute.xlu0 %717 }
 0x8a2   :  { %5706 = vmatmul.mubr.msk.f32.vlgmr.msra.gmra.mrb[4].mxu0 %vm310_vm5, %v718_v62 }
 0x8a3   :  { %5978 = vmatpush3.bf16.msra.mxu0 %v6509_v50  ;;  %5719 = vmatprep.mubr.msk.f32.mxu0 %vm6393_vm1, %v6394_v51 }
 0x8a4   :  { %5982 = vmatprep.subr.bf16.mxu0 %v6392_v49 }
 0x975   :  { %v787_v0 = vpop.f32.mrb[4].mxu0 }
 0x976   :  { %v792_v2 = vrot.slane %v787_v0, 5  ;;  %v5707_v4 = vpop.f32.mrb[5].mxu0  ;;  %v793_v6 = vrot.slane %v787_v0, 6  ;;  %v794_v8 = vrot.slane %v787_v0, 7  ;;  %v802_v12 = vadd.f32 %v787_v0, %v6471_v3 }
 0x978   :  { %v799_v9 = vadd.f32 %v792_v2, %v6467_v1  ;;  %v800_v10 = vadd.f32 %v793_v6, %v6465_v63  ;;  %v801_v11 = vadd.f32 %v794_v8, %v6473_v5  ;;  %v5444_v19 = vmul.f32 -1.442695, %v802_v12 }
 0x97a   :  { %6130 = vtanh.f32 %v799_v9  ;;  %v5441_v17 = vmul.f32 -1.442695, %v799_v9  ;;  %v5442_v45 = vmul.f32 -1.442695, %v800_v10  ;;  %v5443_v18 = vmul.f32 -1.442695, %v801_v11 }
 0x97b   :  { %6132 = vtanh.f32 %v800_v10 }
 0x97c   :  { %6134 = vtanh.f32 %v801_v11 }
 0x97d   :  { %6136 = vtanh.f32 %v802_v12 }
 0x97e   :  { %6138 = vpow2.f32 %v5441_v17 }
 0x97f   :  { %6140 = vpow2.f32 %v5442_v45 }
 0x980   :  { %6142 = vpow2.f32 %v5443_v18 }
 0x981   :  { %6144 = vpow2.f32 %v5444_v19 }
 0x984   :  { %v6131_v40 = vpop.eup %6130 }
 0x985   :  { %851 = vrot.lane.b32.xlu1 %v6131_v40, %s6390_s24  ;;  %v6133_v36 = vpop.eup %6132 }
 0x986   :  { %v6135_v15 = vpop.eup %6134  ;;  %853 = vrot.lane.b32.xlu0 %v6133_v36, %s6390_s24 }
 0x987   :  { %v6137_v16 = vpop.eup %6136 }
 0x988   :  { %v6139_v20 = vpop.eup %6138 }
 0x989   :  { %855 = vrot.lane.b32.xlu1 %v6135_v15, %s6390_s24  ;;  %v815_v21 = vadd.f32 1.0, %v6139_v20  ;;  %v6141_v22 = vpop.eup %6140 }
 0x98a   :  { %857 = vrot.lane.b32.xlu0 %v6137_v16, %s6390_s24  ;;  %v6143_v23 = vpop.eup %6142  ;;  %v816_v24 = vadd.f32 1.0, %v6141_v22 }
 0x98b   :  { %6146 = vrcp.f32 %v815_v21  ;;  %v6145_v26 = vpop.eup %6144  ;;  %v817_v27 = vadd.f32 1.0, %v6143_v23 }
 0x98c   :  { %v818_v28 = vadd.f32 1.0, %v6145_v26  ;;  %6148 = vrcp.f32 %v816_v24 }
 0x98d   :  { %6150 = vrcp.f32 %v817_v27 }
 0x98e   :  { %6152 = vrcp.f32 %v818_v28 }
 0x995   :  { %v6147_v29 = vpop.eup %6146 }
 0x996   :  { %v6149_v7 = vpop.eup %6148  ;;  %v843_v44 = vmul.f32 %v6147_v29, %v835_v43 }
 0x997   :  { %v6151_v42 = vpop.eup %6150  ;;  %v844_v53 = vmul.f32 %v6149_v7, %v836_v47 }
 0x998   :  { %v6153_v38 = vpop.eup %6152  ;;  %v845_v55 = vmul.f32 %v6151_v42, %v837_v52 }
 0x999   :  { %v846_v25 = vmul.f32 %v6153_v38, %v838_v56 }
 0x9f7   :  { %v852_v30 = vpop.permute.xlu1 %851 }
 0x9f8   :  { %v863_v32 = vmul.f32 %v6147_v29, %v852_v30  ;;  %v854_v14 = vpop.permute.xlu0 %853 }
 0x9f9   :  { %v864_v35 = vmul.f32 %v6149_v7, %v854_v14 }
 0x9fa   :  { %871 = vrot.lane.b32.xlu1 %v863_v32, %s6391_s25 }
 0x9fb   :  { %v856_v13 = vpop.permute.xlu1 %855  ;;  %873 = vrot.lane.b32.xlu0 %v864_v35, %s6391_s25 }
 0x9fc   :  { %v865_v37 = vmul.f32 %v6151_v42, %v856_v13  ;;  %v858_v39 = vpop.permute.xlu0 %857 }
 0x9fd   :  { %v866_v41 = vmul.f32 %v6153_v38, %v858_v39 }
 0x9fe   :  { %875 = vrot.lane.b32.xlu1 %v865_v37, %s6391_s25 }
 0x9ff   :  { %877 = vrot.lane.b32.xlu0 %v866_v41, %s6391_s25 }
 0xa6c   :  { %v872_v46 = vpop.permute.xlu1 %871 }
 0xa6d   :  { %v6628_v48 = vadd.f32 %v872_v46, %v843_v44  ;;  %v874_v54 = vpop.permute.xlu0 %873 }
 0xa6e   :  { %v6633_v61 = vadd.f32 %v874_v54, %v844_v53 }
 0xa6f   :  { %6154 = vtanh.f32 %v6628_v48 }
 0xa70   :  { %v876_v62 = vpop.permute.xlu1 %875  ;;  %6156 = vtanh.f32 %v6633_v61 }
 0xa71   :  { %v6635_v0 = vadd.f32 %v876_v62, %v845_v55  ;;  %v878_v31 = vpop.permute.xlu0 %877 }
 0xa72   :  { %v6639_v2 = vadd.f32 %v878_v31, %v846_v25 }
 0xa73   :  { %6158 = vtanh.f32 %v6635_v0 }
 0xa74   :  { %6160 = vtanh.f32 %v6639_v2 }
 0xa79   :  { %v6155_v34 = vpop.eup %6154 }
 0xa7a   :  { %895 = vrot.lane.b32.xlu1 %v6155_v34, %s6391_s25  ;;  %v6157_v4 = vpop.eup %6156 }
 0xa7b   :  { %897 = vrot.lane.b32.xlu0 %v6157_v4, %s6391_s25 }
 0xa7d   :  { %v6159_v33 = vpop.eup %6158 }
 0xa7e   :  { %899 = vrot.lane.b32.xlu1 %v6159_v33, %s6391_s25  ;;  %v6161_v6 = vpop.eup %6160 }
 0xa7f   :  { %901 = vrot.lane.b32.xlu0 %v6161_v6, %s6391_s25 }
 0xaec   :  { %v896_v8 = vpop.permute.xlu1 %895 }
 0xaed   :  { %v907_v9 = vmul.f32 %v6147_v29, %v896_v8  ;;  %v898_v10 = vpop.permute.xlu0 %897 }
 0xaee   :  { %v908_v11 = vmul.f32 %v6149_v7, %v898_v10 }
 0xaef   :  { %v915_v12 = vrot.slane %v907_v9, 3 }
 0xaf0   :  { %v900_v40 = vpop.permute.xlu1 %899  ;;  %v916_v15 = vrot.slane %v908_v11, 2 }
 0xaf1   :  { %v909_v36 = vmul.f32 %v6151_v42, %v900_v40  ;;  %v902_v16 = vpop.permute.xlu0 %901  ;;  %v1041_v40 = vrot.slane %v6633_v61, 7 }
 0xaf2   :  { %v910_v45 = vmul.f32 %v6153_v38, %v902_v16  ;;  %v917_v18 = vsel %vm300_vm2, %v916_v15, %v915_v12  ;;  %v1040_v12 = vrot.slane %v6628_v48, 7 }
 0xaf3   :  { %v918_v17 = vrot.slane %v909_v36, 1 }
 0xaf5   :  { %v919_v19 = vsel %vm303_vm3, %v918_v17, %v917_v18 }
 0xaf6   :  { %v920_v20 = vsel %vm306_vm4, %v910_v45, %v919_v19  ;;  %v1042_v19 = vrot.slane %v6635_v0, 7 }
 0xaf7   :  { %921 = vrot.lane.b32.xlu1 %v920_v20, %s6395_s30  ;;  %v1043_v20 = vrot.slane %v6639_v2, 7 }
 0xb69   :  { %v922_v21 = vpop.permute.xlu1 %921 }
 0xb6a   :  { %5713 = vmatmul.mubr.msk.f32.vlgmr.msra.gmra.mrb[4].mxu1 %vm310_vm5, %v922_v21 }
 0xb6b   :  { %5981 = vmatpush3.bf16.msra.mxu1 %v6509_v50  ;;  %5726 = vmatprep.mubr.msk.f32.mxu1 %vm6393_vm1, %v6394_v51 }
 0xb6c   :  { %5736 = vmatprep.subr.mxu1 %v6394_v51 }
 0xc3d   :  { %v991_v22 = vpop.f32.mrb[4].mxu1 }
 0xc3e   :  { %v996_v23 = vrot.slane %v991_v22, 4  ;;  %v997_v24 = vrot.slane %v991_v22, 5  ;;  %v5714_v26 = vpop.f32.mrb[5].mxu1  ;;  %v998_v27 = vrot.slane %v991_v22, 6  ;;  %v999_v30 = vrot.slane %v991_v22, 7 }
 0xc40   :  { %v1004_v28 = vadd.f32 %v996_v23, %v6467_v1  ;;  %v1005_v29 = vadd.f32 %v997_v24, %v6465_v63  ;;  %v1006_v32 = vadd.f32 %v998_v27, %v6473_v5  ;;  %v1007_v7 = vadd.f32 %v999_v30, %v6471_v3 }
 0xc42   :  { %6162 = vtanh.f32 %v1004_v28  ;;  %v5446_v37 = vmul.f32 -1.442695, %v1004_v28  ;;  %v5447_v38 = vmul.f32 -1.442695, %v1005_v29  ;;  %v5448_v39 = vmul.f32 -1.442695, %v1006_v32 }
 0xc43   :  { %6164 = vtanh.f32 %v1005_v29  ;;  %v5449_v41 = vmul.f32 -1.442695, %v1007_v7 }
 0xc44   :  { %6166 = vtanh.f32 %v1006_v32 }
 0xc45   :  { %6168 = vtanh.f32 %v1007_v7 }
 0xc46   :  { %6170 = vpow2.f32 %v5446_v37 }
 0xc47   :  { %6172 = vpow2.f32 %v5447_v38 }
 0xc48   :  { %6174 = vpow2.f32 %v5448_v39 }
 0xc49   :  { %6176 = vpow2.f32 %v5449_v41 }
 0xc4c   :  { %v6163_v14 = vpop.eup %6162 }
 0xc4d   :  { %v6165_v42 = vpop.eup %6164  ;;  %1056 = vrot.lane.b32.xlu0 %v6163_v14, %s6390_s24 }
 0xc4e   :  { %1058 = vrot.lane.b32.xlu1 %v6165_v42, %s6390_s24  ;;  %v6167_v35 = vpop.eup %6166 }
 0xc4f   :  { %v6169_v13 = vpop.eup %6168 }
 0xc50   :  { %v6171_v43 = vpop.eup %6170 }
 0xc51   :  { %1060 = vrot.lane.b32.xlu0 %v6167_v35, %s6390_s24  ;;  %v6173_v44 = vpop.eup %6172  ;;  %v1020_v46 = vadd.f32 1.0, %v6171_v43 }
 0xc52   :  { %1062 = vrot.lane.b32.xlu1 %v6169_v13, %s6390_s24  ;;  %v1021_v47 = vadd.f32 1.0, %v6173_v44  ;;  %v6175_v52 = vpop.eup %6174 }
 0xc53   :  { %v6177_v53 = vpop.eup %6176  ;;  %6178 = vrcp.f32 %v1020_v46  ;;  %v1022_v54 = vadd.f32 1.0, %v6175_v52 }
 0xc54   :  { %6180 = vrcp.f32 %v1021_v47  ;;  %v1023_v55 = vadd.f32 1.0, %v6177_v53 }
 0xc55   :  { %6182 = vrcp.f32 %v1022_v54 }
 0xc56   :  { %6184 = vrcp.f32 %v1023_v55 }
 0xc5d   :  { %v6179_v56 = vpop.eup %6178 }
 0xc5e   :  { %v6181_v25 = vpop.eup %6180  ;;  %v1048_v36 = vmul.f32 %v6179_v56, %v1040_v12 }
 0xc5f   :  { %v6183_v33 = vpop.eup %6182  ;;  %v1049_v15 = vmul.f32 %v6181_v25, %v1041_v40 }
 0xc60   :  { %v6185_v8 = vpop.eup %6184  ;;  %v1050_v21 = vmul.f32 %v6183_v33, %v1042_v19 }
 0xc61   :  { %v1051_v48 = vmul.f32 %v6185_v8, %v1043_v20 }
 0xcbf   :  { %v1057_v62 = vpop.permute.xlu0 %1056 }
 0xcc0   :  { %v1059_v31 = vpop.permute.xlu1 %1058  ;;  %v1068_v34 = vmul.f32 %v6179_v56, %v1057_v62 }
 0xcc1   :  { %v1069_v4 = vmul.f32 %v6181_v25, %v1059_v31 }
 0xcc2   :  { %1076 = vrot.lane.b32.xlu0 %v1068_v34, %s6391_s25 }
 0xcc3   :  { %1078 = vrot.lane.b32.xlu1 %v1069_v4, %s6391_s25  ;;  %v1061_v6 = vpop.permute.xlu0 %1060 }
 0xcc4   :  { %v1063_v9 = vpop.permute.xlu1 %1062  ;;  %v1070_v10 = vmul.f32 %v6183_v33, %v1061_v6 }
 0xcc5   :  { %v1071_v11 = vmul.f32 %v6185_v8, %v1063_v9 }
 0xcc6   :  { %1080 = vrot.lane.b32.xlu0 %v1070_v10, %s6391_s25 }
 0xcc7   :  { %1082 = vrot.lane.b32.xlu1 %v1071_v11, %s6391_s25 }
 0xd34   :  { %v1077_v16 = vpop.permute.xlu0 %1076 }
 0xd35   :  { %v1079_v17 = vpop.permute.xlu1 %1078  ;;  %v6669_v45 = vadd.f32 %v1077_v16, %v1048_v36 }
 0xd36   :  { %v6671_v18 = vadd.f32 %v1079_v17, %v1049_v15 }
 0xd37   :  { %6186 = vtanh.f32 %v6669_v45 }
 0xd38   :  { %6188 = vtanh.f32 %v6671_v18  ;;  %v1081_v22 = vpop.permute.xlu0 %1080 }
 0xd39   :  { %v1083_v61 = vpop.permute.xlu1 %1082  ;;  %v6677_v23 = vadd.f32 %v1081_v22, %v1050_v21 }
 0xd3a   :  { %v6679_v24 = vadd.f32 %v1083_v61, %v1051_v48 }
 0xd3b   :  { %6190 = vtanh.f32 %v6677_v23 }
 0xd3c   :  { %6192 = vtanh.f32 %v6679_v24 }
 0xd41   :  { %v6187_v26 = vpop.eup %6186 }
 0xd42   :  { %v6189_v0 = vpop.eup %6188  ;;  %1100 = vrot.lane.b32.xlu0 %v6187_v26, %s6391_s25 }
 0xd43   :  { %1102 = vrot.lane.b32.xlu1 %v6189_v0, %s6391_s25 }
 0xd45   :  { %v6191_v2 = vpop.eup %6190 }
 0xd46   :  { %v6193_v27 = vpop.eup %6192  ;;  %1104 = vrot.lane.b32.xlu0 %v6191_v2, %s6391_s25 }
 0xd47   :  { %1106 = vrot.lane.b32.xlu1 %v6193_v27, %s6391_s25 }
 0xdb4   :  { %v1101_v28 = vpop.permute.xlu0 %1100 }
 0xdb5   :  { %v1103_v29 = vpop.permute.xlu1 %1102  ;;  %v1112_v32 = vmul.f32 %v6179_v56, %v1101_v28 }
 0xdb6   :  { %v1113_v30 = vmul.f32 %v6181_v25, %v1103_v29 }
 0xdb7   :  { %v1120_v14 = vrot.slane %v1112_v32, 4 }
 0xdb8   :  { %v1121_v7 = vrot.slane %v1113_v30, 3  ;;  %v1105_v42 = vpop.permute.xlu0 %1104 }
 0xdb9   :  { %v1107_v35 = vpop.permute.xlu1 %1106  ;;  %v1114_v13 = vmul.f32 %v6183_v33, %v1105_v42 }
 0xdba   :  { %v1115_v37 = vmul.f32 %v6185_v8, %v1107_v35  ;;  %v1122_v41 = vsel %vm300_vm2, %v1121_v7, %v1120_v14  ;;  %v1246_v7 = vrot.slane %v6669_v45, 7  ;;  %v1247_v14 = vrot.slane %v6671_v18, 7 }
 0xdbb   :  { %v1123_v38 = vrot.slane %v1114_v13, 2 }
 0xdbc   :  { %v1125_v39 = vrot.slane %v1115_v37, 1 }
 0xdbd   :  { %v1124_v43 = vsel %vm303_vm3, %v1123_v38, %v1122_v41  ;;  %v1248_v41 = vrot.slane %v6677_v23, 7 }
 0xdbe   :  { %v1126_v44 = vsel %vm306_vm4, %v1125_v39, %v1124_v43  ;;  %v1249_v43 = vrot.slane %v6679_v24, 7 }
 0xdbf   :  { %1127 = vrot.lane.b32.xlu0 %v1126_v44, %s6395_s30 }
 0xe31   :  { %v1128_v46 = vpop.permute.xlu0 %1127 }
 0xe32   :  { %5720 = vmatmul.mubr.msk.f32.vlgmr.msra.gmra.mrb[6].mxu0 %vm310_vm5, %v1128_v46 }
 0xe33   :  { %5984 = vmatpush3.bf16.msra.mxu0 %v6509_v50  ;;  %5733 = vmatprep.mubr.msk.f32.mxu0 %vm6393_vm1, %v6394_v51 }
 0xe34   :  { %5988 = vmatprep.subr.bf16.mxu0 %v6392_v49 }
 0xf05   :  { %v1197_v47 = vpop.f32.mrb[6].mxu0 }
 0xf06   :  { %v1202_v52 = vrot.slane %v1197_v47, 3  ;;  %v1203_v53 = vrot.slane %v1197_v47, 4  ;;  %v5721_v54 = vpop.f32.mrb[7].mxu0  ;;  %v1204_v55 = vrot.slane %v1197_v47, 5  ;;  %v1205_v25 = vrot.slane %v1197_v47, 6 }
 0xf08   :  { %v1210_v56 = vadd.f32 %v1202_v52, %v6467_v1  ;;  %v1211_v62 = vadd.f32 %v1203_v53, %v6465_v63  ;;  %v1212_v31 = vadd.f32 %v1204_v55, %v6473_v5  ;;  %v1213_v50 = vadd.f32 %v1205_v25, %v6471_v3 }
 0xf0a   :  { %6194 = vtanh.f32 %v1210_v56  ;;  %v5451_v8 = vmul.f32 -1.442695, %v1210_v56  ;;  %v5452_v9 = vmul.f32 -1.442695, %v1211_v62  ;;  %v5453_v10 = vmul.f32 -1.442695, %v1212_v31 }
 0xf0b   :  { %6196 = vtanh.f32 %v1211_v62  ;;  %v5454_v11 = vmul.f32 -1.442695, %v1213_v50 }
 0xf0c   :  { %6198 = vtanh.f32 %v1212_v31 }
 0xf0d   :  { %6200 = vtanh.f32 %v1213_v50 }
 0xf0e   :  { %6202 = vpow2.f32 %v5451_v8 }
 0xf0f   :  { %6204 = vpow2.f32 %v5452_v9 }
 0xf10   :  { %6206 = vpow2.f32 %v5453_v10 }
 0xf11   :  { %6208 = vpow2.f32 %v5454_v11 }
 0xf14   :  { %v6195_v34 = vpop.eup %6194 }
 0xf15   :  { %v6197_v4 = vpop.eup %6196  ;;  %1262 = vrot.lane.b32.xlu1 %v6195_v34, %s6390_s24 }
 0xf16   :  { %1264 = vrot.lane.b32.xlu0 %v6197_v4, %s6390_s24  ;;  %v6199_v33 = vpop.eup %6198 }
 0xf17   :  { %v6201_v6 = vpop.eup %6200 }
 0xf18   :  { %v6203_v12 = vpop.eup %6202 }
 0xf19   :  { %1266 = vrot.lane.b32.xlu1 %v6199_v33, %s6390_s24  ;;  %v6205_v40 = vpop.eup %6204  ;;  %v1226_v36 = vadd.f32 1.0, %v6203_v12 }
 0xf1a   :  { %1268 = vrot.lane.b32.xlu0 %v6201_v6, %s6390_s24  ;;  %v1227_v15 = vadd.f32 1.0, %v6205_v40  ;;  %v6207_v16 = vpop.eup %6206 }
 0xf1b   :  { %v6209_v17 = vpop.eup %6208  ;;  %6210 = vrcp.f32 %v1226_v36  ;;  %v1228_v19 = vadd.f32 1.0, %v6207_v16 }
 0xf1c   :  { %6212 = vrcp.f32 %v1227_v15  ;;  %v1229_v20 = vadd.f32 1.0, %v6209_v17 }
 0xf1d   :  { %6214 = vrcp.f32 %v1228_v19 }
 0xf1e   :  { %6216 = vrcp.f32 %v1229_v20 }
 0xf25   :  { %v6211_v21 = vpop.eup %6210 }
 0xf26   :  { %v6213_v22 = vpop.eup %6212  ;;  %v1254_v42 = vmul.f32 %v6211_v21, %v1246_v7 }
 0xf27   :  { %v6215_v2 = vpop.eup %6214  ;;  %v1255_v35 = vmul.f32 %v6213_v22, %v1247_v14 }
 0xf28   :  { %v6217_v28 = vpop.eup %6216  ;;  %v1256_v44 = vmul.f32 %v6215_v2, %v1248_v41 }
 0xf29   :  { %v1257_v45 = vmul.f32 %v6217_v28, %v1249_v43 }
 0xf87   :  { %v1263_v48 = vpop.permute.xlu1 %1262 }
 0xf88   :  { %v1265_v61 = vpop.permute.xlu0 %1264  ;;  %v1274_v26 = vmul.f32 %v6211_v21, %v1263_v48 }
 0xf89   :  { %v1275_v0 = vmul.f32 %v6213_v22, %v1265_v61 }
 0xf8a   :  { %1282 = vrot.lane.b32.xlu1 %v1274_v26, %s6391_s25 }
 0xf8b   :  { %1284 = vrot.lane.b32.xlu0 %v1275_v0, %s6391_s25  ;;  %v1267_v27 = vpop.permute.xlu1 %1266 }
 0xf8c   :  { %v1269_v29 = vpop.permute.xlu0 %1268  ;;  %v1276_v30 = vmul.f32 %v6215_v2, %v1267_v27 }
 0xf8d   :  { %v1277_v32 = vmul.f32 %v6217_v28, %v1269_v29 }
 0xf8e   :  { %1286 = vrot.lane.b32.xlu1 %v1276_v30, %s6391_s25 }
 0xf8f   :  { %1288 = vrot.lane.b32.xlu0 %v1277_v32, %s6391_s25 }
 0xffc   :  { %v1283_v13 = vpop.permute.xlu1 %1282 }
 0xffd   :  { %v1285_v37 = vpop.permute.xlu0 %1284  ;;  %v6710_v38 = vadd.f32 %v1283_v13, %v1254_v42 }
 0xffe   :  { %v6712_v39 = vadd.f32 %v1285_v37, %v1255_v35 }
 0xfff   :  { %6218 = vtanh.f32 %v6710_v38 }
0x1000   :  { %6220 = vtanh.f32 %v6712_v39  ;;  %v1287_v46 = vpop.permute.xlu1 %1286 }
0x1001   :  { %v1289_v18 = vpop.permute.xlu0 %1288  ;;  %v6718_v47 = vadd.f32 %v1287_v46, %v1256_v44 }
0x1002   :  { %v6720_v52 = vadd.f32 %v1289_v18, %v1257_v45 }
0x1003   :  { %6222 = vtanh.f32 %v6718_v47 }
0x1004   :  { %6224 = vtanh.f32 %v6720_v52 }
0x1009   :  { %v6219_v53 = vpop.eup %6218 }
0x100a   :  { %v6221_v23 = vpop.eup %6220  ;;  %1306 = vrot.lane.b32.xlu1 %v6219_v53, %s6391_s25 }
0x100b   :  { %1308 = vrot.lane.b32.xlu0 %v6221_v23, %s6391_s25 }
0x100d   :  { %v6223_v24 = vpop.eup %6222 }
0x100e   :  { %v6225_v54 = vpop.eup %6224  ;;  %1310 = vrot.lane.b32.xlu1 %v6223_v24, %s6391_s25 }
0x100f   :  { %1312 = vrot.lane.b32.xlu0 %v6225_v54, %s6391_s25 }
0x107c   :  { %v1307_v55 = vpop.permute.xlu1 %1306 }
0x107d   :  { %v1309_v56 = vpop.permute.xlu0 %1308  ;;  %v1318_v25 = vmul.f32 %v6211_v21, %v1307_v55 }
0x107e   :  { %v1319_v62 = vmul.f32 %v6213_v22, %v1309_v56 }
0x107f   :  { %v1326_v50 = vrot.slane %v1318_v25, 5 }
0x1080   :  { %v1327_v31 = vrot.slane %v1319_v62, 4  ;;  %v1311_v34 = vpop.permute.xlu1 %1310 }
0x1081   :  { %v1313_v4 = vpop.permute.xlu0 %1312  ;;  %v1320_v33 = vmul.f32 %v6215_v2, %v1311_v34 }
0x1082   :  { %v1321_v6 = vmul.f32 %v6217_v28, %v1313_v4  ;;  %v1328_v10 = vsel %vm300_vm2, %v1327_v31, %v1326_v50  ;;  %v1452_v31 = vrot.slane %v6710_v38, 7  ;;  %v1453_v50 = vrot.slane %v6712_v39, 7 }
0x1083   :  { %v1329_v8 = vrot.slane %v1320_v33, 3 }
0x1084   :  { %v1331_v9 = vrot.slane %v1321_v6, 2 }
0x1085   :  { %v1330_v11 = vsel %vm303_vm3, %v1329_v8, %v1328_v10  ;;  %v1454_v10 = vrot.slane %v6718_v47, 7 }
0x1086   :  { %v1332_v12 = vsel %vm306_vm4, %v1331_v9, %v1330_v11  ;;  %v1455_v11 = vrot.slane %v6720_v52, 7 }
0x1087   :  { %1333 = vrot.lane.b32.xlu1 %v1332_v12, %s6395_s30 }
0x10f9   :  { %v1334_v40 = vpop.permute.xlu1 %1333 }
0x10fa   :  { %5727 = vmatmul.mubr.msk.f32.vlgmr.msra.gmra.mrb[6].mxu1 %vm310_vm5, %v1334_v40 }
0x10fb   :  { %5738 = vmatprep.mubr.msk.f32.mxu1 %vm6393_vm1, %v6394_v51 }
0x11cd   :  { %v1403_v36 = vpop.f32.mrb[6].mxu1 }
0x11ce   :  { %v1408_v15 = vrot.slane %v1403_v36, 2  ;;  %v1409_v16 = vrot.slane %v1403_v36, 3  ;;  %v5728_v17 = vpop.f32.mrb[7].mxu1  ;;  %v1410_v19 = vrot.slane %v1403_v36, 4  ;;  %v1411_v48 = vrot.slane %v1403_v36, 5 }
0x11d0   :  { %v1416_v20 = vadd.f32 %v1408_v15, %v6467_v1  ;;  %v1417_v21 = vadd.f32 %v1409_v16, %v6465_v63  ;;  %v1418_v22 = vadd.f32 %v1410_v19, %v6473_v5  ;;  %v1419_v61 = vadd.f32 %v1411_v48, %v6471_v3 }
0x11d2   :  { %6226 = vtanh.f32 %v1416_v20  ;;  %v5456_v28 = vmul.f32 -1.442695, %v1416_v20  ;;  %v5457_v29 = vmul.f32 -1.442695, %v1417_v21  ;;  %v5458_v30 = vmul.f32 -1.442695, %v1418_v22 }
0x11d3   :  { %6228 = vtanh.f32 %v1417_v21  ;;  %v5459_v32 = vmul.f32 -1.442695, %v1419_v61 }
0x11d4   :  { %6230 = vtanh.f32 %v1418_v22 }
0x11d5   :  { %6232 = vtanh.f32 %v1419_v61 }
0x11d6   :  { %6234 = vpow2.f32 %v5456_v28 }
0x11d7   :  { %6236 = vpow2.f32 %v5457_v29 }
0x11d8   :  { %6238 = vpow2.f32 %v5458_v30 }
0x11d9   :  { %6240 = vpow2.f32 %v5459_v32 }
0x11dc   :  { %v6227_v26 = vpop.eup %6226 }
0x11dd   :  { %v6229_v0 = vpop.eup %6228  ;;  %1468 = vrot.lane.b32.xlu0 %v6227_v26, %s6390_s24 }
0x11de   :  { %1470 = vrot.lane.b32.xlu1 %v6229_v0, %s6390_s24  ;;  %v6231_v2 = vpop.eup %6230 }
0x11df   :  { %v6233_v27 = vpop.eup %6232 }
0x11e0   :  { %v6235_v7 = vpop.eup %6234 }
0x11e1   :  { %1472 = vrot.lane.b32.xlu0 %v6231_v2, %s6390_s24  ;;  %v6237_v14 = vpop.eup %6236  ;;  %v1432_v42 = vadd.f32 1.0, %v6235_v7 }
0x11e2   :  { %1474 = vrot.lane.b32.xlu1 %v6233_v27, %s6390_s24  ;;  %v1433_v35 = vadd.f32 1.0, %v6237_v14  ;;  %v6239_v13 = vpop.eup %6238 }
0x11e3   :  { %v6241_v37 = vpop.eup %6240  ;;  %6242 = vrcp.f32 %v1432_v42  ;;  %v1434_v41 = vadd.f32 1.0, %v6239_v13 }
0x11e4   :  { %6244 = vrcp.f32 %v1433_v35  ;;  %v1435_v43 = vadd.f32 1.0, %v6241_v37 }
0x11e5   :  { %6246 = vrcp.f32 %v1434_v41 }
0x11e6   :  { %6248 = vrcp.f32 %v1435_v43 }
0x11ed   :  { %v6243_v44 = vpop.eup %6242 }
0x11ee   :  { %v6245_v46 = vpop.eup %6244  ;;  %v1460_v34 = vmul.f32 %v6243_v44, %v1452_v31 }
0x11ef   :  { %v6247_v24 = vpop.eup %6246  ;;  %v1461_v4 = vmul.f32 %v6245_v46, %v1453_v50 }
0x11f0   :  { %v6249_v55 = vpop.eup %6248  ;;  %v1462_v12 = vmul.f32 %v6247_v24, %v1454_v10 }
0x11f1   :  { %v1463_v38 = vmul.f32 %v6249_v55, %v1455_v11 }
0x124f   :  { %v1469_v45 = vpop.permute.xlu0 %1468 }
0x1250   :  { %v1471_v18 = vpop.permute.xlu1 %1470  ;;  %v1480_v53 = vmul.f32 %v6243_v44, %v1469_v45 }
0x1251   :  { %v1481_v23 = vmul.f32 %v6245_v46, %v1471_v18 }
0x1252   :  { %1488 = vrot.lane.b32.xlu0 %v1480_v53, %s6391_s25 }
0x1253   :  { %1490 = vrot.lane.b32.xlu1 %v1481_v23, %s6391_s25  ;;  %v1473_v54 = vpop.permute.xlu0 %1472 }
0x1254   :  { %v1475_v56 = vpop.permute.xlu1 %1474  ;;  %v1482_v62 = vmul.f32 %v6247_v24, %v1473_v54 }
0x1255   :  { %v1483_v25 = vmul.f32 %v6249_v55, %v1475_v56 }
0x1256   :  { %1492 = vrot.lane.b32.xlu0 %v1482_v62, %s6391_s25 }
0x1257   :  { %1494 = vrot.lane.b32.xlu1 %v1483_v25, %s6391_s25 }
0x12c4   :  { %v1489_v33 = vpop.permute.xlu0 %1488 }
0x12c5   :  { %v1491_v6 = vpop.permute.xlu1 %1490  ;;  %v6749_v8 = vadd.f32 %v1489_v33, %v1460_v34 }
0x12c6   :  { %v6751_v9 = vadd.f32 %v1491_v6, %v1461_v4 }
0x12c7   :  { %6250 = vtanh.f32 %v6749_v8 }
0x12c8   :  { %6252 = vtanh.f32 %v6751_v9  ;;  %v1493_v40 = vpop.permute.xlu0 %1492 }
0x12c9   :  { %v1495_v39 = vpop.permute.xlu1 %1494  ;;  %v6757_v36 = vadd.f32 %v1493_v40, %v1462_v12 }
0x12ca   :  { %v6759_v15 = vadd.f32 %v1495_v39, %v1463_v38 }
0x12cb   :  { %6254 = vtanh.f32 %v6757_v36 }
0x12cc   :  { %6256 = vtanh.f32 %v6759_v15 }
0x12d1   :  { %v6251_v16 = vpop.eup %6250 }
0x12d2   :  { %v6253_v47 = vpop.eup %6252  ;;  %1512 = vrot.lane.b32.xlu0 %v6251_v16, %s6391_s25 }
0x12d3   :  { %1514 = vrot.lane.b32.xlu1 %v6253_v47, %s6391_s25 }
0x12d5   :  { %v6255_v52 = vpop.eup %6254 }
0x12d6   :  { %v6257_v17 = vpop.eup %6256  ;;  %1516 = vrot.lane.b32.xlu0 %v6255_v52, %s6391_s25 }
0x12d7   :  { %1518 = vrot.lane.b32.xlu1 %v6257_v17, %s6391_s25 }
0x1344   :  { %v1513_v19 = vpop.permute.xlu0 %1512 }
0x1345   :  { %v1515_v20 = vpop.permute.xlu1 %1514  ;;  %v1524_v48 = vmul.f32 %v6243_v44, %v1513_v19  ;;  %v1658_v19 = vrot.slane %v6749_v8, 7 }
0x1346   :  { %v1525_v21 = vmul.f32 %v6245_v46, %v1515_v20  ;;  %v1659_v20 = vrot.slane %v6751_v9, 7 }
0x1347   :  { %v1532_v61 = vrot.slane %v1524_v48, 6 }
0x1348   :  { %v1533_v22 = vrot.slane %v1525_v21, 5  ;;  %v1517_v26 = vpop.permute.xlu0 %1516 }
0x1349   :  { %v1519_v0 = vpop.permute.xlu1 %1518  ;;  %v1526_v2 = vmul.f32 %v6247_v24, %v1517_v26 }
0x134a   :  { %v1527_v27 = vmul.f32 %v6249_v55, %v1519_v0  ;;  %v1534_v30 = vsel %vm300_vm2, %v1533_v22, %v1532_v61 }
0x134b   :  { %v1535_v28 = vrot.slane %v1526_v2, 4  ;;  %v1660_v2 = vrot.slane %v6757_v36, 7  ;;  %v1739_v36 = vrot.slane %v6448_v58, 6  ;;  %v19_v58 = vld [vmem:[%s7343_s1 + $0x40] sm:$0xff] }
0x134c   :  { %v1537_v29 = vrot.slane %v1527_v27, 3 }
0x134d   :  { %v1536_v32 = vsel %vm303_vm3, %v1535_v28, %v1534_v30  ;;  %v1661_v28 = vrot.slane %v6759_v15, 7  ;;  %v1741_v15 = vrot.slane %v6450_v59, 5  ;;  %v20_v59 = vld [vmem:[%s7343_s1 + $0x48] sm:$0xff] }
0x134e   :  { %v1538_v7 = vsel %vm306_vm4, %v1537_v29, %v1536_v32 }
0x134f   :  { %1539 = vrot.lane.b32.xlu0 %v1538_v7, %s6395_s30 }
0x13c1   :  { %v1540_v14 = vpop.permute.xlu0 %1539 }
0x13c2   :  { %5734 = vmatmul.mubr.msk.f32.vlgmr.msra.gmra.mrb[8].mxu0 %vm310_vm5, %v1540_v14 }
0x13c3   :  { %5752 = vmatprep.mubr.msk.f32.mxu0 %vm6393_vm1, %v6394_v51 }
0x1495   :  { %v1609_v42 = vpop.f32.mrb[8].mxu0 }
0x1496   :  { %v1614_v35 = vrot.slane %v1609_v42, 1  ;;  %v1615_v13 = vrot.slane %v1609_v42, 2  ;;  %v5735_v37 = vpop.f32.mrb[9].mxu0  ;;  %v1616_v41 = vrot.slane %v1609_v42, 3  ;;  %v1617_v45 = vrot.slane %v1609_v42, 4 }
0x1498   :  { %v1622_v43 = vadd.f32 %v1614_v35, %v6467_v1  ;;  %v1623_v44 = vadd.f32 %v1615_v13, %v6465_v63  ;;  %v1624_v46 = vadd.f32 %v1616_v41, %v6473_v5  ;;  %v1625_v18 = vadd.f32 %v1617_v45, %v6471_v3 }
0x1499   :  { %v1738_v35 = vrot.slane %v6446_v57, 7  ;;  %v1743_v41 = vrot.slane %v6456_v60, 4 }
0x149a   :  { %6258 = vtanh.f32 %v1622_v43  ;;  %v5461_v63 = vmul.f32 -1.442695, %v1622_v43  ;;  %v5462_v1 = vmul.f32 -1.442695, %v1623_v44  ;;  %v5463_v5 = vmul.f32 -1.442695, %v1624_v46 }
0x149b   :  { %6260 = vtanh.f32 %v1623_v44  ;;  %v5464_v3 = vmul.f32 -1.442695, %v1625_v18  ;;  %v1740_v57 = vsel %vm300_vm2, %v1739_v36, %v1738_v35 }
0x149c   :  { %6262 = vtanh.f32 %v1624_v46  ;;  %v17_v46 = vld [vmem:[%s7343_s1 + $0x30] sm:$0xff] }
0x149d   :  { %6264 = vtanh.f32 %v1625_v18  ;;  %5737 = vmatpush3.msra.mxu1 %v17_v46  ;;  %v1742_v18 = vsel %vm303_vm3, %v1741_v15, %v1740_v57 }
0x149e   :  { %6266 = vpow2.f32 %v5461_v63  ;;  %5985 = vmatprep.subr.bf16.mxu1 %v6392_v49 }
0x149f   :  { %6268 = vpow2.f32 %v5462_v1 }
0x14a0   :  { %6270 = vpow2.f32 %v5463_v5 }
0x14a1   :  { %6272 = vpow2.f32 %v5464_v3 }
0x14a4   :  { %v6259_v53 = vpop.eup %6258 }
0x14a5   :  { %v6261_v23 = vpop.eup %6260  ;;  %1674 = vrot.lane.b32.xlu1 %v6259_v53, %s6390_s24  ;;  %v5986_v53 = vpack.c.bf16 %v20_v59, %v19_v58 }
0x14a6   :  { %1676 = vrot.lane.b32.xlu0 %v6261_v23, %s6390_s24  ;;  %v6263_v24 = vpop.eup %6262  ;;  %v1744_v23 = vsel %vm306_vm4, %v1743_v41, %v1742_v18 }
0x14a7   :  { %v6265_v54 = vpop.eup %6264  ;;  %5739 = vmatmul.mubr.msk.f32.vlgmr.msra.gmra.mrb[8].mxu1 %vm39_vm0, %v1744_v23 }
0x14a8   :  { %v6267_v55 = vpop.eup %6266  ;;  %5987 = vmatpush3.bf16.msra.mxu1 %v5986_v53  ;;  %5745 = vmatprep.mubr.msk.f32.mxu1 %vm6393_vm1, %v6394_v51 }
0x14a9   :  { %1678 = vrot.lane.b32.xlu1 %v6263_v24, %s6390_s24  ;;  %v6269_v56 = vpop.eup %6268  ;;  %v1638_v62 = vadd.f32 1.0, %v6267_v55  ;;  %5994 = vmatprep.subr.bf16.mxu1 %v6392_v49 }
0x14aa   :  { %1680 = vrot.lane.b32.xlu0 %v6265_v54, %s6390_s24  ;;  %v1639_v25 = vadd.f32 1.0, %v6269_v56  ;;  %v6271_v31 = vpop.eup %6270 }
0x14ab   :  { %v6273_v50 = vpop.eup %6272  ;;  %6274 = vrcp.f32 %v1638_v62  ;;  %v1640_v34 = vadd.f32 1.0, %v6271_v31 }
0x14ac   :  { %6276 = vrcp.f32 %v1639_v25  ;;  %v1641_v4 = vadd.f32 1.0, %v6273_v50 }
0x14ad   :  { %6278 = vrcp.f32 %v1640_v34 }
0x14ae   :  { %6280 = vrcp.f32 %v1641_v4 }
0x14b5   :  { %v6782_v33 = vpop.eup %6274 }
0x14b6   :  { %v6784_v10 = vpop.eup %6276  ;;  %v1666_v21 = vmul.f32 %v6782_v33, %v1658_v19 }
0x14b7   :  { %v6790_v40 = vpop.eup %6278  ;;  %v1667_v48 = vmul.f32 %v6784_v10, %v1659_v20 }
0x14b8   :  { %v6792_v16 = vpop.eup %6280  ;;  %v1668_v8 = vmul.f32 %v6790_v40, %v1660_v2 }
0x14b9   :  { %v1669_v30 = vmul.f32 %v6792_v16, %v1661_v28 }
0x1517   :  { %v1675_v6 = vpop.permute.xlu1 %1674 }
0x1518   :  { %v1677_v11 = vpop.permute.xlu0 %1676  ;;  %v1686_v12 = vmul.f32 %v6782_v33, %v1675_v6 }
0x1519   :  { %v1687_v38 = vmul.f32 %v6784_v10, %v1677_v11 }
0x151a   :  { %1694 = vrot.lane.b32.xlu1 %v1686_v12, %s6391_s25 }
0x151b   :  { %1696 = vrot.lane.b32.xlu0 %v1687_v38, %s6391_s25  ;;  %v1679_v39 = vpop.permute.xlu1 %1678 }
0x151c   :  { %v1681_v47 = vpop.permute.xlu0 %1680  ;;  %v1688_v52 = vmul.f32 %v6790_v40, %v1679_v39 }
0x151d   :  { %v1689_v17 = vmul.f32 %v6792_v16, %v1681_v47 }
0x151e   :  { %1698 = vrot.lane.b32.xlu1 %v1688_v52, %s6391_s25 }
0x151f   :  { %1700 = vrot.lane.b32.xlu0 %v1689_v17, %s6391_s25 }
0x158c   :  { %v1695_v22 = vpop.permute.xlu1 %1694 }
0x158d   :  { %v1697_v61 = vpop.permute.xlu0 %1696  ;;  %v1706_v26 = vadd.f32 %v1695_v22, %v1666_v21 }
0x158e   :  { %v1707_v0 = vadd.f32 %v1697_v61, %v1667_v48 }
0x158f   :  { %6282 = vtanh.f32 %v1706_v26  ;;  %v1914_v27 = vrot.slane %v1706_v26, 7  ;;  %v21_v26 = vld [vmem:[%s7343_s1 + $0x50] sm:$0xff] }
0x1590   :  { %6284 = vtanh.f32 %v1707_v0  ;;  %v1915_v29 = vrot.slane %v1707_v0, 6  ;;  %v1699_v32 = vpop.permute.xlu1 %1698  ;;  %v22_v0 = vld [vmem:[%s7343_s1 + $0x58] sm:$0xff] }
0x1591   :  { %v1701_v7 = vpop.permute.xlu0 %1700  ;;  %v1708_v14 = vadd.f32 %v1699_v32, %v1668_v8  ;;  %v5989_v2 = vpack.c.bf16 %v22_v0, %v21_v26 }
0x1592   :  { %v1916_v9 = vsel %vm300_vm2, %v1915_v29, %v1914_v27  ;;  %v1709_v42 = vadd.f32 %v1701_v7, %v1669_v30 }
0x1593   :  { %6286 = vtanh.f32 %v1708_v14  ;;  %v1917_v13 = vrot.slane %v1708_v14, 5  ;;  %5990 = vmatpush3.bf16.msra.mxu0 %v5989_v2 }
0x1594   :  { %6288 = vtanh.f32 %v1709_v42  ;;  %v1919_v37 = vrot.slane %v1709_v42, 4  ;;  %5991 = vmatprep.subr.bf16.mxu0 %v6392_v49  ;;  %v5469_v49 = vld [vmem:[%s7343_s1 + $0x60] ss:$0 sm:$0xff] }
0x1595   :  { %v1918_v43 = vsel %vm303_vm3, %v1917_v13, %v1916_v9 }
0x1596   :  { %v1920_v44 = vsel %vm306_vm4, %v1919_v37, %v1918_v43 }
0x1599   :  { %v6283_v45 = vpop.eup %6282 }
0x159a   :  { %v6285_v60 = vpop.eup %6284  ;;  %1718 = vrot.lane.b32.xlu1 %v6283_v45, %s6391_s25 }
0x159b   :  { %1720 = vrot.lane.b32.xlu0 %v6285_v60, %s6391_s25 }
0x159d   :  { %v6287_v24 = vpop.eup %6286 }
0x159e   :  { %v6289_v54 = vpop.eup %6288  ;;  %1722 = vrot.lane.b32.xlu1 %v6287_v24, %s6391_s25 }
0x159f   :  { %1724 = vrot.lane.b32.xlu0 %v6289_v54, %s6391_s25 }
0x160c   :  { %v1719_v63 = vpop.permute.xlu1 %1718 }
0x160d   :  { %v1721_v1 = vpop.permute.xlu0 %1720  ;;  %v1730_v3 = vmul.f32 %v6782_v33, %v1719_v63  ;;  %v5465_v33 = vld [vmem:[%s7343_s1 + $0x38] ss:$0 sm:$0xff] }
0x160e   :  { %v1731_v5 = vmul.f32 %v6784_v10, %v1721_v1 }
0x160f   :  { %v1821_v56 = vrot.slane %v1730_v3, 7 }
0x1610   :  { %v1822_v55 = vrot.slane %v1731_v5, 6  ;;  %v1723_v62 = vpop.permute.xlu1 %1722 }
0x1611   :  { %v1725_v25 = vpop.permute.xlu0 %1724  ;;  %v1732_v31 = vmul.f32 %v6790_v40, %v1723_v62 }
0x1612   :  { %v1733_v50 = vmul.f32 %v6792_v16, %v1725_v25  ;;  %v1823_v4 = vsel %vm300_vm2, %v1822_v55, %v1821_v56 }
0x1613   :  { %v1824_v34 = vrot.slane %v1732_v31, 5 }
0x1614   :  { %v1826_v6 = vrot.slane %v1733_v50, 4 }
0x1615   :  { %v1825_v11 = vsel %vm303_vm3, %v1824_v34, %v1823_v4 }
0x1616   :  { %v1827_v12 = vsel %vm306_vm4, %v1826_v6, %v1825_v11 }
0x1617   :  { %1828 = vrot.lane.b32.xlu1 %v1827_v12, %s6395_s30 }
0x1689   :  { %v1829_v10 = vpop.permute.xlu1 %1828 }
0x168a   :  { %5746 = vmatmul.mubr.msk.f32.vlgmr.msra.gmra.mrb[8].mxu1 %vm310_vm5, %v1829_v10 }
0x168b   :  { %5766 = vmatprep.mubr.msk.f32.mxu1 %vm6393_vm1, %v6394_v51  ;;  %5996 = vmatpush3.bf16.msra.mxu1 %v5989_v2 }
0x175d   :  { %v1898_v38 = vpop.f32.mrb[8].mxu1 }
0x175e   :  { %v6017_v40 = vadd.f32 %v5465_v33, %v1898_v38  ;;  %v5747_v39 = vpop.f32.mrb[9].mxu1 }
0x1760   :  { %6290 = vtanh.f32 %v6017_v40  ;;  %v5468_v47 = vmul.f32 -1.442695, %v6017_v40 }
0x1762   :  { %6292 = vpow2.f32 %v5468_v47 }
0x176a   :  { %v6291_v16 = vpop.eup %6290 }
0x176b   :  { %1924 = vrot.lane.b32.xlu0 %v6291_v16, %s6390_s24 }
0x176c   :  { %v6293_v52 = vpop.eup %6292 }
0x176d   :  { %v1906_v17 = vadd.f32 1.0, %v6293_v52 }
0x176f   :  { %6294 = vrcp.f32 %v1906_v17 }
0x1779   :  { %v6295_v19 = vpop.eup %6294 }
0x177a   :  { %v1922_v48 = vmul.f32 %v6295_v19, %v1920_v44 }
0x17dd   :  { %v1925_v20 = vpop.permute.xlu0 %1924 }
0x17de   :  { %v1927_v21 = vmul.f32 %v6295_v19, %v1925_v20  ;;  %v25_v20 = vld [vmem:[%s7343_s1 + $0x70] sm:$0xff] }
0x17e0   :  { %1929 = vrot.lane.b32.xlu1 %v1927_v21, %s6391_s25 }
0x1852   :  { %v1930_v22 = vpop.permute.xlu1 %1929 }
0x1853   :  { %v1932_v61 = vadd.f32 %v1930_v22, %v1922_v48 }
0x1855   :  { %6296 = vtanh.f32 %v1932_v61 }
0x185f   :  { %v6297_v27 = vpop.eup %6296 }
0x1860   :  { %1935 = vrot.lane.b32.xlu0 %v6297_v27, %s6391_s25  ;;  %v28_v27 = vld [vmem:[%s7343_s1 + $0x88] sm:$0xff] }
0x18d2   :  { %v1936_v28 = vpop.permute.xlu0 %1935 }
0x18d3   :  { %v6858_v29 = vmul.f32 %v6295_v19, %v1936_v28  ;;  %v24_v19 = vld [vmem:[%s7343_s1 + $0x68] sm:$0xff] }
0x18d4   :  { %v5997_v21 = vpack.c.bf16 %v25_v20, %v24_v19 }
0x18d5   :  { %1944 = vrot.lane.b32.xlu1 %v6858_v29, %s6395_s30 }
0x1947   :  { %v1945_v8 = vpop.permute.xlu1 %1944 }
0x1948   :  { %5753 = vmatmul.mubr.msk.f32.vlgmr.msra.gmra.mrb[10].mxu0 %vm310_vm5, %v1945_v8 }
0x1949   :  { %5993 = vmatpush3.bf16.msra.mxu0 %v5989_v2  ;;  %5759 = vmatprep.mubr.msk.f32.mxu0 %vm6393_vm1, %v6394_v51  ;;  %v27_v2 = vld [vmem:[%s7343_s1 + $0x80] sm:$0xff] }
0x194a   :  { %5998 = vmatprep.subr.bf16.mxu0 %v5997_v21  ;;  %v6901_v28 = vpack.c.bf16 %v28_v27, %v27_v2 }
0x194c   :  { %6002 = vmatprep.subr.bf16.mxu1 %v6901_v28 }
0x1a1b   :  { %v2014_v9 = vpop.f32.mrb[10].mxu0 }
0x1a1c   :  { %v2015_v30 = vadd.f32 %v5469_v49, %v2014_v9  ;;  %v5754_v32 = vpop.f32.mrb[11].mxu0 }
0x1a1d   :  { %v6922_v32 = vld [vmem:[%s7343_s1 + $0x90] ss:$0 sm:$0xff] }
0x1a1e   :  { %6298 = vtanh.f32 %v2015_v30  ;;  %v5471_v14 = vmul.f32 -1.442695, %v2015_v30 }
0x1a20   :  { %6300 = vpow2.f32 %v5471_v14 }
0x1a28   :  { %v6299_v7 = vpop.eup %6298 }
0x1a29   :  { %2027 = vrot.lane.b32.xlu0 %v6299_v7, %s6390_s24 }
0x1a2a   :  { %v6301_v42 = vpop.eup %6300 }
0x1a2b   :  { %v2021_v35 = vadd.f32 1.0, %v6301_v42 }
0x1a2d   :  { %6302 = vrcp.f32 %v2021_v35 }
0x1a37   :  { %v6303_v36 = vpop.eup %6302 }
0x1a38   :  { %v2025_v37 = vmul.f32 %v6303_v36, %v1932_v61 }
0x1a9b   :  { %v2028_v13 = vpop.permute.xlu0 %2027 }
0x1a9c   :  { %v2030_v15 = vmul.f32 %v6303_v36, %v2028_v13 }
0x1a9e   :  { %2032 = vrot.lane.b32.xlu1 %v2030_v15, %s6391_s25 }
0x1b10   :  { %v2033_v41 = vpop.permute.xlu1 %2032 }
0x1b11   :  { %v2035_v43 = vadd.f32 %v2033_v41, %v2025_v37 }
0x1b13   :  { %6304 = vtanh.f32 %v2035_v43 }
0x1b1d   :  { %v6305_v44 = vpop.eup %6304 }
0x1b1e   :  { %2038 = vrot.lane.b32.xlu0 %v6305_v44, %s6391_s25 }
0x1b90   :  { %v2039_v45 = vpop.permute.xlu0 %2038 }
0x1b91   :  { %v2041_v46 = vmul.f32 %v6303_v36, %v2039_v45 }
0x1b93   :  { %2043 = vrot.lane.b32.xlu1 %v2041_v46, %s6395_s30  ;;  %v2245_v39 = vcombine.low %v6858_v29, %v2041_v46  ;;  %v5476_v29 = vld [vmem:[%s7343_s1 + $0x78] ss:$0 sm:$0xff] }
0x1c05   :  { %v2044_v57 = vpop.permute.xlu1 %2043 }
0x1c06   :  { %5760 = vmatmul.mubr.msk.f32.vlgmr.msra.gmra.mrb[12].mxu0 %vm310_vm5, %v2044_v57 }
0x1c07   :  { %6000 = vmatpush3.bf16.msra.mxu0 %v5997_v21 }
0x1c08   :  { %5783 = vmatprep.subr.mxu0 %v6394_v51 }
0x1cd9   :  { %v2113_v58 = vpop.f32.mrb[12].mxu0 }
0x1cda   :  { %v2114_v59 = vadd.f32 %v5469_v49, %v2113_v58  ;;  %v5761_v60 = vpop.f32.mrb[13].mxu0 }
0x1cdc   :  { %6306 = vtanh.f32 %v2114_v59  ;;  %v5473_v53 = vmul.f32 -1.442695, %v2114_v59 }
0x1cde   :  { %6308 = vpow2.f32 %v5473_v53 }
0x1ce6   :  { %v6307_v18 = vpop.eup %6306 }
0x1ce7   :  { %2126 = vrot.lane.b32.xlu0 %v6307_v18, %s6390_s24 }
0x1ce8   :  { %v6309_v23 = vpop.eup %6308 }
0x1ce9   :  { %v2120_v24 = vadd.f32 1.0, %v6309_v23 }
0x1ceb   :  { %6310 = vrcp.f32 %v2120_v24 }
0x1cf5   :  { %v6311_v54 = vpop.eup %6310 }
0x1cf6   :  { %v2124_v5 = vmul.f32 %v6311_v54, %v2035_v43 }
0x1d59   :  { %v2127_v63 = vpop.permute.xlu0 %2126 }
0x1d5a   :  { %v2129_v1 = vmul.f32 %v6311_v54, %v2127_v63 }
0x1d5c   :  { %2131 = vrot.lane.b32.xlu1 %v2129_v1, %s6391_s25 }
0x1dce   :  { %v2132_v3 = vpop.permute.xlu1 %2131 }
0x1dcf   :  { %v2134_v55 = vadd.f32 %v2132_v3, %v2124_v5 }
0x1dd1   :  { %6312 = vtanh.f32 %v2134_v55 }
0x1ddb   :  { %v6313_v56 = vpop.eup %6312 }
0x1ddc   :  { %2137 = vrot.lane.b32.xlu0 %v6313_v56, %s6391_s25 }
0x1e4e   :  { %v2138_v62 = vpop.permute.xlu0 %2137 }
0x1e4f   :  { %v2140_v25 = vmul.f32 %v6311_v54, %v2138_v62 }
0x1e51   :  { %2142 = vrot.lane.b32.xlu1 %v2140_v25, %s6395_s30 }
0x1ec3   :  { %v2143_v31 = vpop.permute.xlu1 %2142 }
0x1ec4   :  { %5767 = vmatmul.mubr.msk.f32.vlgmr.msra.gmra.mrb[10].mxu1 %vm310_vm5, %v2143_v31 }
0x1ec5   :  { %6004 = vmatpush3.bf16.msra.mxu1 %v6901_v28 }
0x1ec6   :  { %5788 = vmatprep.subr.mxu1 %v6394_v51 }
0x1f97   :  { %v2212_v50 = vpop.f32.mrb[10].mxu1 }
0x1f98   :  { %v2213_v34 = vadd.f32 %v5469_v49, %v2212_v50  ;;  %v5768_v4 = vpop.f32.mrb[11].mxu1 }
0x1f9a   :  { %6314 = vtanh.f32 %v2213_v34  ;;  %v5475_v11 = vmul.f32 -1.442695, %v2213_v34 }
0x1f9c   :  { %6316 = vpow2.f32 %v5475_v11 }
0x1fa4   :  { %v6315_v6 = vpop.eup %6314 }
0x1fa5   :  { %2225 = vrot.lane.b32.xlu0 %v6315_v6, %s6390_s24 }
0x1fa6   :  { %v6317_v12 = vpop.eup %6316 }
0x1fa7   :  { %v2219_v10 = vadd.f32 1.0, %v6317_v12 }
0x1fa9   :  { %6318 = vrcp.f32 %v2219_v10 }
0x1fb3   :  { %v6319_v33 = vpop.eup %6318 }
0x1fb4   :  { %v2223_v16 = vmul.f32 %v6319_v33, %v2134_v55 }
0x2017   :  { %v2226_v38 = vpop.permute.xlu0 %2225 }
0x2018   :  { %v2228_v40 = vmul.f32 %v6319_v33, %v2226_v38 }
0x201a   :  { %2230 = vrot.lane.b32.xlu1 %v2228_v40, %s6391_s25 }
0x201e   :  { %2247 = vrot.lane.b32.xlu1 %v2245_v39, %s6395_s30 }
0x208c   :  { %v2231_v47 = vpop.permute.xlu1 %2230 }
0x208d   :  { %v2233_v52 = vadd.f32 %v2231_v47, %v2223_v16 }
0x208f   :  { %6320 = vtanh.f32 %v2233_v52 }
0x2090   :  { %v2248_v17 = vpop.permute.xlu1 %2247 }
0x2091   :  { %5773 = vmatprep.mubr.msk.f32.mxu0 %vm310_vm5, %v2248_v17 }
0x2099   :  { %v6321_v48 = vpop.eup %6320 }
0x209a   :  { %2236 = vrot.lane.b32.xlu0 %v6321_v48, %s6391_s25 }
0x210c   :  { %v2237_v22 = vpop.permute.xlu0 %2236 }
0x210d   :  { %v2239_v61 = vmul.f32 %v6319_v33, %v2237_v22 }
0x210f   :  { %v2246_v26 = vcombine.low %v2140_v25, %v2239_v61 }
0x2111   :  { %2249 = vrot.lane.b32.xlu0 %v2246_v26, %s6395_s30 }
0x2183   :  { %v2250_v0 = vpop.permute.xlu0 %2249 }
0x2184   :  { %5774 = vmatmul.mubr.msk.f32.vlgmr.msra.gmra.mrb[14].mxu0 %vm310_vm5, %v2250_v0 }
0x2185   :  { %5785 = vmatprep.mubr.msk.f32.mxu0 %vm6393_vm1, %v6394_v51 }
0x2257   :  { %v5775_v8 = vpop.f32.mrb[14].mxu0 }
0x2258   :  { %v2321_v49 = vpop.f32.mrb[15].mxu0  ;;  %v6911_v30 = vadd.f32 %v5775_v8, %v5476_v29 }
0x2259   :  { %v6909_v9 = vadd.f32 %v5476_v29, %v2321_v49 }
0x225b   :  { %5780 = vmatprep.mubr.msk.f32.mxu1 %vm310_vm5, %v6909_v9 }
0x225c   :  { %5781 = vmatmul.mubr.msk.f32.vlgmr.msra.gmra.mrb[12].mxu1 %vm310_vm5, %v6911_v30 }
0x225d   :  { %5790 = vmatprep.mubr.msk.f32.mxu1 %vm6393_vm1, %v6394_v51 }
0x232f   :  { %v5782_v7 = vpop.f32.mrb[12].mxu1 }
0x2330   :  { %v2406_v14 = vpop.f32.mrb[13].mxu1  ;;  %v6928_v35 = vadd.f32 %v5782_v7, %v6922_v32 }
0x2331   :  { %v6925_v42 = vadd.f32 %v6922_v32, %v2406_v14 }
0x2332   :  { %v6942_v13 = vcombine.high %v6928_v35, %v6928_v35 }
0x2333   :  { %2419 = vrot.lane.b32.xlu1 %v6925_v42, %s6396_s29  ;;  %v6934_v36 = vcombine.high %v6925_v42, %v6925_v42 }
0x2335   :  { %2495 = vrot.lane.b32.xlu0 %v6934_v36, %s6396_s29 }
0x2337   :  { %2571 = vrot.lane.b32.xlu1 %v6928_v35, %s6396_s29 }
0x2339   :  { %2647 = vrot.lane.b32.xlu0 %v6942_v13, %s6396_s29 }
0x233b   :  { %2924 = vrot.lane.b32.xlu1 %v6928_v35, %s6395_s30 }
0x233d   :  { %2768 = vrot.lane.b32.xlu0 %v6925_v42, %s6395_s30 }
0x233f   :  { %3080 = vrot.lane.b32.xlu1 %v6925_v42, %s6397_s3 }
0x2341   :  { %3001 = vrot.lane.b32.xlu0 %v6942_v13, %s6395_s30 }
0x2343   :  { %2847 = vrot.lane.b32.xlu1 %v6934_v36, %s6395_s30 }
0x23a5   :  { %v2420_v15 = vpop.permute.xlu1 %2419 }
0x23a6   :  { %5784 = vmatpush3.xpose.msk.msra.mxu0 %vm39_vm0, %v2420_v15 }
0x23a7   :  { %v2496_v37 = vpop.permute.xlu0 %2495  ;;  %5793 = vmatprep.subr.mxu0 %v6394_v51 }
0x23a8   :  { %5789 = vmatpush3.xpose.msk.msra.mxu1 %vm39_vm0, %v2496_v37 }
0x23a9   :  { %5786 = vmatmul.mubr.msk.f32.vlgmr.msra.gmra.mrb[16].mxu0 %vm39_vm0, %v6925_v42  ;;  %v2572_v41 = vpop.permute.xlu1 %2571  ;;  %5798 = vmatprep.subr.mxu1 %v6394_v51 }
0x23aa   :  { %5794 = vmatpush3.xpose.msk.msra.mxu0 %vm39_vm0, %v2572_v41  ;;  %5795 = vmatprep.mubr.msk.f32.mxu0 %vm6393_vm1, %v6394_v51 }
0x23ab   :  { %5791 = vmatmul.mubr.msk.f32.vlgmr.msra.gmra.mrb[14].mxu1 %vm39_vm0, %v6934_v36  ;;  %v2648_v43 = vpop.permute.xlu0 %2647  ;;  %5803 = vmatprep.subr.mxu0 %v6394_v51 }
0x23ac   :  { %5799 = vmatpush3.xpose.msk.msra.mxu1 %vm39_vm0, %v2648_v43  ;;  %5800 = vmatprep.mubr.msk.f32.mxu1 %vm6393_vm1, %v6394_v51 }
0x23ad   :  { %5796 = vmatmul.mubr.msk.f32.vlgmr.msra.gmra.mrb[18].mxu0 %vm39_vm0, %v6928_v35  ;;  %v6973_v44 = vpop.permute.xlu1 %2924  ;;  %5808 = vmatprep.subr.mxu1 %v6394_v51 }
0x23ae   :  { %5805 = vmatprep.mubr.msk.f32.mxu0 %vm6393_vm1, %v6394_v51 }
0x23af   :  { %5801 = vmatmul.mubr.msk.f32.vlgmr.msra.gmra.mrb[16].mxu1 %vm39_vm0, %v6942_v13  ;;  %v2769_v45 = vpop.permute.xlu0 %2768 }
0x23b0   :  { %5804 = vmatpush3.msk.msra.mxu0 %vm2774_vm6, %v2769_v45  ;;  %5810 = vmatprep.mubr.msk.f32.mxu1 %vm6393_vm1, %v6394_v51 }
0x23b1   :  { %v6983_v46 = vpop.permute.xlu1 %3080  ;;  %5813 = vmatprep.subr.mxu0 %v6394_v51 }
0x23b3   :  { %v3002_v55 = vpop.permute.xlu0 %3001 }
0x23b5   :  { %v2848_v57 = vpop.permute.xlu1 %2847 }
0x23b6   :  { %5809 = vmatpush3.msk.msra.mxu1 %vm2774_vm6, %v2848_v57 }
0x23b7   :  { %5818 = vmatprep.subr.mxu1 %v6394_v51 }
0x247c   :  { %v2491_v58 = vpop.f32.mrb[16].mxu0 }
0x247d   :  { %v5787_v59 = vpop.f32.mrb[17].mxu0  ;;  %v2724_v60 = vsel %vm2723_vm7, %v2491_v58, -inf }
0x247e   :  { %2725 = vmax.xlane.f32.xlu1 %v2724_v60  ;;  %v2567_v18 = vpop.f32.mrb[14].mxu1 }
0x247f   :  { %v5792_v53 = vpop.f32.mrb[15].mxu1  ;;  %v2727_v23 = vsel %vm2723_vm7, %v2567_v18, -inf }
0x2480   :  { %v2643_v24 = vpop.f32.mrb[18].mxu0  ;;  %2728 = vmax.xlane.f32.xlu0 %v2727_v23 }
0x2481   :  { %v5797_v54 = vpop.f32.mrb[19].mxu0  ;;  %v2730_v5 = vsel %vm2723_vm7, %v2643_v24, -inf }
0x2482   :  { %v2719_v63 = vpop.f32.mrb[16].mxu1 }
0x2483   :  { %v5802_v1 = vpop.f32.mrb[17].mxu1  ;;  %v2733_v3 = vsel %vm2723_vm7, %v2719_v63, -inf }
0x2484   :  { %2731 = vmax.xlane.f32.xlu0 %v2730_v5  ;;  %2734 = vmax.xlane.f32.xlu1 %v2733_v3 }
0x2495   :  { %3078 = vrot.lane.b32.xlu1 %v6925_v42, %s6398_s4 }
0x249a   :  { %3158 = vrot.lane.b32.xlu0 %v6934_v36, %s6397_s3 }
0x250b   :  { %v2726_v56 = vpop.xlane.xlu1 %2725 }
0x250c   :  { %v2736_v62 = vsub.f32 %v2491_v58, %v2726_v56 }
0x250d   :  { %v2729_v25 = vpop.xlane.xlu0 %2728 }
0x250e   :  { %v2740_v31 = vmul.f32 1.442695, %v2736_v62  ;;  %v2737_v50 = vsub.f32 %v2567_v18, %v2729_v25 }
0x2510   :  { %6322 = vpow2.f32 %v2740_v31  ;;  %v2742_v34 = vmul.f32 1.442695, %v2737_v50 }
0x2511   :  { %v2732_v10 = vpop.xlane.xlu0 %2731  ;;  %v2735_v33 = vpop.xlane.xlu1 %2734 }
0x2512   :  { %6324 = vpow2.f32 %v2742_v34  ;;  %v2738_v38 = vsub.f32 %v2643_v24, %v2732_v10  ;;  %v2739_v40 = vsub.f32 %v2719_v63, %v2735_v33 }
0x2514   :  { %v2744_v39 = vmul.f32 1.442695, %v2738_v38  ;;  %v2746_v16 = vmul.f32 1.442695, %v2739_v40 }
0x2515   :  { %v3159_v20 = vpop.permute.xlu0 %3158  ;;  %v3079_v21 = vpop.permute.xlu1 %3078 }
0x2516   :  { %6326 = vpow2.f32 %v2744_v39 }
0x2517   :  { %6328 = vpow2.f32 %v2746_v16 }
0x251a   :  { %v6323_v4 = vpop.eup %6322 }
0x251b   :  { %v2748_v6 = vsel %vm2723_vm7, %v6323_v4, 0.0 }
0x251c   :  { %v6325_v11 = vpop.eup %6324  ;;  %2749 = vadd.xlane.f32.xlu0 %v2748_v6 }
0x251d   :  { %v2751_v12 = vsel %vm2723_vm7, %v6325_v11, 0.0 }
0x251e   :  { %2752 = vadd.xlane.f32.xlu1 %v2751_v12 }
0x2520   :  { %v6327_v47 = vpop.eup %6326 }
0x2521   :  { %v6329_v52 = vpop.eup %6328  ;;  %v2754_v17 = vsel %vm2723_vm7, %v6327_v47, 0.0 }
0x2522   :  { %v2757_v19 = vsel %vm2723_vm7, %v6329_v52, 0.0 }
0x252f   :  { %3236 = vrot.lane.b32.xlu1 %v6928_v35, %s6397_s3 }
0x2532   :  { %3156 = vrot.lane.b32.xlu0 %v6934_v36, %s6398_s4 }
0x2551   :  { %2755 = vadd.xlane.f32.xlu0 %v2754_v17 }
0x2553   :  { %2758 = vadd.xlane.f32.xlu1 %v2757_v19 }
0x2564   :  { %3234 = vrot.lane.b32.xlu1 %v6928_v35, %s6398_s4 }
0x2567   :  { %3314 = vrot.lane.b32.xlu0 %v6942_v13, %s6397_s3 }
0x256b   :  { %3312 = vrot.lane.b32.xlu0 %v6942_v13, %s6398_s4 }
0x25a9   :  { %v2750_v48 = vpop.xlane.xlu0 %2749 }
0x25aa   :  { %6330 = vrcp.f32 %v2750_v48 }
0x25ab   :  { %v2753_v22 = vpop.xlane.xlu1 %2752 }
0x25ac   :  { %6332 = vrcp.f32 %v2753_v22 }
0x25ad   :  { %v3157_v27 = vpop.permute.xlu0 %3156 }
0x25af   :  { %v3237_v29 = vpop.permute.xlu1 %3236 }
0x25b4   :  { %v6331_v61 = vpop.eup %6330 }
0x25b5   :  { %v2764_v26 = vmul.f32 %v6331_v61, %v6323_v4 }
0x25b6   :  { %v6333_v0 = vpop.eup %6332 }
0x25b7   :  { %v2765_v2 = vmul.f32 %v6333_v0, %v6325_v11  ;;  %5806 = vmatmul.mubr.msk.f32.vlgmr.msra.gmra.mrb[20].mxu0 %vm2770_vm8, %v2764_v26 }
0x25b8   :  { %5814 = vmatpush3.msk.msra.mxu0 %vm2774_vm6, %v6973_v44  ;;  %5815 = vmatprep.mubr.msk.f32.mxu0 %vm6393_vm1, %v6394_v51 }
0x25b9   :  { %5811 = vmatmul.mubr.msk.f32.vlgmr.msra.gmra.mrb[18].mxu1 %vm2770_vm8, %v2765_v2  ;;  %5823 = vmatprep.subr.mxu0 %v6394_v51 }
0x25ba   :  { %5819 = vmatpush3.msk.msra.mxu1 %vm2774_vm6, %v3002_v55  ;;  %5820 = vmatprep.mubr.msk.f32.mxu1 %vm6393_vm1, %v6394_v51 }
0x25bb   :  { %5828 = vmatprep.subr.mxu1 %v6394_v51 }
0x25de   :  { %v2756_v8 = vpop.xlane.xlu0 %2755 }
0x25df   :  { %6334 = vrcp.f32 %v2756_v8 }
0x25e0   :  { %v2759_v49 = vpop.xlane.xlu1 %2758 }
0x25e1   :  { %6336 = vrcp.f32 %v2759_v49 }
0x25e2   :  { %v3315_v41 = vpop.permute.xlu0 %3314 }
0x25e4   :  { %v3235_v43 = vpop.permute.xlu1 %3234 }
0x25e6   :  { %v3313_v44 = vpop.permute.xlu0 %3312 }
0x25e9   :  { %v6335_v7 = vpop.eup %6334 }
0x25ea   :  { %v2766_v14 = vmul.f32 %v6335_v7, %v6327_v47 }
0x25eb   :  { %v6337_v15 = vpop.eup %6336 }
0x25ec   :  { %v2767_v37 = vmul.f32 %v6337_v15, %v6329_v52  ;;  %5816 = vmatmul.mubr.msk.f32.vlgmr.msra.gmra.mrb[22].mxu0 %vm2770_vm8, %v2766_v14 }
0x25ed   :  { %5824 = vmatpush3.xpose.msk.msra.mxu0 %vm39_vm0, %v6983_v46  ;;  %5825 = vmatprep.mubr.msk.f32.mxu0 %vm6393_vm1, %v6394_v51 }
0x25ee   :  { %5821 = vmatmul.mubr.msk.f32.vlgmr.msra.gmra.mrb[20].mxu1 %vm2770_vm8, %v2767_v37  ;;  %5833 = vmatprep.subr.mxu0 %v6394_v51 }
0x25ef   :  { %5829 = vmatpush3.xpose.msk.msra.mxu1 %vm39_vm0, %v3159_v20  ;;  %5830 = vmatprep.mubr.msk.f32.mxu1 %vm6393_vm1, %v6394_v51 }
0x25f0   :  { %5826 = vmatmul.mubr.msk.f32.vlgmr.msra.gmra.mrb[24].mxu0 %vm39_vm0, %v3079_v21  ;;  %5838 = vmatprep.subr.mxu1 %v6394_v51 }
0x25f1   :  { %5834 = vmatpush3.xpose.msk.msra.mxu0 %vm39_vm0, %v3237_v29  ;;  %5835 = vmatprep.mubr.msk.f32.mxu0 %vm6393_vm1, %v6394_v51 }
0x25f2   :  { %5831 = vmatmul.mubr.msk.f32.vlgmr.msra.gmra.mrb[22].mxu1 %vm39_vm0, %v3157_v27  ;;  %5843 = vmatprep.subr.mxu0 %v6394_v51 }
0x25f3   :  { %5839 = vmatpush3.xpose.msk.msra.mxu1 %vm39_vm0, %v3315_v41  ;;  %5840 = vmatprep.mubr.msk.f32.mxu1 %vm6393_vm1, %v6394_v51  ;;  %v30_v41 = vld [vmem:[%s7343_s1 + $0x98] sm:$0xff] }
0x25f4   :  { %5836 = vmatmul.mubr.msk.f32.vlgmr.msra.gmra.mrb[26].mxu0 %vm39_vm0, %v3235_v43  ;;  %5848 = vmatprep.subr.mxu1 %v6394_v51  ;;  %v31_v43 = vld [vmem:[%s7343_s1 + $0xa0] sm:$0xff] }
0x25f5   :  { %5845 = vmatprep.mubr.msk.f32.mxu0 %vm6393_vm1, %v6394_v51 }
0x25f6   :  { %5841 = vmatmul.mubr.msk.f32.vlgmr.msra.gmra.mrb[24].mxu1 %vm39_vm0, %v3313_v44  ;;  %v7095_v44 = vpack.c.bf16 %v31_v43, %v30_v41 }
0x25f7   :  { %5850 = vmatprep.mubr.msk.f32.mxu1 %vm6393_vm1, %v6394_v51 }
0x268a   :  { %v7048_v45 = vpop.f32.mrb[20].mxu0 }
0x268b   :  { %v5807_v46 = vpop.f32.mrb[21].mxu0 }
0x268c   :  { %v7050_v57 = vpop.f32.mrb[18].mxu1 }
0x268d   :  { %v5812_v58 = vpop.f32.mrb[19].mxu1 }
0x26bf   :  { %v7052_v59 = vpop.f32.mrb[22].mxu0 }
0x26c0   :  { %v5817_v60 = vpop.f32.mrb[23].mxu0 }
0x26c1   :  { %v7054_v18 = vpop.f32.mrb[20].mxu1 }
0x26c2   :  { %v5822_v53 = vpop.f32.mrb[21].mxu1 }
0x26c3   :  { %v3152_v23 = vpop.f32.mrb[24].mxu0 }
0x26c4   :  { %v5827_v24 = vpop.f32.mrb[25].mxu0  ;;  %v3390_v54 = vsel %vm2723_vm7, %v3152_v23, -inf }
0x26c5   :  { %v3230_v63 = vpop.f32.mrb[22].mxu1  ;;  %3391 = vmax.xlane.f32.xlu1 %v3390_v54 }
0x26c6   :  { %v5832_v1 = vpop.f32.mrb[23].mxu1  ;;  %v3393_v5 = vsel %vm2723_vm7, %v3230_v63, -inf }
0x26c7   :  { %3394 = vmax.xlane.f32.xlu0 %v3393_v5  ;;  %v3308_v3 = vpop.f32.mrb[26].mxu0 }
0x26c8   :  { %v5837_v55 = vpop.f32.mrb[27].mxu0  ;;  %v3396_v25 = vsel %vm2723_vm7, %v3308_v3, -inf }
0x26c9   :  { %v3386_v56 = vpop.f32.mrb[24].mxu1 }
0x26ca   :  { %v5842_v62 = vpop.f32.mrb[25].mxu1  ;;  %v3399_v31 = vsel %vm2723_vm7, %v3386_v56, -inf }
0x26cb   :  { %3397 = vmax.xlane.f32.xlu0 %v3396_v25  ;;  %3400 = vmax.xlane.f32.xlu1 %v3399_v31 }
0x26dc   :  { %3511 = vrot.lane.b32.xlu1 %v6934_v36, %s6399_s5 }
0x26e1   :  { %3434 = vrot.lane.b32.xlu0 %v6925_v42, %s6399_s5 }
0x2752   :  { %v3392_v50 = vpop.xlane.xlu1 %3391 }
0x2753   :  { %v3402_v34 = vsub.f32 %v3152_v23, %v3392_v50 }
0x2754   :  { %v3395_v4 = vpop.xlane.xlu0 %3394 }
0x2755   :  { %v3406_v6 = vmul.f32 1.442695, %v3402_v34  ;;  %v3403_v11 = vsub.f32 %v3230_v63, %v3395_v4 }
0x2757   :  { %6338 = vpow2.f32 %v3406_v6  ;;  %v3408_v12 = vmul.f32 1.442695, %v3403_v11 }
0x2758   :  { %v3401_v10 = vpop.xlane.xlu1 %3400  ;;  %v3398_v33 = vpop.xlane.xlu0 %3397 }
0x2759   :  { %6340 = vpow2.f32 %v3408_v12  ;;  %v3405_v38 = vsub.f32 %v3386_v56, %v3401_v10  ;;  %v3404_v40 = vsub.f32 %v3308_v3, %v3398_v33 }
0x275b   :  { %v3412_v39 = vmul.f32 1.442695, %v3405_v38  ;;  %v3410_v16 = vmul.f32 1.442695, %v3404_v40 }
0x275c   :  { %v3512_v47 = vpop.permute.xlu1 %3511  ;;  %v3435_v52 = vpop.permute.xlu0 %3434 }
0x275d   :  { %6342 = vpow2.f32 %v3412_v39  ;;  %5844 = vmatpush3.msk.msra.mxu0 %vm2774_vm6, %v3435_v52  ;;  %5849 = vmatpush3.msk.msra.mxu1 %vm2774_vm6, %v3512_v47 }
0x275e   :  { %6344 = vpow2.f32 %v3410_v16  ;;  %5853 = vmatprep.subr.mxu0 %v6394_v51  ;;  %5858 = vmatprep.subr.mxu1 %v6394_v51 }
0x2761   :  { %v6339_v42 = vpop.eup %6338 }
0x2762   :  { %v3414_v36 = vsel %vm2723_vm7, %v6339_v42, 0.0 }
0x2763   :  { %v6341_v17 = vpop.eup %6340  ;;  %3415 = vadd.xlane.f32.xlu0 %v3414_v36 }
0x2764   :  { %v3417_v19 = vsel %vm2723_vm7, %v6341_v17, 0.0 }
0x2765   :  { %3418 = vadd.xlane.f32.xlu1 %v3417_v19 }
0x2767   :  { %v6343_v20 = vpop.eup %6342 }
0x2768   :  { %v6345_v21 = vpop.eup %6344  ;;  %v3423_v48 = vsel %vm2723_vm7, %v6343_v20, 0.0 }
0x2769   :  { %3424 = vadd.xlane.f32.xlu1 %v3423_v48  ;;  %v3420_v22 = vsel %vm2723_vm7, %v6345_v21, 0.0 }
0x276a   :  { %3421 = vadd.xlane.f32.xlu0 %v3420_v22 }
0x277a   :  { %3588 = vrot.lane.b32.xlu1 %v6928_v35, %s6399_s5 }
0x2780   :  { %3665 = vrot.lane.b32.xlu0 %v6942_v13, %s6399_s5 }
0x27f0   :  { %v3416_v61 = vpop.xlane.xlu0 %3415 }
0x27f1   :  { %6346 = vrcp.f32 %v3416_v61 }
0x27f2   :  { %v3419_v26 = vpop.xlane.xlu1 %3418 }
0x27f3   :  { %6348 = vrcp.f32 %v3419_v26 }
0x27f6   :  { %v3425_v0 = vpop.xlane.xlu1 %3424 }
0x27f7   :  { %6350 = vrcp.f32 %v3425_v0  ;;  %v3422_v2 = vpop.xlane.xlu0 %3421 }
0x27f8   :  { %6352 = vrcp.f32 %v3422_v2 }
0x27fa   :  { %v3589_v7 = vpop.permute.xlu1 %3588 }
0x27fb   :  { %v6347_v27 = vpop.eup %6346  ;;  %v3666_v35 = vpop.permute.xlu0 %3665 }
0x27fc   :  { %v3430_v29 = vmul.f32 %v6347_v27, %v6339_v42 }
0x27fd   :  { %v6349_v8 = vpop.eup %6348 }
0x27fe   :  { %v3431_v49 = vmul.f32 %v6349_v8, %v6341_v17  ;;  %5846 = vmatmul.mubr.msk.f32.vlgmr.msra.gmra.mrb[28].mxu0 %vm2770_vm8, %v3430_v29 }
0x27ff   :  { %5854 = vmatpush3.msk.msra.mxu0 %vm2774_vm6, %v3589_v7  ;;  %5855 = vmatprep.mubr.msk.f32.mxu0 %vm6393_vm1, %v6394_v51 }
0x2800   :  { %5851 = vmatmul.mubr.msk.f32.vlgmr.msra.gmra.mrb[26].mxu1 %vm2770_vm8, %v3431_v49  ;;  %6006 = vmatprep.subr.bf16.mxu0 %v7095_v44 }
0x2801   :  { %v6351_v13 = vpop.eup %6350  ;;  %5859 = vmatpush3.msk.msra.mxu1 %vm2774_vm6, %v3666_v35  ;;  %5860 = vmatprep.mubr.msk.f32.mxu1 %vm6393_vm1, %v6394_v51 }
0x2802   :  { %v6353_v14 = vpop.eup %6352  ;;  %v3433_v15 = vmul.f32 %v6351_v13, %v6343_v20  ;;  %6010 = vmatprep.subr.bf16.mxu1 %v6901_v28 }
0x2803   :  { %v3432_v37 = vmul.f32 %v6353_v14, %v6345_v21 }
0x2804   :  { %5861 = vmatmul.mubr.msk.f32.vlgmr.msra.gmra.mrb[28].mxu1 %vm2770_vm8, %v3433_v15 }
0x2805   :  { %5856 = vmatmul.mubr.msk.f32.vlgmr.msra.gmra.mrb[30].mxu0 %vm2770_vm8, %v3432_v37  ;;  %6012 = vmatpush3.bf16.msra.mxu1 %v6901_v28 }
0x2806   :  { %5882 = vmatprep.subr.mxu1 %v6394_v51  ;;  %6008 = vmatpush3.bf16.msra.mxu0 %v7095_v44 }
0x2807   :  { %5877 = vmatprep.subr.mxu0 %v6394_v51 }
0x28d1   :  { %v3507_v46 = vpop.f32.mrb[28].mxu0 }
0x28d2   :  { %3746 = vrot.lane.b32.xlu1 %v3507_v46, %s6400_s10  ;;  %v5847_v28 = vpop.f32.mrb[29].mxu0 }
0x28d3   :  { %v3584_v58 = vpop.f32.mrb[26].mxu1 }
0x28d4   :  { %v5852_v60 = vpop.f32.mrb[27].mxu1  ;;  %3748 = vrot.lane.b32.xlu0 %v3584_v58, %s6400_s10 }
0x28d7   :  { %v3738_v53 = vpop.f32.mrb[28].mxu1 }
0x28d8   :  { %v3661_v23 = vpop.f32.mrb[30].mxu0  ;;  %3752 = vrot.lane.b32.xlu0 %v3738_v53, %s6400_s10  ;;  %v5862_v24 = vpop.f32.mrb[29].mxu1 }
0x28d9   :  { %3750 = vrot.lane.b32.xlu1 %v3661_v23, %s6400_s10  ;;  %v5857_v54 = vpop.f32.mrb[31].mxu0 }
0x2944   :  { %v3747_v63 = vpop.permute.xlu1 %3746 }
0x2945   :  { %v3758_v5 = vsel %vm39_vm0, %v7048_v45, %v3747_v63  ;;  %v7119_v45 = vld [vmem:[%s7343_s1 + $0xa8] ss:$0 sm:$0xff] }
0x2946   :  { %v3749_v1 = vpop.permute.xlu0 %3748 }
0x2947   :  { %v3759_v3 = vsel %vm39_vm0, %v7050_v57, %v3749_v1 }
0x2948   :  { %v3770_v55 = vcombine.low %v3758_v5, %v3759_v3 }
0x294a   :  { %5867 = vmatprep.mubr.msk.f32.mxu0 %vm310_vm5, %v3770_v55  ;;  %v3753_v56 = vpop.permute.xlu0 %3752 }
0x294b   :  { %v3751_v62 = vpop.permute.xlu1 %3750  ;;  %v3761_v25 = vsel %vm39_vm0, %v7054_v18, %v3753_v56 }
0x294c   :  { %v3760_v31 = vsel %vm39_vm0, %v7052_v59, %v3751_v62 }
0x294d   :  { %v3771_v50 = vcombine.low %v3760_v31, %v3761_v25 }
0x294f   :  { %5868 = vmatmul.mubr.msk.f32.vlgmr.msra.gmra.mrb[32].mxu0 %vm310_vm5, %v3771_v50 }
0x2950   :  { %5879 = vmatprep.mubr.msk.f32.mxu0 %vm6393_vm1, %v6394_v51 }
0x2a22   :  { %v5869_v57 = vpop.f32.mrb[32].mxu0 }
0x2a23   :  { %v3848_v34 = vadd.f32 %v5869_v57, %v7119_v45  ;;  %v3842_v4 = vpop.f32.mrb[33].mxu0 }
0x2a24   :  { %v3843_v18 = vadd.f32 %v7119_v45, %v3842_v4 }
0x2a25   :  { %v7124_v6 = vadd.f32 %v3848_v34, %v6911_v30 }
0x2a26   :  { %v7127_v59 = vadd.f32 %v3843_v18, %v6909_v9 }
0x2a27   :  { %v3854_v12 = vmax.f32 %v7124_v6, 0.0 }
0x2a28   :  { %v3853_v11 = vmax.f32 %v7127_v59, 0.0 }
0x2a2a   :  { %5874 = vmatprep.mubr.msk.f32.mxu1 %vm310_vm5, %v3853_v11 }
0x2a2b   :  { %5875 = vmatmul.mubr.msk.f32.vlgmr.msra.gmra.mrb[30].mxu1 %vm310_vm5, %v3854_v12 }
0x2a2c   :  { %5884 = vmatprep.mubr.msk.f32.mxu1 %vm6393_vm1, %v6394_v51 }
0x2afe   :  { %v5876_v10 = vpop.f32.mrb[30].mxu1 }
0x2aff   :  { %v3927_v33 = vpop.f32.mrb[31].mxu1  ;;  %v7143_v40 = vadd.f32 %v5876_v10, %v6922_v32 }
0x2b00   :  { %v7140_v38 = vadd.f32 %v6922_v32, %v3927_v33 }
0x2b01   :  { %v7157_v16 = vcombine.high %v7143_v40, %v7143_v40 }
0x2b02   :  { %3940 = vrot.lane.b32.xlu1 %v7140_v38, %s6396_s29  ;;  %v7149_v39 = vcombine.high %v7140_v38, %v7140_v38 }
0x2b04   :  { %4016 = vrot.lane.b32.xlu0 %v7149_v39, %s6396_s29 }
0x2b06   :  { %4092 = vrot.lane.b32.xlu1 %v7143_v40, %s6396_s29 }
0x2b08   :  { %4168 = vrot.lane.b32.xlu0 %v7157_v16, %s6396_s29 }
0x2b0a   :  { %4442 = vrot.lane.b32.xlu1 %v7143_v40, %s6395_s30 }
0x2b0c   :  { %4288 = vrot.lane.b32.xlu0 %v7140_v38, %s6395_s30 }
0x2b0e   :  { %4598 = vrot.lane.b32.xlu1 %v7140_v38, %s6397_s3 }
0x2b10   :  { %4519 = vrot.lane.b32.xlu0 %v7157_v16, %s6395_s30 }
0x2b12   :  { %4365 = vrot.lane.b32.xlu1 %v7149_v39, %s6395_s30 }
0x2b74   :  { %v3941_v32 = vpop.permute.xlu1 %3940 }
0x2b75   :  { %5878 = vmatpush3.xpose.msk.msra.mxu0 %vm39_vm0, %v3941_v32 }
0x2b76   :  { %v4017_v47 = vpop.permute.xlu0 %4016  ;;  %5887 = vmatprep.subr.mxu0 %v6394_v51 }
0x2b77   :  { %5883 = vmatpush3.xpose.msk.msra.mxu1 %vm39_vm0, %v4017_v47 }
0x2b78   :  { %5880 = vmatmul.mubr.msk.f32.vlgmr.msra.gmra.mrb[34].mxu0 %vm39_vm0, %v7140_v38  ;;  %v4093_v52 = vpop.permute.xlu1 %4092  ;;  %5892 = vmatprep.subr.mxu1 %v6394_v51 }
0x2b79   :  { %5888 = vmatpush3.xpose.msk.msra.mxu0 %vm39_vm0, %v4093_v52  ;;  %5889 = vmatprep.mubr.msk.f32.mxu0 %vm6393_vm1, %v6394_v51 }
0x2b7a   :  { %5885 = vmatmul.mubr.msk.f32.vlgmr.msra.gmra.mrb[32].mxu1 %vm39_vm0, %v7149_v39  ;;  %v4169_v42 = vpop.permute.xlu0 %4168  ;;  %5897 = vmatprep.subr.mxu0 %v6394_v51 }
0x2b7b   :  { %5893 = vmatpush3.xpose.msk.msra.mxu1 %vm39_vm0, %v4169_v42  ;;  %5894 = vmatprep.mubr.msk.f32.mxu1 %vm6393_vm1, %v6394_v51 }
0x2b7c   :  { %5890 = vmatmul.mubr.msk.f32.vlgmr.msra.gmra.mrb[36].mxu0 %vm39_vm0, %v7143_v40  ;;  %v7188_v36 = vpop.permute.xlu1 %4442  ;;  %5902 = vmatprep.subr.mxu1 %v6394_v51 }
0x2b7d   :  { %5899 = vmatprep.mubr.msk.f32.mxu0 %vm6393_vm1, %v6394_v51 }
0x2b7e   :  { %5895 = vmatmul.mubr.msk.f32.vlgmr.msra.gmra.mrb[34].mxu1 %vm39_vm0, %v7157_v16  ;;  %v4289_v17 = vpop.permute.xlu0 %4288 }
0x2b7f   :  { %5898 = vmatpush3.msk.msra.mxu0 %vm2774_vm6, %v4289_v17  ;;  %5904 = vmatprep.mubr.msk.f32.mxu1 %vm6393_vm1, %v6394_v51 }
0x2b80   :  { %v7198_v19 = vpop.permute.xlu1 %4598  ;;  %5907 = vmatprep.subr.mxu0 %v6394_v51 }
0x2b82   :  { %v4520_v35 = vpop.permute.xlu0 %4519 }
0x2b84   :  { %v4366_v20 = vpop.permute.xlu1 %4365 }
0x2b85   :  { %5903 = vmatpush3.msk.msra.mxu1 %vm2774_vm6, %v4366_v20 }
0x2b86   :  { %5912 = vmatprep.subr.mxu1 %v6394_v51 }
0x2c4b   :  { %v4012_v21 = vpop.f32.mrb[34].mxu0 }
0x2c4c   :  { %v5881_v48 = vpop.f32.mrb[35].mxu0  ;;  %v4244_v22 = vsel %vm2723_vm7, %v4012_v21, -inf }
0x2c4d   :  { %4245 = vmax.xlane.f32.xlu1 %v4244_v22  ;;  %v4088_v61 = vpop.f32.mrb[32].mxu1 }
0x2c4e   :  { %v5886_v26 = vpop.f32.mrb[33].mxu1  ;;  %v4247_v0 = vsel %vm2723_vm7, %v4088_v61, -inf }
0x2c4f   :  { %v4164_v2 = vpop.f32.mrb[36].mxu0  ;;  %4248 = vmax.xlane.f32.xlu0 %v4247_v0 }
0x2c50   :  { %v5891_v27 = vpop.f32.mrb[37].mxu0  ;;  %v4250_v49 = vsel %vm2723_vm7, %v4164_v2, -inf }
0x2c51   :  { %v4240_v29 = vpop.f32.mrb[34].mxu1 }
0x2c52   :  { %v5896_v8 = vpop.f32.mrb[35].mxu1  ;;  %v4253_v7 = vsel %vm2723_vm7, %v4240_v29, -inf }
0x2c53   :  { %4251 = vmax.xlane.f32.xlu0 %v4250_v49  ;;  %4254 = vmax.xlane.f32.xlu1 %v4253_v7 }
0x2c64   :  { %4596 = vrot.lane.b32.xlu1 %v7140_v38, %s6398_s4 }
0x2c69   :  { %4676 = vrot.lane.b32.xlu0 %v7149_v39, %s6397_s3 }
0x2cda   :  { %v4246_v13 = vpop.xlane.xlu1 %4245 }
0x2cdb   :  { %v4256_v14 = vsub.f32 %v4012_v21, %v4246_v13 }
0x2cdc   :  { %v4249_v15 = vpop.xlane.xlu0 %4248 }
0x2cdd   :  { %v4260_v37 = vmul.f32 1.442695, %v4256_v14  ;;  %v4257_v41 = vsub.f32 %v4088_v61, %v4249_v15 }
0x2cdf   :  { %6354 = vpow2.f32 %v4260_v37  ;;  %v4262_v43 = vmul.f32 1.442695, %v4257_v41 }
0x2ce0   :  { %v4252_v53 = vpop.xlane.xlu0 %4251  ;;  %v4255_v23 = vpop.xlane.xlu1 %4254 }
0x2ce1   :  { %6356 = vpow2.f32 %v4262_v43  ;;  %v4258_v24 = vsub.f32 %v4164_v2, %v4252_v53  ;;  %v4259_v54 = vsub.f32 %v4240_v29, %v4255_v23 }
0x2ce3   :  { %v4264_v63 = vmul.f32 1.442695, %v4258_v24  ;;  %v4266_v1 = vmul.f32 1.442695, %v4259_v54 }
0x2ce4   :  { %v4677_v62 = vpop.permute.xlu0 %4676  ;;  %v4597_v25 = vpop.permute.xlu1 %4596 }
0x2ce5   :  { %6358 = vpow2.f32 %v4264_v63 }
0x2ce6   :  { %6360 = vpow2.f32 %v4266_v1 }
0x2ce9   :  { %v6355_v46 = vpop.eup %6354 }
0x2cea   :  { %v4268_v28 = vsel %vm2723_vm7, %v6355_v46, 0.0 }
0x2ceb   :  { %v6357_v58 = vpop.eup %6356  ;;  %4269 = vadd.xlane.f32.xlu0 %v4268_v28 }
0x2cec   :  { %v4271_v60 = vsel %vm2723_vm7, %v6357_v58, 0.0 }
0x2ced   :  { %4272 = vadd.xlane.f32.xlu1 %v4271_v60 }
0x2cef   :  { %v6359_v5 = vpop.eup %6358 }
0x2cf0   :  { %v6361_v3 = vpop.eup %6360  ;;  %v4274_v55 = vsel %vm2723_vm7, %v6359_v5, 0.0 }
0x2cf1   :  { %v4277_v56 = vsel %vm2723_vm7, %v6361_v3, 0.0 }
0x2cfe   :  { %4754 = vrot.lane.b32.xlu1 %v7143_v40, %s6397_s3 }
0x2d01   :  { %4674 = vrot.lane.b32.xlu0 %v7149_v39, %s6398_s4 }
0x2d20   :  { %4275 = vadd.xlane.f32.xlu0 %v4274_v55 }
0x2d22   :  { %4278 = vadd.xlane.f32.xlu1 %v4277_v56 }
0x2d33   :  { %4752 = vrot.lane.b32.xlu1 %v7143_v40, %s6398_s4 }
0x2d36   :  { %4832 = vrot.lane.b32.xlu0 %v7157_v16, %s6397_s3 }
0x2d3a   :  { %4830 = vrot.lane.b32.xlu0 %v7157_v16, %s6398_s4 }
0x2d78   :  { %v4270_v31 = vpop.xlane.xlu0 %4269 }
0x2d79   :  { %6362 = vrcp.f32 %v4270_v31 }
0x2d7a   :  { %v4273_v50 = vpop.xlane.xlu1 %4272 }
0x2d7b   :  { %6364 = vrcp.f32 %v4273_v50 }
0x2d7c   :  { %v4675_v10 = vpop.permute.xlu0 %4674 }
0x2d7e   :  { %v4755_v33 = vpop.permute.xlu1 %4754 }
0x2d83   :  { %v6363_v57 = vpop.eup %6362 }
0x2d84   :  { %v4284_v34 = vmul.f32 %v6363_v57, %v6355_v46 }
0x2d85   :  { %v6365_v4 = vpop.eup %6364 }
0x2d86   :  { %v4285_v18 = vmul.f32 %v6365_v4, %v6357_v58  ;;  %5900 = vmatmul.mubr.msk.f32.vlgmr.msra.gmra.mrb[38].mxu0 %vm2770_vm8, %v4284_v34 }
0x2d87   :  { %5908 = vmatpush3.msk.msra.mxu0 %vm2774_vm6, %v7188_v36  ;;  %5909 = vmatprep.mubr.msk.f32.mxu0 %vm6393_vm1, %v6394_v51 }
0x2d88   :  { %5905 = vmatmul.mubr.msk.f32.vlgmr.msra.gmra.mrb[36].mxu1 %vm2770_vm8, %v4285_v18  ;;  %5917 = vmatprep.subr.mxu0 %v6394_v51 }
0x2d89   :  { %5913 = vmatpush3.msk.msra.mxu1 %vm2774_vm6, %v4520_v35  ;;  %5914 = vmatprep.mubr.msk.f32.mxu1 %vm6393_vm1, %v6394_v51 }
0x2d8a   :  { %5922 = vmatprep.subr.mxu1 %v6394_v51 }
0x2dad   :  { %v4276_v32 = vpop.xlane.xlu0 %4275 }
0x2dae   :  { %6366 = vrcp.f32 %v4276_v32 }
0x2daf   :  { %v4279_v47 = vpop.xlane.xlu1 %4278 }
0x2db0   :  { %6368 = vrcp.f32 %v4279_v47 }
0x2db1   :  { %v4833_v20 = vpop.permute.xlu0 %4832 }
0x2db5   :  { %v4831_v21 = vpop.permute.xlu0 %4830 }
0x2db8   :  { %v6367_v52 = vpop.eup %6366 }
0x2db9   :  { %v4286_v42 = vmul.f32 %v6367_v52, %v6359_v5 }
0x2dba   :  { %v6369_v36 = vpop.eup %6368 }
0x2dbb   :  { %v4287_v17 = vmul.f32 %v6369_v36, %v6361_v3  ;;  %5910 = vmatmul.mubr.msk.f32.vlgmr.msra.gmra.mrb[40].mxu0 %vm2770_vm8, %v4286_v42 }
0x2dbc   :  { %5918 = vmatpush3.xpose.msk.msra.mxu0 %vm39_vm0, %v7198_v19  ;;  %5919 = vmatprep.mubr.msk.f32.mxu0 %vm6393_vm1, %v6394_v51  ;;  %v4753_v19 = vpop.permute.xlu1 %4752 }
0x2dbd   :  { %5915 = vmatmul.mubr.msk.f32.vlgmr.msra.gmra.mrb[38].mxu1 %vm2770_vm8, %v4287_v17  ;;  %5927 = vmatprep.subr.mxu0 %v6394_v51 }
0x2dbe   :  { %5923 = vmatpush3.xpose.msk.msra.mxu1 %vm39_vm0, %v4677_v62  ;;  %5924 = vmatprep.mubr.msk.f32.mxu1 %vm6393_vm1, %v6394_v51 }
0x2dbf   :  { %5920 = vmatmul.mubr.msk.f32.vlgmr.msra.gmra.mrb[42].mxu0 %vm39_vm0, %v4597_v25  ;;  %5932 = vmatprep.subr.mxu1 %v6394_v51 }
0x2dc0   :  { %5928 = vmatpush3.xpose.msk.msra.mxu0 %vm39_vm0, %v4755_v33  ;;  %5929 = vmatprep.mubr.msk.f32.mxu0 %vm6393_vm1, %v6394_v51 }
0x2dc1   :  { %5925 = vmatmul.mubr.msk.f32.vlgmr.msra.gmra.mrb[40].mxu1 %vm39_vm0, %v4675_v10  ;;  %5937 = vmatprep.subr.mxu0 %v6394_v51 }
0x2dc2   :  { %5933 = vmatpush3.xpose.msk.msra.mxu1 %vm39_vm0, %v4833_v20  ;;  %5934 = vmatprep.mubr.msk.f32.mxu1 %vm6393_vm1, %v6394_v51 }
0x2dc3   :  { %5930 = vmatmul.mubr.msk.f32.vlgmr.msra.gmra.mrb[44].mxu0 %vm39_vm0, %v4753_v19  ;;  %5942 = vmatprep.subr.mxu1 %v6394_v51 }
0x2dc4   :  { %5939 = vmatprep.mubr.msk.f32.mxu0 %vm6393_vm1, %v6394_v51 }
0x2dc5   :  { %5935 = vmatmul.mubr.msk.f32.vlgmr.msra.gmra.mrb[42].mxu1 %vm39_vm0, %v4831_v21 }
0x2dc6   :  { %5944 = vmatprep.mubr.msk.f32.mxu1 %vm6393_vm1, %v6394_v51 }
0x2e59   :  { %v7263_v48 = vpop.f32.mrb[38].mxu0 }
0x2e5a   :  { %v5901_v22 = vpop.f32.mrb[39].mxu0 }
0x2e5b   :  { %v7265_v61 = vpop.f32.mrb[36].mxu1 }
0x2e5c   :  { %v5906_v26 = vpop.f32.mrb[37].mxu1 }
0x2e8e   :  { %v7267_v0 = vpop.f32.mrb[40].mxu0 }
0x2e8f   :  { %v5911_v2 = vpop.f32.mrb[41].mxu0 }
0x2e90   :  { %v7269_v27 = vpop.f32.mrb[38].mxu1 }
0x2e91   :  { %v5916_v29 = vpop.f32.mrb[39].mxu1 }
0x2e92   :  { %v4670_v8 = vpop.f32.mrb[42].mxu0 }
0x2e93   :  { %v5921_v49 = vpop.f32.mrb[43].mxu0  ;;  %v4908_v7 = vsel %vm2723_vm7, %v4670_v8, -inf }
0x2e94   :  { %v4748_v35 = vpop.f32.mrb[40].mxu1  ;;  %4909 = vmax.xlane.f32.xlu1 %v4908_v7 }
0x2e95   :  { %v5926_v13 = vpop.f32.mrb[41].mxu1  ;;  %v4911_v14 = vsel %vm2723_vm7, %v4748_v35, -inf }
0x2e96   :  { %4912 = vmax.xlane.f32.xlu0 %v4911_v14  ;;  %v4826_v15 = vpop.f32.mrb[44].mxu0 }
0x2e97   :  { %v5931_v37 = vpop.f32.mrb[45].mxu0  ;;  %v4914_v46 = vsel %vm2723_vm7, %v4826_v15, -inf }
0x2e98   :  { %v4904_v41 = vpop.f32.mrb[42].mxu1 }
0x2e99   :  { %v5936_v43 = vpop.f32.mrb[43].mxu1  ;;  %v4917_v28 = vsel %vm2723_vm7, %v4904_v41, -inf }
0x2e9a   :  { %4915 = vmax.xlane.f32.xlu0 %v4914_v46  ;;  %4918 = vmax.xlane.f32.xlu1 %v4917_v28 }
0x2eab   :  { %5029 = vrot.lane.b32.xlu1 %v7149_v39, %s6399_s5 }
0x2eb0   :  { %4952 = vrot.lane.b32.xlu0 %v7140_v38, %s6399_s5 }
0x2f21   :  { %v4910_v58 = vpop.xlane.xlu1 %4909 }
0x2f22   :  { %v4920_v60 = vsub.f32 %v4670_v8, %v4910_v58 }
0x2f23   :  { %v4913_v53 = vpop.xlane.xlu0 %4912 }
0x2f24   :  { %v4924_v23 = vmul.f32 1.442695, %v4920_v60  ;;  %v4921_v24 = vsub.f32 %v4748_v35, %v4913_v53 }
0x2f26   :  { %6370 = vpow2.f32 %v4924_v23  ;;  %v4926_v54 = vmul.f32 1.442695, %v4921_v24 }
0x2f27   :  { %v4919_v63 = vpop.xlane.xlu1 %4918  ;;  %v4916_v1 = vpop.xlane.xlu0 %4915 }
0x2f28   :  { %6372 = vpow2.f32 %v4926_v54  ;;  %v4923_v5 = vsub.f32 %v4904_v41, %v4919_v63  ;;  %v4922_v3 = vsub.f32 %v4826_v15, %v4916_v1 }
0x2f2a   :  { %v4930_v55 = vmul.f32 1.442695, %v4923_v5  ;;  %v4928_v56 = vmul.f32 1.442695, %v4922_v3 }
0x2f2b   :  { %v5030_v62 = vpop.permute.xlu1 %5029  ;;  %v4953_v25 = vpop.permute.xlu0 %4952 }
0x2f2c   :  { %6374 = vpow2.f32 %v4930_v55  ;;  %5938 = vmatpush3.msk.msra.mxu0 %vm2774_vm6, %v4953_v25  ;;  %5943 = vmatpush3.msk.msra.mxu1 %vm2774_vm6, %v5030_v62 }
0x2f2d   :  { %6376 = vpow2.f32 %v4928_v56  ;;  %5947 = vmatprep.subr.mxu0 %v6394_v51  ;;  %5952 = vmatprep.subr.mxu1 %v6394_v51 }
0x2f30   :  { %v6371_v38 = vpop.eup %6370 }
0x2f31   :  { %v4932_v39 = vsel %vm2723_vm7, %v6371_v38, 0.0 }
0x2f32   :  { %v6373_v31 = vpop.eup %6372  ;;  %4933 = vadd.xlane.f32.xlu0 %v4932_v39 }
0x2f33   :  { %v4935_v50 = vsel %vm2723_vm7, %v6373_v31, 0.0 }
0x2f34   :  { %4936 = vadd.xlane.f32.xlu1 %v4935_v50 }
0x2f36   :  { %v6375_v57 = vpop.eup %6374 }
0x2f37   :  { %v6377_v34 = vpop.eup %6376  ;;  %v4941_v4 = vsel %vm2723_vm7, %v6375_v57, 0.0 }
0x2f38   :  { %4942 = vadd.xlane.f32.xlu1 %v4941_v4  ;;  %v4938_v18 = vsel %vm2723_vm7, %v6377_v34, 0.0 }
0x2f39   :  { %4939 = vadd.xlane.f32.xlu0 %v4938_v18 }
0x2f49   :  { %5106 = vrot.lane.b32.xlu1 %v7143_v40, %s6399_s5 }
0x2f4f   :  { %5183 = vrot.lane.b32.xlu0 %v7157_v16, %s6399_s5 }
0x2fbf   :  { %v4934_v10 = vpop.xlane.xlu0 %4933 }
0x2fc0   :  { %6378 = vrcp.f32 %v4934_v10 }
0x2fc1   :  { %v4937_v33 = vpop.xlane.xlu1 %4936 }
0x2fc2   :  { %6380 = vrcp.f32 %v4937_v33 }
0x2fc5   :  { %v4943_v32 = vpop.xlane.xlu1 %4942 }
0x2fc6   :  { %6382 = vrcp.f32 %v4943_v32  ;;  %v4940_v47 = vpop.xlane.xlu0 %4939 }
0x2fc7   :  { %6384 = vrcp.f32 %v4940_v47 }
0x2fc9   :  { %v5107_v20 = vpop.permute.xlu1 %5106 }
0x2fca   :  { %v6379_v52 = vpop.eup %6378  ;;  %v5184_v40 = vpop.permute.xlu0 %5183 }
0x2fcb   :  { %v4948_v42 = vmul.f32 %v6379_v52, %v6371_v38 }
0x2fcc   :  { %v6381_v36 = vpop.eup %6380 }
0x2fcd   :  { %v4949_v17 = vmul.f32 %v6381_v36, %v6373_v31  ;;  %5940 = vmatmul.mubr.msk.f32.vlgmr.msra.gmra.mrb[46].mxu0 %vm2770_vm8, %v4948_v42 }
0x2fce   :  { %5948 = vmatpush3.msk.msra.mxu0 %vm2774_vm6, %v5107_v20  ;;  %5949 = vmatprep.mubr.msk.f32.mxu0 %vm6393_vm1, %v6394_v51 }
0x2fcf   :  { %5945 = vmatmul.mubr.msk.f32.vlgmr.msra.gmra.mrb[44].mxu1 %vm2770_vm8, %v4949_v17  ;;  %6014 = vmatprep.subr.bf16.mxu0 %v7095_v44 }
0x2fd0   :  { %v6383_v16 = vpop.eup %6382  ;;  %5953 = vmatpush3.msk.msra.mxu1 %vm2774_vm6, %v5184_v40  ;;  %5954 = vmatprep.mubr.msk.f32.mxu1 %vm6393_vm1, %v6394_v51 }
0x2fd1   :  { %v6385_v19 = vpop.eup %6384  ;;  %v4951_v21 = vmul.f32 %v6383_v16, %v6375_v57 }
0x2fd2   :  { %v4950_v22 = vmul.f32 %v6385_v19, %v6377_v34 }
0x2fd3   :  { %5955 = vmatmul.mubr.msk.f32.vlgmr.msra.gmra.mrb[46].mxu1 %vm2770_vm8, %v4951_v21 }
0x2fd4   :  { %5950 = vmatmul.mubr.msk.f32.vlgmr.msra.gmra.mrb[48].mxu0 %vm2770_vm8, %v4950_v22 }
0x2fd5   :  { %6016 = vmatpush3.bf16.msra.mxu0 %v7095_v44 }
0x30a0   :  { %v5025_v26 = vpop.f32.mrb[46].mxu0 }
0x30a1   :  { %5264 = vrot.lane.b32.xlu1 %v5025_v26, %s6400_s10  ;;  %v5941_v2 = vpop.f32.mrb[47].mxu0 }
0x30a2   :  { %v5102_v29 = vpop.f32.mrb[44].mxu1 }
0x30a3   :  { %v5946_v8 = vpop.f32.mrb[45].mxu1  ;;  %5266 = vrot.lane.b32.xlu0 %v5102_v29, %s6400_s10 }
0x30a6   :  { %v5256_v49 = vpop.f32.mrb[46].mxu1 }
0x30a7   :  { %v5179_v7 = vpop.f32.mrb[48].mxu0  ;;  %5270 = vrot.lane.b32.xlu0 %v5256_v49, %s6400_s10  ;;  %v5956_v51 = vpop.f32.mrb[47].mxu1 }
0x30a8   :  { %5268 = vrot.lane.b32.xlu1 %v5179_v7, %s6400_s10  ;;  %v5951_v35 = vpop.f32.mrb[49].mxu0 }
0x3113   :  { %v5265_v13 = vpop.permute.xlu1 %5264 }
0x3114   :  { %v5276_v44 = vsel %vm39_vm0, %v7263_v48, %v5265_v13 }
0x3115   :  { %v5267_v14 = vpop.permute.xlu0 %5266 }
0x3116   :  { %v5277_v15 = vsel %vm39_vm0, %v7265_v61, %v5267_v14 }
0x3117   :  { %v5284_v37 = vcombine.low %v5276_v44, %v5277_v15 }
0x3119   :  { %5961 = vmatprep.mubr.msk.f32.mxu0 %vm310_vm5, %v5284_v37  ;;  %v5271_v41 = vpop.permute.xlu0 %5270 }
0x311a   :  { %v5269_v43 = vpop.permute.xlu1 %5268  ;;  %v5279_v46 = vsel %vm39_vm0, %v7269_v27, %v5271_v41  ;;  %v5553_v27 = vld [vmem:[%s7343_s1 + $0xb0] ss:$0 sm:$0xff] }
0x311b   :  { %v5278_v28 = vsel %vm39_vm0, %v7267_v0, %v5269_v43 }
0x311c   :  { %v5285_v58 = vcombine.low %v5278_v28, %v5279_v46 }
0x311e   :  { %5962 = vmatmul.mubr.msk.f32.vlgmr.msra.gmra.mrb[50].mxu0 %vm310_vm5, %v5285_v58 }
0x31f1   :  { %v5963_v60 = vpop.f32.mrb[50].mxu0 }
0x31f2   :  { %v5362_v48 = vadd.f32 %v5963_v60, %v7119_v45  ;;  %v5356_v53 = vpop.f32.mrb[51].mxu0 }
0x31f3   :  { %v5357_v61 = vadd.f32 %v7119_v45, %v5356_v53  ;;  %v5554_v45 = vld [vmem:[%s7343_s1 + $0xb8] ss:$0 sm:$0xff] }
0x31f4   :  { %v5366_v23 = vadd.f32 %v5362_v48, %v3854_v12 }
0x31f5   :  { %v5365_v24 = vadd.f32 %v5357_v61, %v3853_v11 }
0x31f6   :  { %v5368_v0 = vmax.f32 %v5366_v23, 0.0 }
0x31f7   :  { %v5367_v54 = vmax.f32 %v5365_v24, 0.0 }
0x31f8   :  { %v5374_v63 = vmul.f32 %v5553_v27, %v5368_v0 }
0x31f9   :  { %v5373_v1 = vmul.f32 %v5553_v27, %v5367_v54 }
0x31fa   :  { %v5378_v5 = vsel %vm310_vm5, %v5374_v63, 0.0 }
0x31fb   :  { %5379 = vadd.xlane.f32.xlu0 %v5378_v5  ;;  %v5375_v3 = vsel %vm310_vm5, %v5373_v1, 0.0 }
0x31fc   :  { %5376 = vadd.xlane.f32.xlu1 %v5375_v3 }
0x320d   :  { %5395 = vrot.lane.b32.xlu1 %v5368_v0, %s6391_s25 }
0x3211   :  { %5393 = vrot.lane.b32.xlu0 %v5367_v54, %s6391_s25 }
0x3288   :  { %v5380_v6 = vpop.xlane.xlu0 %5379 }
0x3289   :  { %v5386_v59 = vadd.f32 %v5554_v45, %v5380_v6  ;;  %v5377_v11 = vpop.xlane.xlu1 %5376 }
0x328a   :  { %v5385_v12 = vadd.f32 %v5554_v45, %v5377_v11 }
0x328b   :  { %v5389_v55 = vmul.f32 1.442695, %v5386_v59 }
0x328c   :  { %v5387_v56 = vmul.f32 1.442695, %v5385_v12  ;;  %v5394_v38 = vpop.permute.xlu0 %5393 }
0x328d   :  { %6386 = vpow2.f32 %v5389_v55  ;;  %v5396_v39 = vpop.permute.xlu1 %5395  ;;  %v5407_v57 = vsel %vm310_vm5, %v6909_v9, %v5394_v38 }
0x328e   :  { %6388 = vpow2.f32 %v5387_v56  ;;  %v5408_v31 = vsel %vm310_vm5, %v6911_v30, %v5396_v39 }
0x3297   :  { %v6387_v62 = vpop.eup %6386 }
0x3298   :  { %v6389_v25 = vpop.eup %6388  ;;  %5403 = vrot.lane.b32.xlu0 %v6387_v62, %s6401_s16 }
0x3299   :  { %5401 = vrot.lane.b32.xlu1 %v6389_v25, %s6401_s16 }
0x330a   :  { %v5404_v50 = vpop.permute.xlu0 %5403 }
0x330b   :  { %v5411_v34 = vsel %vm5409_vm9, %v5408_v31, %v5404_v50  ;;  %v5402_v4 = vpop.permute.xlu1 %5401 }
0x330c   :  { %v5414_v18 = vsel %vm5412_vm10, %v5411_v34, 0.0  ;;  %v5410_v10 = vsel %vm5409_vm9, %v5407_v57, %v5402_v4 }
0x330d   :  { %5416 = vst [vmem:[%s7345_s2 + $0x8] sm:$0xff] %v5414_v18  ;;  %v5413_v33 = vsel %vm5412_vm10, %v5410_v10, 0.0 }
0x330e   :  { %5415 = vst [vmem:[%s7345_s2] sm:$0xff] %v5413_v33 }

</bundles_post_ra>
